<compile_context>
chip_gen: v6e
topology: v6e:2x2x1
jax: 0.10.0
libtpu: 0.0.40
codegen_flags: <defaults>
</compile_context>

<pallas_src>
import functools
import math

import jax
import jax.numpy as jnp
from jax import lax
from jax.experimental import pallas as pl
from jax.experimental.pallas import tpu as pltpu

_MXU_DTYPE = jnp.bfloat16       # MXU inputs + residual-stream HBM activations
_LN_EPS = 1e-5                  # torch nn.LayerNorm default eps


# ----------------------------- per-chip config -----------------------------

def _chip_config():
    """Tile / scoped-VMEM targets per TPU generation (review items)."""
    vmem = 64 * 1024 * 1024
    try:
        vmem = int(getattr(pltpu.get_tpu_info(), "vmem_capacity_bytes", vmem))
    except Exception:           # non-TPU backend / older API -> conservative
        pass
    if vmem >= 100 * 1024 * 1024:       # v5e / v6e: 128 MiB physical VMEM
        return dict(tm=512, tn=512, tk=512, tq=512, tkv=256,
                    vmem_limit=96 * 1024 * 1024)
    # v7x: 64 MiB physical VMEM -> keep the scoped budget well under it
    return dict(tm=512, tn=256, tk=512, tq=256, tkv=256,
                vmem_limit=48 * 1024 * 1024)


_CFG = _chip_config()


def _compiler_params(semantics):
    # TODO(synk): on v7x verify the 'parallel' axes actually shard across the
    # two TensorCores; if not, switch the M / batch axes to pltpu.CORE_PARALLEL.
    return pltpu.CompilerParams(dimension_semantics=semantics,
                                vmem_limit_bytes=_CFG["vmem_limit"])


def _pick_tile(dim, target, align):
    """Largest tile <= target that divides `dim` and is `align`-aligned, else full dim."""
    if dim <= target:
        return dim
    t = (target // align) * align
    while t >= align:
        if dim % t == 0:
            return t
        t -= align
    return dim


# ----------------------------- elementwise helpers -----------------------------

def _erf_f32(x):
    # Abramowitz & Stegun 7.1.26 rational approximation (|err| < 1.5e-7):
    # reproduces PyTorch's exact (erf-based) nn.GELU to well below bf16
    # precision using only exp/rcp/abs/mul (EUP + VPU).
    a1, a2, a3, a4, a5 = (0.254829592, -0.284496736, 1.421413741,
                          -1.453152027, 1.061405429)
    p = 0.3275911
    sgn = jnp.where(x >= 0.0, 1.0, -1.0)
    ax = jnp.abs(x)
    t = pl.reciprocal(1.0 + p * ax, approx=True)   # divide -> EUP (review item)
    poly = ((((a5 * t + a4) * t + a3) * t + a2) * t + a1) * t
    return sgn * (1.0 - poly * jnp.exp(-ax * ax))


def _gelu_exact(x):
    return 0.5 * x * (1.0 + _erf_f32(x * 0.7071067811865476))


# ----------------------------- Pallas kernels -----------------------------

def _ln_matmul_kernel(*refs, n_parts, n_outs, gelu):
    """Fused LayerNorm (over the channel concat of the x parts) + matmul(s).

    Ref order: x parts | gammas | betas | weights (whole, one per output) |
               biases | outputs | xn scratch.
    The normalized bf16 row-tile is computed once per M tile (j == 0) into the
    VMEM scratch and reused for every output-column tile j.
    """
    idx = 0
    x_refs = refs[idx:idx + n_parts]; idx += n_parts
    g_refs = refs[idx:idx + n_parts]; idx += n_parts
    b_refs = refs[idx:idx + n_parts]; idx += n_parts
    w_refs = refs[idx:idx + n_outs]; idx += n_outs
    bias_refs = refs[idx:idx + n_outs]; idx += n_outs
    out_refs = refs[idx:idx + n_outs]; idx += n_outs
    xn_ref = refs[idx]

    @pl.when(pl.program_id(1) == 0)
    def _normalize():
        xs = [r[...].astype(jnp.float32) for r in x_refs]
        k_total = sum(x.shape[-1] for x in xs)
        total = xs[0].sum(axis=-1, keepdims=True)
        for x in xs[1:]:
            total = total + x.sum(axis=-1, keepdims=True)
        mu = total / k_total
        sq = jnp.square(xs[0] - mu).sum(axis=-1, keepdims=True)
        for x in xs[1:]:
            sq = sq + jnp.square(x - mu).sum(axis=-1, keepdims=True)
        inv = lax.rsqrt(sq / k_total + _LN_EPS)
        # LN statistics stay f32 (v5e-friendly); only the matmul input goes bf16.
        off = 0
        for p_i, x in enumerate(xs):
            pd = x.shape[-1]
            xn_ref[:, off:off + pd] = ((x - mu) * inv * g_refs[p_i][...]
                                       + b_refs[p_i][...]).astype(xn_ref.dtype)
            off += pd

    xn = xn_ref[...]                                  # (tm, K_total) bf16
    for o in range(n_outs):
        acc = jnp.dot(xn, w_refs[o][...], preferred_element_type=jnp.float32)
        acc = acc + bias_refs[o][...]
        if gelu:
            acc = _gelu_exact(acc)
        out_refs[o][...] = acc.astype(out_refs[o].dtype)


def _matmul_kernel(*refs, has_residual):
    """K-tiled matmul with f32 accumulator; bias (+ optional residual) at finalize."""
    if has_residual:
        x_ref, w_ref, b_ref, r_ref, o_ref, acc_ref = refs
    else:
        x_ref, w_ref, b_ref, o_ref, acc_ref = refs
    kk = pl.program_id(2)

    @pl.when(kk == 0)
    def _init():
        acc_ref[...] = jnp.zeros_like(acc_ref)

    w = w_ref[...]
    acc_ref[...] += jnp.dot(x_ref[...].astype(w.dtype), w,
                            preferred_element_type=jnp.float32)

    @pl.when(kk == pl.num_programs(2) - 1)
    def _finalize():
        y = acc_ref[...] + b_ref[...]
        if has_residual:
            y = y + r_ref[...].astype(jnp.float32)   # residual add in f32
        o_ref[...] = y.astype(o_ref.dtype)


def _flash_attn_kernel(q_ref, k_ref, v_ref, o_ref, m_ref, l_ref, acc_ref,
                       *, heads, head_dim):
    """Flash-style online-softmax attention.

    Heads are contiguous channel slices of the lane-dense (tq, D_model) tiles.
    acc is a single lane-dense (tq, D) f32 buffer; m/l are lane-packed
    (tq, heads).  The softmax-denominator row-sum is folded into the PV matmul
    via an appended ones column, removing one XLU lane-reduce per head per kv
    step.  1/sqrt(head_dim) is pre-folded into W_q."""
    kv = pl.program_id(2)

    @pl.when(kv == 0)
    def _init():
        m_ref[...] = jnp.full_like(m_ref, -jnp.inf)
        l_ref[...] = jnp.zeros_like(l_ref)
        acc_ref[...] = jnp.zeros_like(acc_ref)

    q = q_ref[0]                       # (tq,  D_model) bf16
    k = k_ref[0]                       # (tkv, D_model) bf16
    v = v_ref[0]
    tkv = k.shape[0]
    dn_qk = (((1,), (1,)), ((), ()))   # contract last dims (no explicit k.T)
    dn_pv = (((1,), (0,)), ((), ()))
    ones_col = jnp.ones((tkv, 1), v.dtype)

    for h in range(heads):
        sl = slice(h * head_dim, (h + 1) * head_dim)
        s = lax.dot_general(q[:, sl], k[:, sl], dn_qk,
                            preferred_element_type=jnp.float32)   # (tq, tkv)
        m_prev = m_ref[:, h:h + 1]
        m_new = jnp.maximum(m_prev, jnp.max(s, axis=-1, keepdims=True))
        alpha = jnp.exp(m_prev - m_new)
        p = jnp.exp(s - m_new)
        # Ones column folded into the PV matmul: last output column is sum_j p.
        v_aug = jnp.concatenate([v[:, sl], ones_col], axis=-1)    # (tkv, hd+1)
        pv = lax.dot_general(p.astype(v.dtype), v_aug, dn_pv,
                             preferred_element_type=jnp.float32)  # (tq, hd+1)
        acc_ref[:, sl] = alpha * acc_ref[:, sl] + pv[:, :head_dim]
        l_ref[:, h:h + 1] = alpha * l_ref[:, h:h + 1] + pv[:, head_dim:head_dim + 1]
        m_ref[:, h:h + 1] = m_new

    @pl.when(kv == pl.num_programs(2) - 1)
    def _finalize():
        tq = acc_ref.shape[0]
        inv = jnp.concatenate(
            [jnp.broadcast_to(pl.reciprocal(l_ref[:, h:h + 1], approx=True),
                              (tq, head_dim))
             for h in range(heads)], axis=-1)                      # (tq, D) f32
        # Single full-width multiply + cast + unmasked lane-dense store.
        o_ref[0] = (acc_ref[...] * inv).astype(o_ref.dtype)


# ----------------------------- pallas_call wrappers -----------------------------

def _ln_matmul(x_parts, gammas, betas, weights, biases, *, gelu, out_dtype):
    """Fused LayerNorm + one-or-more matmuls sharing the normalized input.

    x_parts : list of (M, K_p) slabs whose channel concat is the LN input
    weights : list (one per output) of whole (K_total, W) matrices
    biases  : list of (1, W) biases (one per output)
    Returns a list of (M, W) outputs.
    """
    n_parts, n_outs = len(x_parts), len(weights)
    M = x_parts[0].shape[0]
    K_total = sum(x.shape[1] for x in x_parts)
    W = weights[0].shape[1]
    tm = _pick_tile(M, _CFG["tm"], 16)
    tn = _pick_tile(W, _CFG["tn"], 128)
    grid = (M // tm, W // tn)

    arrays, in_specs = [], []
    for x in x_parts:
        arrays.append(x)
        in_specs.append(pl.BlockSpec((tm, x.shape[1]), lambda i, j: (i, 0)))
    for g in gammas:
        arrays.append(g)
        in_specs.append(pl.BlockSpec(g.shape, lambda i, j: (0, 0)))
    for b in betas:
        arrays.append(b)
        in_specs.append(pl.BlockSpec(b.shape, lambda i, j: (0, 0)))
    for w in weights:
        arrays.append(w)
        in_specs.append(pl.BlockSpec((K_total, tn), lambda i, j: (0, j)))
    for b in biases:
        arrays.append(b)
        in_specs.append(pl.BlockSpec((1, tn), lambda i, j: (0, j)))

    outs = pl.pallas_call(
        functools.partial(_ln_matmul_kernel, n_parts=n_parts, n_outs=n_outs,
                          gelu=gelu),
        grid=grid,
        in_specs=in_specs,
        out_specs=[pl.BlockSpec((tm, tn), lambda i, j: (i, j))
                   for _ in range(n_outs)],
        out_shape=[jax.ShapeDtypeStruct((M, W), out_dtype)
                   for _ in range(n_outs)],
        scratch_shapes=[pltpu.VMEM((tm, K_total), _MXU_DTYPE)],   # cached xn
        # j must run sequentially per i so the xn scratch stays valid.
        compiler_params=_compiler_params(("parallel", "arbitrary")),
    )(*arrays)
    return list(outs)


def _matmul(x, w, bias, residual=None, *, out_dtype=_MXU_DTYPE):
    """Tiled, pipelined matmul: out = x @ w + bias (+ residual).

    Grid (M/tm, N/tn, K/tk); M/N 'parallel' (megacore), K 'arbitrary' with an
    f32 accumulator scratch.  Output dtype defaults to bf16 so the residual
    stream travels HBM at half the bytes (review item).  No residual-buffer
    donation: encoder outputs double as decoder skips (correctness item).
    """
    M, K = x.shape
    N = w.shape[1]
    tm = _pick_tile(M, _CFG["tm"], 16)
    tn = _pick_tile(N, _CFG["tn"], 128)
    tk = _pick_tile(K, _CFG["tk"], 128)
    grid = (M // tm, N // tn, K // tk)

    arrays = [x, w, bias]
    in_specs = [
        pl.BlockSpec((tm, tk), lambda i, j, k: (i, k)),
        pl.BlockSpec((tk, tn), lambda i, j, k: (k, j)),
        pl.BlockSpec((1, tn), lambda i, j, k: (0, j)),
    ]
    if residual is not None:
        arrays.append(residual)
        in_specs.append(pl.BlockSpec((tm, tn), lambda i, j, k: (i, j)))

    return pl.pallas_call(
        functools.partial(_matmul_kernel, has_residual=residual is not None),
        grid=grid,
        in_specs=in_specs,
        out_specs=pl.BlockSpec((tm, tn), lambda i, j, k: (i, j)),
        out_shape=jax.ShapeDtypeStruct((M, N), out_dtype),
        scratch_shapes=[pltpu.VMEM((tm, tn), jnp.float32)],
        compiler_params=_compiler_params(("parallel", "parallel", "arbitrary")),
    )(*arrays)


def _attention(q, k, v, heads):
    """Flash attention over (B, S, D_model) q/k/v (heads = contiguous channel chunks)."""
    B, S, D = q.shape
    hd = D // heads
    tq = _pick_tile(S, _CFG["tq"], 16)     # bf16 sublane-pack alignment
    tkv = _pick_tile(S, _CFG["tkv"], 128)  # lane / contraction alignment
    grid = (B, S // tq, S // tkv)

    q_spec = pl.BlockSpec((1, tq, D), lambda b, qi, ki: (b, qi, 0))
    kv_spec = pl.BlockSpec((1, tkv, D), lambda b, qi, ki: (b, ki, 0))

    return pl.pallas_call(
        functools.partial(_flash_attn_kernel, heads=heads, head_dim=hd),
        grid=grid,
        in_specs=[q_spec, kv_spec, kv_spec],
        out_specs=q_spec,
        out_shape=jax.ShapeDtypeStruct((B, S, D), q.dtype),
        scratch_shapes=[
            pltpu.VMEM((tq, heads), jnp.float32),   # running max   (lane-packed)
            pltpu.VMEM((tq, heads), jnp.float32),   # running denom (lane-packed)
            pltpu.VMEM((tq, D), jnp.float32),       # lane-dense running output
        ],
        compiler_params=_compiler_params(("parallel", "parallel", "arbitrary")),
    )(q, k, v)


# ----------------------------- model pieces -----------------------------

def _transformer_block(p, x_parts, heads, B, S):
    """Pre-LN MHA + pre-LN FF with residuals (== TransformerBlock.forward, mask=None).

    `x_parts` is a list of (B*S, d_p) slabs whose channel concatenation is the
    block input; the decoder passes [x, skip] so torch.cat never hits HBM.
    Returns the block output in the same per-part layout.
    """
    d_model = sum(x.shape[1] for x in x_parts)

    # ---- attention sub-block: x = x + out_proj(MHA(norm1(x))) ----
    q, k, v = _ln_matmul(x_parts, p["ln1_g"], p["ln1_b"],
                         [p["wq"], p["wk"], p["wv"]],
                         [p["bq"], p["bk"], p["bv"]],
                         gelu=False, out_dtype=_MXU_DTYPE)
    ctx = _attention(q.reshape(B, S, d_model), k.reshape(B, S, d_model),
                     v.reshape(B, S, d_model), heads).reshape(B * S, d_model)
    y_parts = [_matmul(ctx, p["wo"][i], p["bo"][i], residual=x_parts[i])
               for i in range(len(x_parts))]

    # ---- feed-forward sub-block: x = x + W2(GELU(W1(norm2(x)))) ----
    (h,) = _ln_matmul(y_parts, p["ln2_g"], p["ln2_b"], [p["w1"]], [p["b1"]],
                      gelu=True, out_dtype=_MXU_DTYPE)
    return [_matmul(h, p["w2"][i], p["b2"][i], residual=y_parts[i])
            for i in range(len(y_parts))]


def unet_t_forward(params, x, mask=None, heads=4):
    B, S, D = x.shape
    h = x.reshape(B * S, D)

    skips = []
    for blk in params["encoder"]:
        (h,) = _transformer_block(blk, [h], heads, B, S)
        skips.append(h)

    for blk, skip in zip(params["decoder"], reversed(skips)):
        # torch.cat([x, skip], -1) is handled inside the block via two-part
        # LayerNorm and column-split residual weights (no (B,S,2*dim) HBM concat).
        parts = _transformer_block(blk, [h, skip], heads, B, S)
        # TODO(synk): the reference forward is shape-inconsistent for depth >= 4
        # (the skip concat keeps growing past the decoder width 2*dim and past
        # to_out's in_features=dim); as before we keep the first `dim` channels
        # of each decoder output so the chain and to_out stay well-formed.
        h = parts[0]

    out = _matmul(h, params["to_out_w"], params["to_out_b"], out_dtype=x.dtype)
    out = out.reshape(B, S, D)
    if mask is not None:
        # TODO(synk): reference also forwards the same `mask` as attn_mask with
        # an incompatible (L, L) shape; only the final masked_fill is applied.
        out = jnp.where(mask[..., None], out, 0.0)
    return out


# ----------------------------- deterministic params -----------------------------

def _init_block(key, d, ff_mult):
    ks = jax.random.split(key, 8)
    n = lambda k, shape, s=0.02: s * jax.random.normal(k, shape, jnp.float32)
    return dict(
        ln1_g=jnp.ones((d,), jnp.float32), ln1_b=jnp.zeros((d,), jnp.float32),
        ln2_g=jnp.ones((d,), jnp.float32), ln2_b=jnp.zeros((d,), jnp.float32),
        # nn.MultiheadAttention: in_proj (d -> 3d) + bias, out_proj (d -> d) + bias
        w_qkv=n(ks[0], (d, 3 * d)), b_qkv=n(ks[1], (3 * d,)),
        w_o=n(ks[2], (d, d)), b_o=n(ks[3], (d,)),
        # ff: Linear(d, d*ff_mult), GELU, Linear(d*ff_mult, d)
        w_ff1=n(ks[4], (d, d * ff_mult)), b_ff1=n(ks[5], (d * ff_mult,)),
        w_ff2=n(ks[6], (d * ff_mult, d)), b_ff2=n(ks[7], (d,)),
    )


def init_unet_t(key, dim, depth, ff_mult):
    half = depth // 2
    keys = jax.random.split(key, depth + 2)
    enc = [_init_block(keys[i], dim, ff_mult) for i in range(half)]
    dec = [_init_block(keys[half + i], dim * 2, ff_mult) for i in range(half)]
    return dict(
        encoder=enc, decoder=dec,
        to_out_w=0.02 * jax.random.normal(keys[-2], (dim, dim), jnp.float32),
        to_out_b=0.02 * jax.random.normal(keys[-1], (dim,), jnp.float32),
    )


def _split_rows(w, part_dims):
    out, off = [], 0
    for pd in part_dims:
        out.append(w[off:off + pd])
        off += pd
    return out


def _split_cols(w, part_dims):
    out, off = [], 0
    for pd in part_dims:
        out.append(w[:, off:off + pd])
        off += pd
    return out


def _prepare_block(blk, part_dims, heads):
    """One-time re-layout of torch-style block params into the kernel layout:
    bf16 matmul weights, (1, n) biases, 1/sqrt(hd) folded into W_q/b_q, LN
    gamma/beta split along the x/skip concat boundary, and out-proj / FF2
    weights column-split per residual part (QKV / FF1 weights stay whole)."""
    d = sum(part_dims)
    scale = 1.0 / math.sqrt(d // heads)
    wq, wk, wv = (blk["w_qkv"][:, :d], blk["w_qkv"][:, d:2 * d],
                  blk["w_qkv"][:, 2 * d:])
    bq, bk, bv = blk["b_qkv"][:d], blk["b_qkv"][d:2 * d], blk["b_qkv"][2 * d:]
    cast = lambda w: w.astype(_MXU_DTYPE)
    row = lambda b: b.reshape(1, -1).astype(jnp.float32)
    return dict(
        ln1_g=[row(g) for g in _split_rows(blk["ln1_g"], part_dims)],
        ln1_b=[row(b) for b in _split_rows(blk["ln1_b"], part_dims)],
        ln2_g=[row(g) for g in _split_rows(blk["ln2_g"], part_dims)],
        ln2_b=[row(b) for b in _split_rows(blk["ln2_b"], part_dims)],
        wq=cast(wq * scale), wk=cast(wk), wv=cast(wv),
        bq=row(bq * scale), bk=row(bk), bv=row(bv),
        wo=[cast(w) for w in _split_cols(blk["w_o"], part_dims)],
        bo=[row(b) for b in _split_rows(blk["b_o"], part_dims)],
        w1=cast(blk["w_ff1"]), b1=row(blk["b_ff1"]),
        w2=[cast(w) for w in _split_cols(blk["w_ff2"], part_dims)],
        b2=[row(b) for b in _split_rows(blk["b_ff2"], part_dims)],
    )


def prepare_params(params, dim, heads):
    return dict(
        encoder=[_prepare_block(b, (dim,), heads) for b in params["encoder"]],
        decoder=[_prepare_block(b, (dim, dim), heads) for b in params["decoder"]],
        to_out_w=params["to_out_w"].astype(_MXU_DTYPE),
        to_out_b=params["to_out_b"].reshape(1, -1).astype(jnp.float32),
    )


# ----------------------------- demo -----------------------------

if __name__ == "__main__":
    DIM, DEPTH, HEADS, FF_MULT = 32, 4, 4, 4     # small stand-ins for 1024/24/16/4
    B, S = 2, 8

    key = jax.random.PRNGKey(0)
    pkey, xkey = jax.random.split(key)
    raw_params = init_unet_t(pkey, DIM, DEPTH, FF_MULT)
    params = prepare_params(raw_params, DIM, HEADS)   # one-time, outside jit
    x = jax.random.normal(xkey, (B, S, DIM), jnp.float32)

    fwd = jax.jit(functools.partial(unet_t_forward, heads=HEADS))
    out = jax.block_until_ready(fwd(params, x))

    assert out.shape == (B, S, DIM), out.shape
    assert bool(jnp.all(jnp.isfinite(out)))
    print("KERNEL_OK")
</pallas_src>

<mosaic_0001>
module attributes {stable_mosaic.version = 11 : i64} {
  func.func @_ln_matmul_kernel(%arg0: i32, %arg1: i32, %arg2: memref<16x32xf32, #tpu.memory_space<vmem>>, %arg3: memref<1x32xf32, #tpu.memory_space<vmem>>, %arg4: memref<1x32xf32, #tpu.memory_space<vmem>>, %arg5: memref<32x32xbf16, #tpu.memory_space<vmem>>, %arg6: memref<32x32xbf16, #tpu.memory_space<vmem>>, %arg7: memref<32x32xbf16, #tpu.memory_space<vmem>>, %arg8: memref<1x32xf32, #tpu.memory_space<vmem>>, %arg9: memref<1x32xf32, #tpu.memory_space<vmem>>, %arg10: memref<1x32xf32, #tpu.memory_space<vmem>>, %arg11: memref<16x32xbf16, #tpu.memory_space<vmem>>, %arg12: memref<16x32xbf16, #tpu.memory_space<vmem>>, %arg13: memref<16x32xbf16, #tpu.memory_space<vmem>>, %arg14: memref<16x32xbf16, #tpu.memory_space<vmem>>) attributes {dimension_semantics = [#tpu.dimension_semantics<parallel>, #tpu.dimension_semantics<arbitrary>], iteration_bounds = array<i64: 1, 1>, scalar_prefetch = 0 : i64, scratch_operands = 1 : i64, tpu.core_type = #tpu.core_type<tc>, window_params = [{transform_indices = @transform_0, window_bounds = array<i64: 16, 32>}, {pipeline_mode = #tpu.pipeline_mode<synchronous>, transform_indices = @transform_1, window_bounds = array<i64: 1, 32>}, {pipeline_mode = #tpu.pipeline_mode<synchronous>, transform_indices = @transform_2, window_bounds = array<i64: 1, 32>}, {transform_indices = @transform_3, window_bounds = array<i64: 32, 32>}, {transform_indices = @transform_4, window_bounds = array<i64: 32, 32>}, {transform_indices = @transform_5, window_bounds = array<i64: 32, 32>}, {transform_indices = @transform_6, window_bounds = array<i64: 1, 32>}, {transform_indices = @transform_7, window_bounds = array<i64: 1, 32>}, {transform_indices = @transform_8, window_bounds = array<i64: 1, 32>}, {transform_indices = @transform_9, window_bounds = array<i64: 16, 32>}, {transform_indices = @transform_10, window_bounds = array<i64: 16, 32>}, {transform_indices = @transform_11, window_bounds = array<i64: 16, 32>}]} {
    %c0_i32 = arith.constant 0 : i32
    %0 = arith.cmpi eq, %arg1, %c0_i32 : i32
    %1 = arith.extui %0 : i1 to i32
    %c0_i32_0 = arith.constant 0 : i32
    %2 = arith.cmpi ne, %1, %c0_i32_0 : i32
    scf.if %2 {
      %c0_22 = arith.constant 0 : index
      %c0_23 = arith.constant 0 : index
      %25 = vector.load %arg2[%c0_22, %c0_23] : memref<16x32xf32, #tpu.memory_space<vmem>>, vector<16x32xf32>
      %cst_24 = arith.constant dense<0.000000e+00> : vector<16xf32>
      %26 = vector.multi_reduction <add>, %25, %cst_24 [1] : vector<16x32xf32> to vector<16xf32>
      %27 = vector.shape_cast %26 : vector<16xf32> to vector<16x1xf32>
      %cst_25 = arith.constant 3.200000e+01 : f32
      %28 = vector.broadcast %cst_25 : f32 to vector<16x1xf32>
      %29 = arith.divf %27, %28 : vector<16x1xf32>
      %30 = vector.broadcast %29 : vector<16x1xf32> to vector<16x32xf32>
      %31 = arith.subf %25, %30 : vector<16x32xf32>
      %32 = arith.mulf %31, %31 : vector<16x32xf32>
      %cst_26 = arith.constant dense<0.000000e+00> : vector<16xf32>
      %33 = vector.multi_reduction <add>, %32, %cst_26 [1] : vector<16x32xf32> to vector<16xf32>
      %34 = vector.shape_cast %33 : vector<16xf32> to vector<16x1xf32>
      %cst_27 = arith.constant 3.200000e+01 : f32
      %35 = vector.broadcast %cst_27 : f32 to vector<16x1xf32>
      %36 = arith.divf %34, %35 : vector<16x1xf32>
      %cst_28 = arith.constant 9.99999974E-6 : f32
      %37 = vector.broadcast %cst_28 : f32 to vector<16x1xf32>
      %38 = arith.addf %36, %37 : vector<16x1xf32>
      %39 = math.rsqrt %38 : vector<16x1xf32>
      %40 = vector.broadcast %29 : vector<16x1xf32> to vector<16x32xf32>
      %41 = arith.subf %25, %40 : vector<16x32xf32>
      %42 = vector.broadcast %39 : vector<16x1xf32> to vector<16x32xf32>
      %43 = arith.mulf %41, %42 : vector<16x32xf32>
      %c0_29 = arith.constant 0 : index
      %c0_30 = arith.constant 0 : index
      %44 = vector.load %arg3[%c0_29, %c0_30] : memref<1x32xf32, #tpu.memory_space<vmem>>, vector<1x32xf32>
      %45 = vector.broadcast %44 : vector<1x32xf32> to vector<16x32xf32>
      %46 = arith.mulf %43, %45 : vector<16x32xf32>
      %c0_31 = arith.constant 0 : index
      %c0_32 = arith.constant 0 : index
      %47 = vector.load %arg4[%c0_31, %c0_32] : memref<1x32xf32, #tpu.memory_space<vmem>>, vector<1x32xf32>
      %48 = vector.broadcast %47 : vector<1x32xf32> to vector<16x32xf32>
      %49 = arith.addf %46, %48 : vector<16x32xf32>
      %50 = arith.truncf %49 : vector<16x32xf32> to vector<16x32xbf16>
      %c0_33 = arith.constant 0 : index
      %c0_34 = arith.constant 0 : index
      %51 = vector.load %arg14[%c0_33, %c0_34] : memref<16x32xbf16, #tpu.memory_space<vmem>>, vector<16x32xbf16>
      tpu.vector_store %arg14[%c0_33, %c0_34], %50 {strides = array<i32>} : memref<16x32xbf16, #tpu.memory_space<vmem>>, vector<16x32xbf16>,
    } else {
    }
    %c0 = arith.constant 0 : index
    %c0_1 = arith.constant 0 : index
    %3 = vector.load %arg14[%c0, %c0_1] : memref<16x32xbf16, #tpu.memory_space<vmem>>, vector<16x32xbf16>
    %c0_2 = arith.constant 0 : index
    %c0_3 = arith.constant 0 : index
    %4 = vector.load %arg5[%c0_2, %c0_3] : memref<32x32xbf16, #tpu.memory_space<vmem>>, vector<32x32xbf16>
    %cst = arith.constant dense<0.000000e+00> : vector<16x32xf32>
    %5 = tpu.matmul %3, %4, %cst {dimension_numbers = #tpu.dot_dimension_numbers<[1], [0], [0], [1], [0, 0, 1, 1], [], []>} : vector<16x32xbf16>, vector<32x32xbf16>, vector<16x32xf32> -> vector<16x32xf32>
    %c0_4 = arith.constant 0 : index
    %c0_5 = arith.constant 0 : index
    %6 = vector.load %arg8[%c0_4, %c0_5] : memref<1x32xf32, #tpu.memory_space<vmem>>, vector<1x32xf32>
    %7 = vector.broadcast %6 : vector<1x32xf32> to vector<16x32xf32>
    %8 = arith.addf %5, %7 : vector<16x32xf32>
    %9 = arith.truncf %8 : vector<16x32xf32> to vector<16x32xbf16>
    %c0_6 = arith.constant 0 : index
    %c0_7 = arith.constant 0 : index
    %10 = vector.load %arg11[%c0_6, %c0_7] : memref<16x32xbf16, #tpu.memory_space<vmem>>, vector<16x32xbf16>
    tpu.vector_store %arg11[%c0_6, %c0_7], %9 {strides = array<i32>} : memref<16x32xbf16, #tpu.memory_space<vmem>>, vector<16x32xbf16>,
    %c0_8 = arith.constant 0 : index
    %c0_9 = arith.constant 0 : index
    %11 = vector.load %arg6[%c0_8, %c0_9] : memref<32x32xbf16, #tpu.memory_space<vmem>>, vector<32x32xbf16>
    %cst_10 = arith.constant dense<0.000000e+00> : vector<16x32xf32>
    %12 = tpu.matmul %3, %11, %cst_10 {dimension_numbers = #tpu.dot_dimension_numbers<[1], [0], [0], [1], [0, 0, 1, 1], [], []>} : vector<16x32xbf16>, vector<32x32xbf16>, vector<16x32xf32> -> vector<16x32xf32>
    %c0_11 = arith.constant 0 : index
    %c0_12 = arith.constant 0 : index
    %13 = vector.load %arg9[%c0_11, %c0_12] : memref<1x32xf32, #tpu.memory_space<vmem>>, vector<1x32xf32>
    %14 = vector.broadcast %13 : vector<1x32xf32> to vector<16x32xf32>
    %15 = arith.addf %12, %14 : vector<16x32xf32>
    %16 = arith.truncf %15 : vector<16x32xf32> to vector<16x32xbf16>
    %c0_13 = arith.constant 0 : index
    %c0_14 = arith.constant 0 : index
    %17 = vector.load %arg12[%c0_13, %c0_14] : memref<16x32xbf16, #tpu.memory_space<vmem>>, vector<16x32xbf16>
    tpu.vector_store %arg12[%c0_13, %c0_14], %16 {strides = array<i32>} : memref<16x32xbf16, #tpu.memory_space<vmem>>, vector<16x32xbf16>,
    %c0_15 = arith.constant 0 : index
    %c0_16 = arith.constant 0 : index
    %18 = vector.load %arg7[%c0_15, %c0_16] : memref<32x32xbf16, #tpu.memory_space<vmem>>, vector<32x32xbf16>
    %cst_17 = arith.constant dense<0.000000e+00> : vector<16x32xf32>
    %19 = tpu.matmul %3, %18, %cst_17 {dimension_numbers = #tpu.dot_dimension_numbers<[1], [0], [0], [1], [0, 0, 1, 1], [], []>} : vector<16x32xbf16>, vector<32x32xbf16>, vector<16x32xf32> -> vector<16x32xf32>
    %c0_18 = arith.constant 0 : index
    %c0_19 = arith.constant 0 : index
    %20 = vector.load %arg10[%c0_18, %c0_19] : memref<1x32xf32, #tpu.memory_space<vmem>>, vector<1x32xf32>
    %21 = vector.broadcast %20 : vector<1x32xf32> to vector<16x32xf32>
    %22 = arith.addf %19, %21 : vector<16x32xf32>
    %23 = arith.truncf %22 : vector<16x32xf32> to vector<16x32xbf16>
    %c0_20 = arith.constant 0 : index
    %c0_21 = arith.constant 0 : index
    %24 = vector.load %arg13[%c0_20, %c0_21] : memref<16x32xbf16, #tpu.memory_space<vmem>>, vector<16x32xbf16>
    tpu.vector_store %arg13[%c0_20, %c0_21], %23 {strides = array<i32>} : memref<16x32xbf16, #tpu.memory_space<vmem>>, vector<16x32xbf16>,
    return
  }
  func.func @transform_0(%arg0: i32, %arg1: i32) -> (i32, i32) {
    %c0_i32 = arith.constant 0 : i32
    %c0_i32_0 = arith.constant 0 : i32
    return %arg0, %c0_i32 : i32, i32
  }
  func.func @transform_1(%arg0: i32, %arg1: i32) -> (i32, i32) {
    %c0_i32 = arith.constant 0 : i32
    %c0_i32_0 = arith.constant 0 : i32
    %c0_i32_1 = arith.constant 0 : i32
    return %c0_i32, %c0_i32_0 : i32, i32
  }
  func.func @transform_2(%arg0: i32, %arg1: i32) -> (i32, i32) {
    %c0_i32 = arith.constant 0 : i32
    %c0_i32_0 = arith.constant 0 : i32
    %c0_i32_1 = arith.constant 0 : i32
    return %c0_i32, %c0_i32_0 : i32, i32
  }
  func.func @transform_3(%arg0: i32, %arg1: i32) -> (i32, i32) {
    %c0_i32 = arith.constant 0 : i32
    %c0_i32_0 = arith.constant 0 : i32
    return %c0_i32, %arg1 : i32, i32
  }
  func.func @transform_4(%arg0: i32, %arg1: i32) -> (i32, i32) {
    %c0_i32 = arith.constant 0 : i32
    %c0_i32_0 = arith.constant 0 : i32
    return %c0_i32, %arg1 : i32, i32
  }
  func.func @transform_5(%arg0: i32, %arg1: i32) -> (i32, i32) {
    %c0_i32 = arith.constant 0 : i32
    %c0_i32_0 = arith.constant 0 : i32
    return %c0_i32, %arg1 : i32, i32
  }
  func.func @transform_6(%arg0: i32, %arg1: i32) -> (i32, i32) {
    %c0_i32 = arith.constant 0 : i32
    %c0_i32_0 = arith.constant 0 : i32
    return %c0_i32, %arg1 : i32, i32
  }
  func.func @transform_7(%arg0: i32, %arg1: i32) -> (i32, i32) {
    %c0_i32 = arith.constant 0 : i32
    %c0_i32_0 = arith.constant 0 : i32
    return %c0_i32, %arg1 : i32, i32
  }
  func.func @transform_8(%arg0: i32, %arg1: i32) -> (i32, i32) {
    %c0_i32 = arith.constant 0 : i32
    %c0_i32_0 = arith.constant 0 : i32
    return %c0_i32, %arg1 : i32, i32
  }
  func.func @transform_9(%arg0: i32, %arg1: i32) -> (i32, i32) {
    %c0_i32 = arith.constant 0 : i32
    return %arg0, %arg1 : i32, i32
  }
  func.func @transform_10(%arg0: i32, %arg1: i32) -> (i32, i32) {
    %c0_i32 = arith.constant 0 : i32
    return %arg0, %arg1 : i32, i32
  }
  func.func @transform_11(%arg0: i32, %arg1: i32) -> (i32, i32) {
    %c0_i32 = arith.constant 0 : i32
    return %arg0, %arg1 : i32, i32
  }
}

module attributes {stable_mosaic.version = 11 : i64} {
  func.func @_ln_matmul_kernel(%arg0: i32, %arg1: i32, %arg2: memref<16x32xbf16, #tpu.memory_space<vmem>>, %arg3: memref<1x32xf32, #tpu.memory_space<vmem>>, %arg4: memref<1x32xf32, #tpu.memory_space<vmem>>, %arg5: memref<32x128xbf16, #tpu.memory_space<vmem>>, %arg6: memref<1x128xf32, #tpu.memory_space<vmem>>, %arg7: memref<16x128xbf16, #tpu.memory_space<vmem>>, %arg8: memref<16x32xbf16, #tpu.memory_space<vmem>>) attributes {dimension_semantics = [#tpu.dimension_semantics<parallel>, #tpu.dimension_semantics<arbitrary>], iteration_bounds = array<i64: 1, 1>, scalar_prefetch = 0 : i64, scratch_operands = 1 : i64, tpu.core_type = #tpu.core_type<tc>, window_params = [{transform_indices = @transform_0, window_bounds = array<i64: 16, 32>}, {pipeline_mode = #tpu.pipeline_mode<synchronous>, transform_indices = @transform_1, window_bounds = array<i64: 1, 32>}, {pipeline_mode = #tpu.pipeline_mode<synchronous>, transform_indices = @transform_2, window_bounds = array<i64: 1, 32>}, {transform_indices = @transform_3, window_bounds = array<i64: 32, 128>}, {transform_indices = @transform_4, window_bounds = array<i64: 1, 128>}, {transform_indices = @transform_5, window_bounds = array<i64: 16, 128>}]} {
    %c0_i32 = arith.constant 0 : i32
    %0 = arith.cmpi eq, %arg1, %c0_i32 : i32
    %1 = arith.extui %0 : i1 to i32
    %c0_i32_0 = arith.constant 0 : i32
    %2 = arith.cmpi ne, %1, %c0_i32_0 : i32
    scf.if %2 {
      %c0_23 = arith.constant 0 : index
      %c0_24 = arith.constant 0 : index
      %51 = vector.load %arg2[%c0_23, %c0_24] : memref<16x32xbf16, #tpu.memory_space<vmem>>, vector<16x32xbf16>
      %52 = arith.extf %51 : vector<16x32xbf16> to vector<16x32xf32>
      %cst_25 = arith.constant dense<0.000000e+00> : vector<16xf32>
      %53 = vector.multi_reduction <add>, %52, %cst_25 [1] : vector<16x32xf32> to vector<16xf32>
      %54 = vector.shape_cast %53 : vector<16xf32> to vector<16x1xf32>
      %cst_26 = arith.constant 3.200000e+01 : f32
      %55 = vector.broadcast %cst_26 : f32 to vector<16x1xf32>
      %56 = arith.divf %54, %55 : vector<16x1xf32>
      %57 = vector.broadcast %56 : vector<16x1xf32> to vector<16x32xf32>
      %58 = arith.subf %52, %57 : vector<16x32xf32>
      %59 = arith.mulf %58, %58 : vector<16x32xf32>
      %cst_27 = arith.constant dense<0.000000e+00> : vector<16xf32>
      %60 = vector.multi_reduction <add>, %59, %cst_27 [1] : vector<16x32xf32> to vector<16xf32>
      %61 = vector.shape_cast %60 : vector<16xf32> to vector<16x1xf32>
      %cst_28 = arith.constant 3.200000e+01 : f32
      %62 = vector.broadcast %cst_28 : f32 to vector<16x1xf32>
      %63 = arith.divf %61, %62 : vector<16x1xf32>
      %cst_29 = arith.constant 9.99999974E-6 : f32
      %64 = vector.broadcast %cst_29 : f32 to vector<16x1xf32>
      %65 = arith.addf %63, %64 : vector<16x1xf32>
      %66 = math.rsqrt %65 : vector<16x1xf32>
      %67 = vector.broadcast %56 : vector<16x1xf32> to vector<16x32xf32>
      %68 = arith.subf %52, %67 : vector<16x32xf32>
      %69 = vector.broadcast %66 : vector<16x1xf32> to vector<16x32xf32>
      %70 = arith.mulf %68, %69 : vector<16x32xf32>
      %c0_30 = arith.constant 0 : index
      %c0_31 = arith.constant 0 : index
      %71 = vector.load %arg3[%c0_30, %c0_31] : memref<1x32xf32, #tpu.memory_space<vmem>>, vector<1x32xf32>
      %72 = vector.broadcast %71 : vector<1x32xf32> to vector<16x32xf32>
      %73 = arith.mulf %70, %72 : vector<16x32xf32>
      %c0_32 = arith.constant 0 : index
      %c0_33 = arith.constant 0 : index
      %74 = vector.load %arg4[%c0_32, %c0_33] : memref<1x32xf32, #tpu.memory_space<vmem>>, vector<1x32xf32>
      %75 = vector.broadcast %74 : vector<1x32xf32> to vector<16x32xf32>
      %76 = arith.addf %73, %75 : vector<16x32xf32>
      %77 = arith.truncf %76 : vector<16x32xf32> to vector<16x32xbf16>
      %c0_34 = arith.constant 0 : index
      %c0_35 = arith.constant 0 : index
      %78 = vector.load %arg8[%c0_34, %c0_35] : memref<16x32xbf16, #tpu.memory_space<vmem>>, vector<16x32xbf16>
      tpu.vector_store %arg8[%c0_34, %c0_35], %77 {strides = array<i32>} : memref<16x32xbf16, #tpu.memory_space<vmem>>, vector<16x32xbf16>,
    } else {
    }
    %c0 = arith.constant 0 : index
    %c0_1 = arith.constant 0 : index
    %3 = vector.load %arg8[%c0, %c0_1] : memref<16x32xbf16, #tpu.memory_space<vmem>>, vector<16x32xbf16>
    %c0_2 = arith.constant 0 : index
    %c0_3 = arith.constant 0 : index
    %4 = vector.load %arg5[%c0_2, %c0_3] : memref<32x128xbf16, #tpu.memory_space<vmem>>, vector<32x128xbf16>
    %cst = arith.constant dense<0.000000e+00> : vector<16x128xf32>
    %5 = tpu.matmul %3, %4, %cst {dimension_numbers = #tpu.dot_dimension_numbers<[1], [0], [0], [1], [0, 0, 1, 1], [], []>} : vector<16x32xbf16>, vector<32x128xbf16>, vector<16x128xf32> -> vector<16x128xf32>
    %c0_4 = arith.constant 0 : index
    %c0_5 = arith.constant 0 : index
    %6 = vector.load %arg6[%c0_4, %c0_5] : memref<1x128xf32, #tpu.memory_space<vmem>>, vector<1x128xf32>
    %7 = vector.broadcast %6 : vector<1x128xf32> to vector<16x128xf32>
    %8 = arith.addf %5, %7 : vector<16x128xf32>
    %cst_6 = arith.constant 5.000000e-01 : f32
    %9 = vector.broadcast %cst_6 : f32 to vector<16x128xf32>
    %10 = arith.mulf %9, %8 : vector<16x128xf32>
    %cst_7 = arith.constant 0.707106769 : f32
    %11 = vector.broadcast %cst_7 : f32 to vector<16x128xf32>
    %12 = arith.mulf %8, %11 : vector<16x128xf32>
    %cst_8 = arith.constant 0.000000e+00 : f32
    %13 = vector.broadcast %cst_8 : f32 to vector<16x128xf32>
    %14 = arith.cmpf oge, %12, %13 : vector<16x128xf32>
    %cst_9 = arith.constant 1.000000e+00 : f32
    %cst_10 = arith.constant -1.000000e+00 : f32
    %15 = vector.broadcast %cst_9 : f32 to vector<16x128xf32>
    %16 = vector.broadcast %cst_10 : f32 to vector<16x128xf32>
    %17 = arith.select %14, %15, %16 : vector<16x128xi1>, vector<16x128xf32>
    %18 = math.absf %12 : vector<16x128xf32>
    %cst_11 = arith.constant 0.327591091 : f32
    %19 = vector.broadcast %cst_11 : f32 to vector<16x128xf32>
    %20 = arith.mulf %19, %18 : vector<16x128xf32>
    %cst_12 = arith.constant 1.000000e+00 : f32
    %21 = vector.broadcast %cst_12 : f32 to vector<16x128xf32>
    %22 = arith.addf %21, %20 : vector<16x128xf32>
    %23 = tpu.reciprocal %22 {approx = true} : vector<16x128xf32> -> vector<16x128xf32>
    %cst_13 = arith.constant 1.06140542 : f32
    %24 = vector.broadcast %cst_13 : f32 to vector<16x128xf32>
    %25 = arith.mulf %24, %23 : vector<16x128xf32>
    %cst_14 = arith.constant -1.45315206 : f32
    %26 = vector.broadcast %cst_14 : f32 to vector<16x128xf32>
    %27 = arith.addf %25, %26 : vector<16x128xf32>
    %28 = arith.mulf %27, %23 : vector<16x128xf32>
    %cst_15 = arith.constant 1.42141378 : f32
    %29 = vector.broadcast %cst_15 : f32 to vector<16x128xf32>
    %30 = arith.addf %28, %29 : vector<16x128xf32>
    %31 = arith.mulf %30, %23 : vector<16x128xf32>
    %cst_16 = arith.constant -0.284496725 : f32
    %32 = vector.broadcast %cst_16 : f32 to vector<16x128xf32>
    %33 = arith.addf %31, %32 : vector<16x128xf32>
    %34 = arith.mulf %33, %23 : vector<16x128xf32>
    %cst_17 = arith.constant 0.254829586 : f32
    %35 = vector.broadcast %cst_17 : f32 to vector<16x128xf32>
    %36 = arith.addf %34, %35 : vector<16x128xf32>
    %37 = arith.mulf %36, %23 : vector<16x128xf32>
    %cst_18 = arith.constant 0.000000e+00 : f32
    %38 = vector.broadcast %cst_18 : f32 to vector<16x128xf32>
    %39 = arith.subf %38, %18 : vector<16x128xf32>
    %40 = arith.mulf %39, %18 : vector<16x128xf32>
    %41 = math.exp %40 : vector<16x128xf32>
    %42 = arith.mulf %37, %41 : vector<16x128xf32>
    %cst_19 = arith.constant 1.000000e+00 : f32
    %43 = vector.broadcast %cst_19 : f32 to vector<16x128xf32>
    %44 = arith.subf %43, %42 : vector<16x128xf32>
    %45 = arith.mulf %17, %44 : vector<16x128xf32>
    %cst_20 = arith.constant 1.000000e+00 : f32
    %46 = vector.broadcast %cst_20 : f32 to vector<16x128xf32>
    %47 = arith.addf %46, %45 : vector<16x128xf32>
    %48 = arith.mulf %10, %47 : vector<16x128xf32>
    %49 = arith.truncf %48 : vector<16x128xf32> to vector<16x128xbf16>
    %c0_21 = arith.constant 0 : index
    %c0_22 = arith.constant 0 : index
    %50 = vector.load %arg7[%c0_21, %c0_22] : memref<16x128xbf16, #tpu.memory_space<vmem>>, vector<16x128xbf16>
    tpu.vector_store %arg7[%c0_21, %c0_22], %49 {strides = array<i32>} : memref<16x128xbf16, #tpu.memory_space<vmem>>, vector<16x128xbf16>,
    return
  }
  func.func @transform_0(%arg0: i32, %arg1: i32) -> (i32, i32) {
    %c0_i32 = arith.constant 0 : i32
    %c0_i32_0 = arith.constant 0 : i32
    return %arg0, %c0_i32 : i32, i32
  }
  func.func @transform_1(%arg0: i32, %arg1: i32) -> (i32, i32) {
    %c0_i32 = arith.constant 0 : i32
    %c0_i32_0 = arith.constant 0 : i32
    %c0_i32_1 = arith.constant 0 : i32
    return %c0_i32, %c0_i32_0 : i32, i32
  }
  func.func @transform_2(%arg0: i32, %arg1: i32) -> (i32, i32) {
    %c0_i32 = arith.constant 0 : i32
    %c0_i32_0 = arith.constant 0 : i32
    %c0_i32_1 = arith.constant 0 : i32
    return %c0_i32, %c0_i32_0 : i32, i32
  }
  func.func @transform_3(%arg0: i32, %arg1: i32) -> (i32, i32) {
    %c0_i32 = arith.constant 0 : i32
    %c0_i32_0 = arith.constant 0 : i32
    return %c0_i32, %arg1 : i32, i32
  }
  func.func @transform_4(%arg0: i32, %arg1: i32) -> (i32, i32) {
    %c0_i32 = arith.constant 0 : i32
    %c0_i32_0 = arith.constant 0 : i32
    return %c0_i32, %arg1 : i32, i32
  }
  func.func @transform_5(%arg0: i32, %arg1: i32) -> (i32, i32) {
    %c0_i32 = arith.constant 0 : i32
    return %arg0, %arg1 : i32, i32
  }
}

module attributes {stable_mosaic.version = 11 : i64} {
  func.func @_matmul_kernel(%arg0: i32, %arg1: i32, %arg2: i32, %arg3: memref<16x32xbf16, #tpu.memory_space<vmem>>, %arg4: memref<32x32xbf16, #tpu.memory_space<vmem>>, %arg5: memref<1x32xf32, #tpu.memory_space<vmem>>, %arg6: memref<16x32xf32, #tpu.memory_space<vmem>>, %arg7: memref<16x32xbf16, #tpu.memory_space<vmem>>, %arg8: memref<16x32xf32, #tpu.memory_space<vmem>>) attributes {dimension_semantics = [#tpu.dimension_semantics<parallel>, #tpu.dimension_semantics<parallel>, #tpu.dimension_semantics<arbitrary>], iteration_bounds = array<i64: 1, 1, 1>, scalar_prefetch = 0 : i64, scratch_operands = 1 : i64, tpu.core_type = #tpu.core_type<tc>, window_params = [{transform_indices = @transform_0, window_bounds = array<i64: 16, 32>}, {transform_indices = @transform_1, window_bounds = array<i64: 32, 32>}, {transform_indices = @transform_2, window_bounds = array<i64: 1, 32>}, {transform_indices = @transform_3, window_bounds = array<i64: 16, 32>}, {transform_indices = @transform_4, window_bounds = array<i64: 16, 32>}]} {
    %c0_i32 = arith.constant 0 : i32
    %0 = arith.cmpi eq, %arg2, %c0_i32 : i32
    %1 = arith.extui %0 : i1 to i32
    %c0_i32_0 = arith.constant 0 : i32
    %2 = arith.cmpi ne, %1, %c0_i32_0 : i32
    scf.if %2 {
      %cst_10 = arith.constant 0.000000e+00 : f32
      %12 = vector.broadcast %cst_10 : f32 to vector<16x32xf32>
      %c0_11 = arith.constant 0 : index
      %c0_12 = arith.constant 0 : index
      %13 = vector.load %arg8[%c0_11, %c0_12] : memref<16x32xf32, #tpu.memory_space<vmem>>, vector<16x32xf32>
      tpu.vector_store %arg8[%c0_11, %c0_12], %12 {strides = array<i32>} : memref<16x32xf32, #tpu.memory_space<vmem>>, vector<16x32xf32>,
    } else {
    }
    %c0 = arith.constant 0 : index
    %c0_1 = arith.constant 0 : index
    %3 = vector.load %arg4[%c0, %c0_1] : memref<32x32xbf16, #tpu.memory_space<vmem>>, vector<32x32xbf16>
    %c0_2 = arith.constant 0 : index
    %c0_3 = arith.constant 0 : index
    %4 = vector.load %arg8[%c0_2, %c0_3] : memref<16x32xf32, #tpu.memory_space<vmem>>, vector<16x32xf32>
    %c0_4 = arith.constant 0 : index
    %c0_5 = arith.constant 0 : index
    %5 = vector.load %arg3[%c0_4, %c0_5] : memref<16x32xbf16, #tpu.memory_space<vmem>>, vector<16x32xbf16>
    %cst = arith.constant dense<0.000000e+00> : vector<16x32xf32>
    %6 = tpu.matmul %5, %3, %cst {dimension_numbers = #tpu.dot_dimension_numbers<[1], [0], [0], [1], [0, 0, 1, 1], [], []>} : vector<16x32xbf16>, vector<32x32xbf16>, vector<16x32xf32> -> vector<16x32xf32>
    %7 = arith.addf %4, %6 : vector<16x32xf32>
    %c0_6 = arith.constant 0 : index
    %c0_7 = arith.constant 0 : index
    %8 = vector.load %arg8[%c0_6, %c0_7] : memref<16x32xf32, #tpu.memory_space<vmem>>, vector<16x32xf32>
    tpu.vector_store %arg8[%c0_6, %c0_7], %7 {strides = array<i32>} : memref<16x32xf32, #tpu.memory_space<vmem>>, vector<16x32xf32>,
    %c0_i32_8 = arith.constant 0 : i32
    %9 = arith.cmpi eq, %arg2, %c0_i32_8 : i32
    %10 = arith.extui %9 : i1 to i32
    %c0_i32_9 = arith.constant 0 : i32
    %11 = arith.cmpi ne, %10, %c0_i32_9 : i32
    scf.if %11 {
      %c0_10 = arith.constant 0 : index
      %c0_11 = arith.constant 0 : index
      %12 = vector.load %arg8[%c0_10, %c0_11] : memref<16x32xf32, #tpu.memory_space<vmem>>, vector<16x32xf32>
      %c0_12 = arith.constant 0 : index
      %c0_13 = arith.constant 0 : index
      %13 = vector.load %arg5[%c0_12, %c0_13] : memref<1x32xf32, #tpu.memory_space<vmem>>, vector<1x32xf32>
      %14 = vector.broadcast %13 : vector<1x32xf32> to vector<16x32xf32>
      %15 = arith.addf %12, %14 : vector<16x32xf32>
      %c0_14 = arith.constant 0 : index
      %c0_15 = arith.constant 0 : index
      %16 = vector.load %arg6[%c0_14, %c0_15] : memref<16x32xf32, #tpu.memory_space<vmem>>, vector<16x32xf32>
      %17 = arith.addf %15, %16 : vector<16x32xf32>
      %18 = arith.truncf %17 : vector<16x32xf32> to vector<16x32xbf16>
      %c0_16 = arith.constant 0 : index
      %c0_17 = arith.constant 0 : index
      %19 = vector.load %arg7[%c0_16, %c0_17] : memref<16x32xbf16, #tpu.memory_space<vmem>>, vector<16x32xbf16>
      tpu.vector_store %arg7[%c0_16, %c0_17], %18 {strides = array<i32>} : memref<16x32xbf16, #tpu.memory_space<vmem>>, vector<16x32xbf16>,
    } else {
    }
    return
  }
  func.func @transform_0(%arg0: i32, %arg1: i32, %arg2: i32) -> (i32, i32) {
    %c0_i32 = arith.constant 0 : i32
    return %arg0, %arg2 : i32, i32
  }
  func.func @transform_1(%arg0: i32, %arg1: i32, %arg2: i32) -> (i32, i32) {
    %c0_i32 = arith.constant 0 : i32
    return %arg2, %arg1 : i32, i32
  }
  func.func @transform_2(%arg0: i32, %arg1: i32, %arg2: i32) -> (i32, i32) {
    %c0_i32 = arith.constant 0 : i32
    %c0_i32_0 = arith.constant 0 : i32
    return %c0_i32, %arg1 : i32, i32
  }
  func.func @transform_3(%arg0: i32, %arg1: i32, %arg2: i32) -> (i32, i32) {
    %c0_i32 = arith.constant 0 : i32
    return %arg0, %arg1 : i32, i32
  }
  func.func @transform_4(%arg0: i32, %arg1: i32, %arg2: i32) -> (i32, i32) {
    %c0_i32 = arith.constant 0 : i32
    return %arg0, %arg1 : i32, i32
  }
}

module attributes {stable_mosaic.version = 11 : i64} {
  func.func @_flash_attn_kernel(%arg0: i32, %arg1: i32, %arg2: i32, %arg3: memref<1x8x32xbf16, #tpu.memory_space<vmem>>, %arg4: memref<1x8x32xbf16, #tpu.memory_space<vmem>>, %arg5: memref<1x8x32xbf16, #tpu.memory_space<vmem>>, %arg6: memref<1x8x32xbf16, #tpu.memory_space<vmem>>, %arg7: memref<8x4xf32, #tpu.memory_space<vmem>>, %arg8: memref<8x4xf32, #tpu.memory_space<vmem>>, %arg9: memref<8x32xf32, #tpu.memory_space<vmem>>) attributes {dimension_semantics = [#tpu.dimension_semantics<parallel>, #tpu.dimension_semantics<parallel>, #tpu.dimension_semantics<arbitrary>], iteration_bounds = array<i64: 2, 1, 1>, scalar_prefetch = 0 : i64, scratch_operands = 3 : i64, tpu.core_type = #tpu.core_type<tc>, window_params = [{transform_indices = @transform_0, window_bounds = array<i64: 1, 8, 32>}, {transform_indices = @transform_1, window_bounds = array<i64: 1, 8, 32>}, {transform_indices = @transform_2, window_bounds = array<i64: 1, 8, 32>}, {transform_indices = @transform_3, window_bounds = array<i64: 1, 8, 32>}]} {
    %c0_i32 = arith.constant 0 : i32
    %0 = arith.cmpi eq, %arg2, %c0_i32 : i32
    %1 = arith.extui %0 : i1 to i32
    %c0_i32_0 = arith.constant 0 : i32
    %2 = arith.cmpi ne, %1, %c0_i32_0 : i32
    scf.if %2 {
      %cst_65 = arith.constant 0xFF800000 : f32
      %125 = vector.broadcast %cst_65 : f32 to vector<8x4xf32>
      %c0_66 = arith.constant 0 : index
      %c0_67 = arith.constant 0 : index
      %126 = vector.load %arg7[%c0_66, %c0_67] : memref<8x4xf32, #tpu.memory_space<vmem>>, vector<8x4xf32>
      tpu.vector_store %arg7[%c0_66, %c0_67], %125 {strides = array<i32>} : memref<8x4xf32, #tpu.memory_space<vmem>>, vector<8x4xf32>,
      %cst_68 = arith.constant 0.000000e+00 : f32
      %127 = vector.broadcast %cst_68 : f32 to vector<8x4xf32>
      %c0_69 = arith.constant 0 : index
      %c0_70 = arith.constant 0 : index
      %128 = vector.load %arg8[%c0_69, %c0_70] : memref<8x4xf32, #tpu.memory_space<vmem>>, vector<8x4xf32>
      tpu.vector_store %arg8[%c0_69, %c0_70], %127 {strides = array<i32>} : memref<8x4xf32, #tpu.memory_space<vmem>>, vector<8x4xf32>,
      %cst_71 = arith.constant 0.000000e+00 : f32
      %129 = vector.broadcast %cst_71 : f32 to vector<8x32xf32>
      %c0_72 = arith.constant 0 : index
      %c0_73 = arith.constant 0 : index
      %130 = vector.load %arg9[%c0_72, %c0_73] : memref<8x32xf32, #tpu.memory_space<vmem>>, vector<8x32xf32>
      tpu.vector_store %arg9[%c0_72, %c0_73], %129 {strides = array<i32>} : memref<8x32xf32, #tpu.memory_space<vmem>>, vector<8x32xf32>,
    } else {
    }
    %c0 = arith.constant 0 : index
    %c0_1 = arith.constant 0 : index
    %c0_2 = arith.constant 0 : index
    %3 = vector.load %arg3[%c0, %c0_1, %c0_2] : memref<1x8x32xbf16, #tpu.memory_space<vmem>>, vector<1x8x32xbf16>
    %4 = vector.shape_cast %3 : vector<1x8x32xbf16> to vector<8x32xbf16>
    %c0_3 = arith.constant 0 : index
    %c0_4 = arith.constant 0 : index
    %c0_5 = arith.constant 0 : index
    %5 = vector.load %arg4[%c0_3, %c0_4, %c0_5] : memref<1x8x32xbf16, #tpu.memory_space<vmem>>, vector<1x8x32xbf16>
    %6 = vector.shape_cast %5 : vector<1x8x32xbf16> to vector<8x32xbf16>
    %c0_6 = arith.constant 0 : index
    %c0_7 = arith.constant 0 : index
    %c0_8 = arith.constant 0 : index
    %7 = vector.load %arg5[%c0_6, %c0_7, %c0_8] : memref<1x8x32xbf16, #tpu.memory_space<vmem>>, vector<1x8x32xbf16>
    %8 = vector.shape_cast %7 : vector<1x8x32xbf16> to vector<8x32xbf16>
    %cst = arith.constant 1.000000e+00 : bf16
    %9 = vector.broadcast %cst : bf16 to vector<8x1xbf16>
    %10 = vector.extract_strided_slice %4 {offsets = [0, 0], sizes = [8, 8], strides = [1, 1]} : vector<8x32xbf16> to vector<8x8xbf16>
    %11 = vector.extract_strided_slice %6 {offsets = [0, 0], sizes = [8, 8], strides = [1, 1]} : vector<8x32xbf16> to vector<8x8xbf16>
    %cst_9 = arith.constant dense<0.000000e+00> : vector<8x8xf32>
    %12 = tpu.matmul %10, %11, %cst_9 {dimension_numbers = #tpu.dot_dimension_numbers<[1], [1], [0], [0], [0, 0, 1, 0], [], []>} : vector<8x8xbf16>, vector<8x8xbf16>, vector<8x8xf32> -> vector<8x8xf32>
    %c0_10 = arith.constant 0 : index
    %c0_11 = arith.constant 0 : index
    %13 = vector.load %arg7[%c0_10, %c0_11] : memref<8x4xf32, #tpu.memory_space<vmem>>, vector<8x1xf32>
    %cst_12 = arith.constant dense<0xFF800000> : vector<8xf32>
    %14 = vector.multi_reduction <maximumf>, %12, %cst_12 [1] : vector<8x8xf32> to vector<8xf32>
    %15 = vector.shape_cast %14 : vector<8xf32> to vector<8x1xf32>
    %16 = arith.maximumf %13, %15 : vector<8x1xf32>
    %17 = arith.subf %13, %16 : vector<8x1xf32>
    %18 = math.exp %17 : vector<8x1xf32>
    %19 = vector.broadcast %16 : vector<8x1xf32> to vector<8x8xf32>
    %20 = arith.subf %12, %19 : vector<8x8xf32>
    %21 = math.exp %20 : vector<8x8xf32>
    %22 = vector.extract_strided_slice %8 {offsets = [0, 0], sizes = [8, 8], strides = [1, 1]} : vector<8x32xbf16> to vector<8x8xbf16>
    %23 = tpu.concatenate %22, %9 in 1 : vector<8x8xbf16>, vector<8x1xbf16> -> vector<8x9xbf16>
    %24 = arith.truncf %21 : vector<8x8xf32> to vector<8x8xbf16>
    %cst_13 = arith.constant dense<0.000000e+00> : vector<8x9xf32>
    %25 = tpu.matmul %24, %23, %cst_13 {dimension_numbers = #tpu.dot_dimension_numbers<[1], [0], [0], [1], [0, 0, 1, 1], [], []>} : vector<8x8xbf16>, vector<8x9xbf16>, vector<8x9xf32> -> vector<8x9xf32>
    %c0_14 = arith.constant 0 : index
    %c0_15 = arith.constant 0 : index
    %26 = vector.load %arg9[%c0_14, %c0_15] : memref<8x32xf32, #tpu.memory_space<vmem>>, vector<8x8xf32>
    %27 = vector.broadcast %18 : vector<8x1xf32> to vector<8x8xf32>
    %28 = arith.mulf %27, %26 : vector<8x8xf32>
    %29 = vector.extract_strided_slice %25 {offsets = [0, 0], sizes = [8, 8], strides = [1, 1]} : vector<8x9xf32> to vector<8x8xf32>
    %30 = arith.addf %28, %29 : vector<8x8xf32>
    %c0_16 = arith.constant 0 : index
    %c0_17 = arith.constant 0 : index
    %31 = vector.load %arg9[%c0_16, %c0_17] : memref<8x32xf32, #tpu.memory_space<vmem>>, vector<8x8xf32>
    tpu.vector_store %arg9[%c0_16, %c0_17], %30 {strides = array<i32>} : memref<8x32xf32, #tpu.memory_space<vmem>>, vector<8x8xf32>,
    %c0_18 = arith.constant 0 : index
    %c0_19 = arith.constant 0 : index
    %32 = vector.load %arg8[%c0_18, %c0_19] : memref<8x4xf32, #tpu.memory_space<vmem>>, vector<8x1xf32>
    %33 = arith.mulf %18, %32 : vector<8x1xf32>
    %34 = vector.extract_strided_slice %25 {offsets = [0, 8], sizes = [8, 1], strides = [1, 1]} : vector<8x9xf32> to vector<8x1xf32>
    %35 = arith.addf %33, %34 : vector<8x1xf32>
    %c0_20 = arith.constant 0 : index
    %c0_21 = arith.constant 0 : index
    %36 = vector.load %arg8[%c0_20, %c0_21] : memref<8x4xf32, #tpu.memory_space<vmem>>, vector<8x1xf32>
    tpu.vector_store %arg8[%c0_20, %c0_21], %35 {strides = array<i32>} : memref<8x4xf32, #tpu.memory_space<vmem>>, vector<8x1xf32>,
    %c0_22 = arith.constant 0 : index
    %c0_23 = arith.constant 0 : index
    %37 = vector.load %arg7[%c0_22, %c0_23] : memref<8x4xf32, #tpu.memory_space<vmem>>, vector<8x1xf32>
    tpu.vector_store %arg7[%c0_22, %c0_23], %16 {strides = array<i32>} : memref<8x4xf32, #tpu.memory_space<vmem>>, vector<8x1xf32>,
    %38 = vector.extract_strided_slice %4 {offsets = [0, 8], sizes = [8, 8], strides = [1, 1]} : vector<8x32xbf16> to vector<8x8xbf16>
    %39 = vector.extract_strided_slice %6 {offsets = [0, 8], sizes = [8, 8], strides = [1, 1]} : vector<8x32xbf16> to vector<8x8xbf16>
    %cst_24 = arith.constant dense<0.000000e+00> : vector<8x8xf32>
    %40 = tpu.matmul %38, %39, %cst_24 {dimension_numbers = #tpu.dot_dimension_numbers<[1], [1], [0], [0], [0, 0, 1, 0], [], []>} : vector<8x8xbf16>, vector<8x8xbf16>, vector<8x8xf32> -> vector<8x8xf32>
    %c0_25 = arith.constant 0 : index
    %c1 = arith.constant 1 : index
    %41 = vector.load %arg7[%c0_25, %c1] : memref<8x4xf32, #tpu.memory_space<vmem>>, vector<8x1xf32>
    %cst_26 = arith.constant dense<0xFF800000> : vector<8xf32>
    %42 = vector.multi_reduction <maximumf>, %40, %cst_26 [1] : vector<8x8xf32> to vector<8xf32>
    %43 = vector.shape_cast %42 : vector<8xf32> to vector<8x1xf32>
    %44 = arith.maximumf %41, %43 : vector<8x1xf32>
    %45 = arith.subf %41, %44 : vector<8x1xf32>
    %46 = math.exp %45 : vector<8x1xf32>
    %47 = vector.broadcast %44 : vector<8x1xf32> to vector<8x8xf32>
    %48 = arith.subf %40, %47 : vector<8x8xf32>
    %49 = math.exp %48 : vector<8x8xf32>
    %50 = vector.extract_strided_slice %8 {offsets = [0, 8], sizes = [8, 8], strides = [1, 1]} : vector<8x32xbf16> to vector<8x8xbf16>
    %51 = tpu.concatenate %50, %9 in 1 : vector<8x8xbf16>, vector<8x1xbf16> -> vector<8x9xbf16>
    %52 = arith.truncf %49 : vector<8x8xf32> to vector<8x8xbf16>
    %cst_27 = arith.constant dense<0.000000e+00> : vector<8x9xf32>
    %53 = tpu.matmul %52, %51, %cst_27 {dimension_numbers = #tpu.dot_dimension_numbers<[1], [0], [0], [1], [0, 0, 1, 1], [], []>} : vector<8x8xbf16>, vector<8x9xbf16>, vector<8x9xf32> -> vector<8x9xf32>
    %c0_28 = arith.constant 0 : index
    %c8 = arith.constant 8 : index
    %54 = vector.load %arg9[%c0_28, %c8] : memref<8x32xf32, #tpu.memory_space<vmem>>, vector<8x8xf32>
    %55 = vector.broadcast %46 : vector<8x1xf32> to vector<8x8xf32>
    %56 = arith.mulf %55, %54 : vector<8x8xf32>
    %57 = vector.extract_strided_slice %53 {offsets = [0, 0], sizes = [8, 8], strides = [1, 1]} : vector<8x9xf32> to vector<8x8xf32>
    %58 = arith.addf %56, %57 : vector<8x8xf32>
    %c0_29 = arith.constant 0 : index
    %c8_30 = arith.constant 8 : index
    %59 = vector.load %arg9[%c0_29, %c8_30] : memref<8x32xf32, #tpu.memory_space<vmem>>, vector<8x8xf32>
    tpu.vector_store %arg9[%c0_29, %c8_30], %58 {strides = array<i32>} : memref<8x32xf32, #tpu.memory_space<vmem>>, vector<8x8xf32>,
    %c0_31 = arith.constant 0 : index
    %c1_32 = arith.constant 1 : index
    %60 = vector.load %arg8[%c0_31, %c1_32] : memref<8x4xf32, #tpu.memory_space<vmem>>, vector<8x1xf32>
    %61 = arith.mulf %46, %60 : vector<8x1xf32>
    %62 = vector.extract_strided_slice %53 {offsets = [0, 8], sizes = [8, 1], strides = [1, 1]} : vector<8x9xf32> to vector<8x1xf32>
    %63 = arith.addf %61, %62 : vector<8x1xf32>
    %c0_33 = arith.constant 0 : index
    %c1_34 = arith.constant 1 : index
    %64 = vector.load %arg8[%c0_33, %c1_34] : memref<8x4xf32, #tpu.memory_space<vmem>>, vector<8x1xf32>
    tpu.vector_store %arg8[%c0_33, %c1_34], %63 {strides = array<i32>} : memref<8x4xf32, #tpu.memory_space<vmem>>, vector<8x1xf32>,
    %c0_35 = arith.constant 0 : index
    %c1_36 = arith.constant 1 : index
    %65 = vector.load %arg7[%c0_35, %c1_36] : memref<8x4xf32, #tpu.memory_space<vmem>>, vector<8x1xf32>
    tpu.vector_store %arg7[%c0_35, %c1_36], %44 {strides = array<i32>} : memref<8x4xf32, #tpu.memory_space<vmem>>, vector<8x1xf32>,
    %66 = vector.extract_strided_slice %4 {offsets = [0, 16], sizes = [8, 8], strides = [1, 1]} : vector<8x32xbf16> to vector<8x8xbf16>
    %67 = vector.extract_strided_slice %6 {offsets = [0, 16], sizes = [8, 8], strides = [1, 1]} : vector<8x32xbf16> to vector<8x8xbf16>
    %cst_37 = arith.constant dense<0.000000e+00> : vector<8x8xf32>
    %68 = tpu.matmul %66, %67, %cst_37 {dimension_numbers = #tpu.dot_dimension_numbers<[1], [1], [0], [0], [0, 0, 1, 0], [], []>} : vector<8x8xbf16>, vector<8x8xbf16>, vector<8x8xf32> -> vector<8x8xf32>
    %c0_38 = arith.constant 0 : index
    %c2 = arith.constant 2 : index
    %69 = vector.load %arg7[%c0_38, %c2] : memref<8x4xf32, #tpu.memory_space<vmem>>, vector<8x1xf32>
    %cst_39 = arith.constant dense<0xFF800000> : vector<8xf32>
    %70 = vector.multi_reduction <maximumf>, %68, %cst_39 [1] : vector<8x8xf32> to vector<8xf32>
    %71 = vector.shape_cast %70 : vector<8xf32> to vector<8x1xf32>
    %72 = arith.maximumf %69, %71 : vector<8x1xf32>
    %73 = arith.subf %69, %72 : vector<8x1xf32>
    %74 = math.exp %73 : vector<8x1xf32>
    %75 = vector.broadcast %72 : vector<8x1xf32> to vector<8x8xf32>
    %76 = arith.subf %68, %75 : vector<8x8xf32>
    %77 = math.exp %76 : vector<8x8xf32>
    %78 = vector.extract_strided_slice %8 {offsets = [0, 16], sizes = [8, 8], strides = [1, 1]} : vector<8x32xbf16> to vector<8x8xbf16>
    %79 = tpu.concatenate %78, %9 in 1 : vector<8x8xbf16>, vector<8x1xbf16> -> vector<8x9xbf16>
    %80 = arith.truncf %77 : vector<8x8xf32> to vector<8x8xbf16>
    %cst_40 = arith.constant dense<0.000000e+00> : vector<8x9xf32>
    %81 = tpu.matmul %80, %79, %cst_40 {dimension_numbers = #tpu.dot_dimension_numbers<[1], [0], [0], [1], [0, 0, 1, 1], [], []>} : vector<8x8xbf16>, vector<8x9xbf16>, vector<8x9xf32> -> vector<8x9xf32>
    %c0_41 = arith.constant 0 : index
    %c16 = arith.constant 16 : index
    %82 = vector.load %arg9[%c0_41, %c16] : memref<8x32xf32, #tpu.memory_space<vmem>>, vector<8x8xf32>
    %83 = vector.broadcast %74 : vector<8x1xf32> to vector<8x8xf32>
    %84 = arith.mulf %83, %82 : vector<8x8xf32>
    %85 = vector.extract_strided_slice %81 {offsets = [0, 0], sizes = [8, 8], strides = [1, 1]} : vector<8x9xf32> to vector<8x8xf32>
    %86 = arith.addf %84, %85 : vector<8x8xf32>
    %c0_42 = arith.constant 0 : index
    %c16_43 = arith.constant 16 : index
    %87 = vector.load %arg9[%c0_42, %c16_43] : memref<8x32xf32, #tpu.memory_space<vmem>>, vector<8x8xf32>
    tpu.vector_store %arg9[%c0_42, %c16_43], %86 {strides = array<i32>} : memref<8x32xf32, #tpu.memory_space<vmem>>, vector<8x8xf32>,
    %c0_44 = arith.constant 0 : index
    %c2_45 = arith.constant 2 : index
    %88 = vector.load %arg8[%c0_44, %c2_45] : memref<8x4xf32, #tpu.memory_space<vmem>>, vector<8x1xf32>
    %89 = arith.mulf %74, %88 : vector<8x1xf32>
    %90 = vector.extract_strided_slice %81 {offsets = [0, 8], sizes = [8, 1], strides = [1, 1]} : vector<8x9xf32> to vector<8x1xf32>
    %91 = arith.addf %89, %90 : vector<8x1xf32>
    %c0_46 = arith.constant 0 : index
    %c2_47 = arith.constant 2 : index
    %92 = vector.load %arg8[%c0_46, %c2_47] : memref<8x4xf32, #tpu.memory_space<vmem>>, vector<8x1xf32>
    tpu.vector_store %arg8[%c0_46, %c2_47], %91 {strides = array<i32>} : memref<8x4xf32, #tpu.memory_space<vmem>>, vector<8x1xf32>,
    %c0_48 = arith.constant 0 : index
    %c2_49 = arith.constant 2 : index
    %93 = vector.load %arg7[%c0_48, %c2_49] : memref<8x4xf32, #tpu.memory_space<vmem>>, vector<8x1xf32>
    tpu.vector_store %arg7[%c0_48, %c2_49], %72 {strides = array<i32>} : memref<8x4xf32, #tpu.memory_space<vmem>>, vector<8x1xf32>,
    %94 = vector.extract_strided_slice %4 {offsets = [0, 24], sizes = [8, 8], strides = [1, 1]} : vector<8x32xbf16> to vector<8x8xbf16>
    %95 = vector.extract_strided_slice %6 {offsets = [0, 24], sizes = [8, 8], strides = [1, 1]} : vector<8x32xbf16> to vector<8x8xbf16>
    %cst_50 = arith.constant dense<0.000000e+00> : vector<8x8xf32>
    %96 = tpu.matmul %94, %95, %cst_50 {dimension_numbers = #tpu.dot_dimension_numbers<[1], [1], [0], [0], [0, 0, 1, 0], [], []>} : vector<8x8xbf16>, vector<8x8xbf16>, vector<8x8xf32> -> vector<8x8xf32>
    %c0_51 = arith.constant 0 : index
    %c3 = arith.constant 3 : index
    %97 = vector.load %arg7[%c0_51, %c3] : memref<8x4xf32, #tpu.memory_space<vmem>>, vector<8x1xf32>
    %cst_52 = arith.constant dense<0xFF800000> : vector<8xf32>
    %98 = vector.multi_reduction <maximumf>, %96, %cst_52 [1] : vector<8x8xf32> to vector<8xf32>
    %99 = vector.shape_cast %98 : vector<8xf32> to vector<8x1xf32>
    %100 = arith.maximumf %97, %99 : vector<8x1xf32>
    %101 = arith.subf %97, %100 : vector<8x1xf32>
    %102 = math.exp %101 : vector<8x1xf32>
    %103 = vector.broadcast %100 : vector<8x1xf32> to vector<8x8xf32>
    %104 = arith.subf %96, %103 : vector<8x8xf32>
    %105 = math.exp %104 : vector<8x8xf32>
    %106 = vector.extract_strided_slice %8 {offsets = [0, 24], sizes = [8, 8], strides = [1, 1]} : vector<8x32xbf16> to vector<8x8xbf16>
    %107 = tpu.concatenate %106, %9 in 1 : vector<8x8xbf16>, vector<8x1xbf16> -> vector<8x9xbf16>
    %108 = arith.truncf %105 : vector<8x8xf32> to vector<8x8xbf16>
    %cst_53 = arith.constant dense<0.000000e+00> : vector<8x9xf32>
    %109 = tpu.matmul %108, %107, %cst_53 {dimension_numbers = #tpu.dot_dimension_numbers<[1], [0], [0], [1], [0, 0, 1, 1], [], []>} : vector<8x8xbf16>, vector<8x9xbf16>, vector<8x9xf32> -> vector<8x9xf32>
    %c0_54 = arith.constant 0 : index
    %c24 = arith.constant 24 : index
    %110 = vector.load %arg9[%c0_54, %c24] : memref<8x32xf32, #tpu.memory_space<vmem>>, vector<8x8xf32>
    %111 = vector.broadcast %102 : vector<8x1xf32> to vector<8x8xf32>
    %112 = arith.mulf %111, %110 : vector<8x8xf32>
    %113 = vector.extract_strided_slice %109 {offsets = [0, 0], sizes = [8, 8], strides = [1, 1]} : vector<8x9xf32> to vector<8x8xf32>
    %114 = arith.addf %112, %113 : vector<8x8xf32>
    %c0_55 = arith.constant 0 : index
    %c24_56 = arith.constant 24 : index
    %115 = vector.load %arg9[%c0_55, %c24_56] : memref<8x32xf32, #tpu.memory_space<vmem>>, vector<8x8xf32>
    tpu.vector_store %arg9[%c0_55, %c24_56], %114 {strides = array<i32>} : memref<8x32xf32, #tpu.memory_space<vmem>>, vector<8x8xf32>,
    %c0_57 = arith.constant 0 : index
    %c3_58 = arith.constant 3 : index
    %116 = vector.load %arg8[%c0_57, %c3_58] : memref<8x4xf32, #tpu.memory_space<vmem>>, vector<8x1xf32>
    %117 = arith.mulf %102, %116 : vector<8x1xf32>
    %118 = vector.extract_strided_slice %109 {offsets = [0, 8], sizes = [8, 1], strides = [1, 1]} : vector<8x9xf32> to vector<8x1xf32>
    %119 = arith.addf %117, %118 : vector<8x1xf32>
    %c0_59 = arith.constant 0 : index
    %c3_60 = arith.constant 3 : index
    %120 = vector.load %arg8[%c0_59, %c3_60] : memref<8x4xf32, #tpu.memory_space<vmem>>, vector<8x1xf32>
    tpu.vector_store %arg8[%c0_59, %c3_60], %119 {strides = array<i32>} : memref<8x4xf32, #tpu.memory_space<vmem>>, vector<8x1xf32>,
    %c0_61 = arith.constant 0 : index
    %c3_62 = arith.constant 3 : index
    %121 = vector.load %arg7[%c0_61, %c3_62] : memref<8x4xf32, #tpu.memory_space<vmem>>, vector<8x1xf32>
    tpu.vector_store %arg7[%c0_61, %c3_62], %100 {strides = array<i32>} : memref<8x4xf32, #tpu.memory_space<vmem>>, vector<8x1xf32>,
    %c0_i32_63 = arith.constant 0 : i32
    %122 = arith.cmpi eq, %arg2, %c0_i32_63 : i32
    %123 = arith.extui %122 : i1 to i32
    %c0_i32_64 = arith.constant 0 : i32
    %124 = arith.cmpi ne, %123, %c0_i32_64 : i32
    scf.if %124 {
      %c0_65 = arith.constant 0 : index
      %c0_66 = arith.constant 0 : index
      %125 = vector.load %arg8[%c0_65, %c0_66] : memref<8x4xf32, #tpu.memory_space<vmem>>, vector<8x1xf32>
      %126 = tpu.reciprocal %125 {approx = true} : vector<8x1xf32> -> vector<8x1xf32>
      %127 = vector.shape_cast %126 : vector<8x1xf32> to vector<8x1xf32>
      %128 = vector.broadcast %127 : vector<8x1xf32> to vector<8x8xf32>
      %c0_67 = arith.constant 0 : index
      %c1_68 = arith.constant 1 : index
      %129 = vector.load %arg8[%c0_67, %c1_68] : memref<8x4xf32, #tpu.memory_space<vmem>>, vector<8x1xf32>
      %130 = tpu.reciprocal %129 {approx = true} : vector<8x1xf32> -> vector<8x1xf32>
      %131 = vector.shape_cast %130 : vector<8x1xf32> to vector<8x1xf32>
      %132 = vector.broadcast %131 : vector<8x1xf32> to vector<8x8xf32>
      %c0_69 = arith.constant 0 : index
      %c2_70 = arith.constant 2 : index
      %133 = vector.load %arg8[%c0_69, %c2_70] : memref<8x4xf32, #tpu.memory_space<vmem>>, vector<8x1xf32>
      %134 = tpu.reciprocal %133 {approx = true} : vector<8x1xf32> -> vector<8x1xf32>
      %135 = vector.shape_cast %134 : vector<8x1xf32> to vector<8x1xf32>
      %136 = vector.broadcast %135 : vector<8x1xf32> to vector<8x8xf32>
      %c0_71 = arith.constant 0 : index
      %c3_72 = arith.constant 3 : index
      %137 = vector.load %arg8[%c0_71, %c3_72] : memref<8x4xf32, #tpu.memory_space<vmem>>, vector<8x1xf32>
      %138 = tpu.reciprocal %137 {approx = true} : vector<8x1xf32> -> vector<8x1xf32>
      %139 = vector.shape_cast %138 : vector<8x1xf32> to vector<8x1xf32>
      %140 = vector.broadcast %139 : vector<8x1xf32> to vector<8x8xf32>
      %141 = tpu.concatenate %128, %132, %136, %140 in 1 : vector<8x8xf32>, vector<8x8xf32>, vector<8x8xf32>, vector<8x8xf32> -> vector<8x32xf32>
      %c0_73 = arith.constant 0 : index
      %c0_74 = arith.constant 0 : index
      %142 = vector.load %arg9[%c0_73, %c0_74] : memref<8x32xf32, #tpu.memory_space<vmem>>, vector<8x32xf32>
      %143 = arith.mulf %142, %141 : vector<8x32xf32>
      %144 = arith.truncf %143 : vector<8x32xf32> to vector<8x32xbf16>
      %c0_75 = arith.constant 0 : index
      %c0_76 = arith.constant 0 : index
      %c0_77 = arith.constant 0 : index
      %145 = vector.load %arg6[%c0_75, %c0_76, %c0_77] : memref<1x8x32xbf16, #tpu.memory_space<vmem>>, vector<1x8x32xbf16>
      %146 = vector.shape_cast %145 : vector<1x8x32xbf16> to vector<8x32xbf16>
      %147 = vector.shape_cast %144 : vector<8x32xbf16> to vector<1x8x32xbf16>
      tpu.vector_store %arg6[%c0_75, %c0_76, %c0_77], %147 {strides = array<i32>} : memref<1x8x32xbf16, #tpu.memory_space<vmem>>, vector<1x8x32xbf16>,
    } else {
    }
    return
  }
  func.func @transform_0(%arg0: i32, %arg1: i32, %arg2: i32) -> (i32, i32, i32) {
    %c0_i32 = arith.constant 0 : i32
    %c0_i32_0 = arith.constant 0 : i32
    return %arg0, %arg1, %c0_i32 : i32, i32, i32
  }
  func.func @transform_1(%arg0: i32, %arg1: i32, %arg2: i32) -> (i32, i32, i32) {
    %c0_i32 = arith.constant 0 : i32
    %c0_i32_0 = arith.constant 0 : i32
    return %arg0, %arg2, %c0_i32 : i32, i32, i32
  }
  func.func @transform_2(%arg0: i32, %arg1: i32, %arg2: i32) -> (i32, i32, i32) {
    %c0_i32 = arith.constant 0 : i32
    %c0_i32_0 = arith.constant 0 : i32
    return %arg0, %arg2, %c0_i32 : i32, i32, i32
  }
  func.func @transform_3(%arg0: i32, %arg1: i32, %arg2: i32) -> (i32, i32, i32) {
    %c0_i32 = arith.constant 0 : i32
    %c0_i32_0 = arith.constant 0 : i32
    return %arg0, %arg1, %c0_i32 : i32, i32, i32
  }
}

module attributes {stable_mosaic.version = 11 : i64} {
  func.func @_matmul_kernel(%arg0: i32, %arg1: i32, %arg2: i32, %arg3: memref<16x128xbf16, #tpu.memory_space<vmem>>, %arg4: memref<128x32xbf16, #tpu.memory_space<vmem>>, %arg5: memref<1x32xf32, #tpu.memory_space<vmem>>, %arg6: memref<16x32xbf16, #tpu.memory_space<vmem>>, %arg7: memref<16x32xbf16, #tpu.memory_space<vmem>>, %arg8: memref<16x32xf32, #tpu.memory_space<vmem>>) attributes {dimension_semantics = [#tpu.dimension_semantics<parallel>, #tpu.dimension_semantics<parallel>, #tpu.dimension_semantics<arbitrary>], iteration_bounds = array<i64: 1, 1, 1>, scalar_prefetch = 0 : i64, scratch_operands = 1 : i64, tpu.core_type = #tpu.core_type<tc>, window_params = [{transform_indices = @transform_0, window_bounds = array<i64: 16, 128>}, {transform_indices = @transform_1, window_bounds = array<i64: 128, 32>}, {transform_indices = @transform_2, window_bounds = array<i64: 1, 32>}, {transform_indices = @transform_3, window_bounds = array<i64: 16, 32>}, {transform_indices = @transform_4, window_bounds = array<i64: 16, 32>}]} {
    %c0_i32 = arith.constant 0 : i32
    %0 = arith.cmpi eq, %arg2, %c0_i32 : i32
    %1 = arith.extui %0 : i1 to i32
    %c0_i32_0 = arith.constant 0 : i32
    %2 = arith.cmpi ne, %1, %c0_i32_0 : i32
    scf.if %2 {
      %cst_10 = arith.constant 0.000000e+00 : f32
      %12 = vector.broadcast %cst_10 : f32 to vector<16x32xf32>
      %c0_11 = arith.constant 0 : index
      %c0_12 = arith.constant 0 : index
      %13 = vector.load %arg8[%c0_11, %c0_12] : memref<16x32xf32, #tpu.memory_space<vmem>>, vector<16x32xf32>
      tpu.vector_store %arg8[%c0_11, %c0_12], %12 {strides = array<i32>} : memref<16x32xf32, #tpu.memory_space<vmem>>, vector<16x32xf32>,
    } else {
    }
    %c0 = arith.constant 0 : index
    %c0_1 = arith.constant 0 : index
    %3 = vector.load %arg4[%c0, %c0_1] : memref<128x32xbf16, #tpu.memory_space<vmem>>, vector<128x32xbf16>
    %c0_2 = arith.constant 0 : index
    %c0_3 = arith.constant 0 : index
    %4 = vector.load %arg8[%c0_2, %c0_3] : memref<16x32xf32, #tpu.memory_space<vmem>>, vector<16x32xf32>
    %c0_4 = arith.constant 0 : index
    %c0_5 = arith.constant 0 : index
    %5 = vector.load %arg3[%c0_4, %c0_5] : memref<16x128xbf16, #tpu.memory_space<vmem>>, vector<16x128xbf16>
    %cst = arith.constant dense<0.000000e+00> : vector<16x32xf32>
    %6 = tpu.matmul %5, %3, %cst {dimension_numbers = #tpu.dot_dimension_numbers<[1], [0], [0], [1], [0, 0, 1, 1], [], []>} : vector<16x128xbf16>, vector<128x32xbf16>, vector<16x32xf32> -> vector<16x32xf32>
    %7 = arith.addf %4, %6 : vector<16x32xf32>
    %c0_6 = arith.constant 0 : index
    %c0_7 = arith.constant 0 : index
    %8 = vector.load %arg8[%c0_6, %c0_7] : memref<16x32xf32, #tpu.memory_space<vmem>>, vector<16x32xf32>
    tpu.vector_store %arg8[%c0_6, %c0_7], %7 {strides = array<i32>} : memref<16x32xf32, #tpu.memory_space<vmem>>, vector<16x32xf32>,
    %c0_i32_8 = arith.constant 0 : i32
    %9 = arith.cmpi eq, %arg2, %c0_i32_8 : i32
    %10 = arith.extui %9 : i1 to i32
    %c0_i32_9 = arith.constant 0 : i32
    %11 = arith.cmpi ne, %10, %c0_i32_9 : i32
    scf.if %11 {
      %c0_10 = arith.constant 0 : index
      %c0_11 = arith.constant 0 : index
      %12 = vector.load %arg8[%c0_10, %c0_11] : memref<16x32xf32, #tpu.memory_space<vmem>>, vector<16x32xf32>
      %c0_12 = arith.constant 0 : index
      %c0_13 = arith.constant 0 : index
      %13 = vector.load %arg5[%c0_12, %c0_13] : memref<1x32xf32, #tpu.memory_space<vmem>>, vector<1x32xf32>
      %14 = vector.broadcast %13 : vector<1x32xf32> to vector<16x32xf32>
      %15 = arith.addf %12, %14 : vector<16x32xf32>
      %c0_14 = arith.constant 0 : index
      %c0_15 = arith.constant 0 : index
      %16 = vector.load %arg6[%c0_14, %c0_15] : memref<16x32xbf16, #tpu.memory_space<vmem>>, vector<16x32xbf16>
      %17 = arith.extf %16 : vector<16x32xbf16> to vector<16x32xf32>
      %18 = arith.addf %15, %17 : vector<16x32xf32>
      %19 = arith.truncf %18 : vector<16x32xf32> to vector<16x32xbf16>
      %c0_16 = arith.constant 0 : index
      %c0_17 = arith.constant 0 : index
      %20 = vector.load %arg7[%c0_16, %c0_17] : memref<16x32xbf16, #tpu.memory_space<vmem>>, vector<16x32xbf16>
      tpu.vector_store %arg7[%c0_16, %c0_17], %19 {strides = array<i32>} : memref<16x32xbf16, #tpu.memory_space<vmem>>, vector<16x32xbf16>,
    } else {
    }
    return
  }
  func.func @transform_0(%arg0: i32, %arg1: i32, %arg2: i32) -> (i32, i32) {
    %c0_i32 = arith.constant 0 : i32
    return %arg0, %arg2 : i32, i32
  }
  func.func @transform_1(%arg0: i32, %arg1: i32, %arg2: i32) -> (i32, i32) {
    %c0_i32 = arith.constant 0 : i32
    return %arg2, %arg1 : i32, i32
  }
  func.func @transform_2(%arg0: i32, %arg1: i32, %arg2: i32) -> (i32, i32) {
    %c0_i32 = arith.constant 0 : i32
    %c0_i32_0 = arith.constant 0 : i32
    return %c0_i32, %arg1 : i32, i32
  }
  func.func @transform_3(%arg0: i32, %arg1: i32, %arg2: i32) -> (i32, i32) {
    %c0_i32 = arith.constant 0 : i32
    return %arg0, %arg1 : i32, i32
  }
  func.func @transform_4(%arg0: i32, %arg1: i32, %arg2: i32) -> (i32, i32) {
    %c0_i32 = arith.constant 0 : i32
    return %arg0, %arg1 : i32, i32
  }
}

module attributes {stable_mosaic.version = 11 : i64} {
  func.func @_matmul_kernel(%arg0: i32, %arg1: i32, %arg2: i32, %arg3: memref<16x32xbf16, #tpu.memory_space<vmem>>, %arg4: memref<32x32xbf16, #tpu.memory_space<vmem>>, %arg5: memref<1x32xf32, #tpu.memory_space<vmem>>, %arg6: memref<16x32xbf16, #tpu.memory_space<vmem>>, %arg7: memref<16x32xbf16, #tpu.memory_space<vmem>>, %arg8: memref<16x32xf32, #tpu.memory_space<vmem>>) attributes {dimension_semantics = [#tpu.dimension_semantics<parallel>, #tpu.dimension_semantics<parallel>, #tpu.dimension_semantics<arbitrary>], iteration_bounds = array<i64: 1, 1, 1>, scalar_prefetch = 0 : i64, scratch_operands = 1 : i64, tpu.core_type = #tpu.core_type<tc>, window_params = [{transform_indices = @transform_0, window_bounds = array<i64: 16, 32>}, {transform_indices = @transform_1, window_bounds = array<i64: 32, 32>}, {transform_indices = @transform_2, window_bounds = array<i64: 1, 32>}, {transform_indices = @transform_3, window_bounds = array<i64: 16, 32>}, {transform_indices = @transform_4, window_bounds = array<i64: 16, 32>}]} {
    %c0_i32 = arith.constant 0 : i32
    %0 = arith.cmpi eq, %arg2, %c0_i32 : i32
    %1 = arith.extui %0 : i1 to i32
    %c0_i32_0 = arith.constant 0 : i32
    %2 = arith.cmpi ne, %1, %c0_i32_0 : i32
    scf.if %2 {
      %cst_10 = arith.constant 0.000000e+00 : f32
      %12 = vector.broadcast %cst_10 : f32 to vector<16x32xf32>
      %c0_11 = arith.constant 0 : index
      %c0_12 = arith.constant 0 : index
      %13 = vector.load %arg8[%c0_11, %c0_12] : memref<16x32xf32, #tpu.memory_space<vmem>>, vector<16x32xf32>
      tpu.vector_store %arg8[%c0_11, %c0_12], %12 {strides = array<i32>} : memref<16x32xf32, #tpu.memory_space<vmem>>, vector<16x32xf32>,
    } else {
    }
    %c0 = arith.constant 0 : index
    %c0_1 = arith.constant 0 : index
    %3 = vector.load %arg4[%c0, %c0_1] : memref<32x32xbf16, #tpu.memory_space<vmem>>, vector<32x32xbf16>
    %c0_2 = arith.constant 0 : index
    %c0_3 = arith.constant 0 : index
    %4 = vector.load %arg8[%c0_2, %c0_3] : memref<16x32xf32, #tpu.memory_space<vmem>>, vector<16x32xf32>
    %c0_4 = arith.constant 0 : index
    %c0_5 = arith.constant 0 : index
    %5 = vector.load %arg3[%c0_4, %c0_5] : memref<16x32xbf16, #tpu.memory_space<vmem>>, vector<16x32xbf16>
    %cst = arith.constant dense<0.000000e+00> : vector<16x32xf32>
    %6 = tpu.matmul %5, %3, %cst {dimension_numbers = #tpu.dot_dimension_numbers<[1], [0], [0], [1], [0, 0, 1, 1], [], []>} : vector<16x32xbf16>, vector<32x32xbf16>, vector<16x32xf32> -> vector<16x32xf32>
    %7 = arith.addf %4, %6 : vector<16x32xf32>
    %c0_6 = arith.constant 0 : index
    %c0_7 = arith.constant 0 : index
    %8 = vector.load %arg8[%c0_6, %c0_7] : memref<16x32xf32, #tpu.memory_space<vmem>>, vector<16x32xf32>
    tpu.vector_store %arg8[%c0_6, %c0_7], %7 {strides = array<i32>} : memref<16x32xf32, #tpu.memory_space<vmem>>, vector<16x32xf32>,
    %c0_i32_8 = arith.constant 0 : i32
    %9 = arith.cmpi eq, %arg2, %c0_i32_8 : i32
    %10 = arith.extui %9 : i1 to i32
    %c0_i32_9 = arith.constant 0 : i32
    %11 = arith.cmpi ne, %10, %c0_i32_9 : i32
    scf.if %11 {
      %c0_10 = arith.constant 0 : index
      %c0_11 = arith.constant 0 : index
      %12 = vector.load %arg8[%c0_10, %c0_11] : memref<16x32xf32, #tpu.memory_space<vmem>>, vector<16x32xf32>
      %c0_12 = arith.constant 0 : index
      %c0_13 = arith.constant 0 : index
      %13 = vector.load %arg5[%c0_12, %c0_13] : memref<1x32xf32, #tpu.memory_space<vmem>>, vector<1x32xf32>
      %14 = vector.broadcast %13 : vector<1x32xf32> to vector<16x32xf32>
      %15 = arith.addf %12, %14 : vector<16x32xf32>
      %c0_14 = arith.constant 0 : index
      %c0_15 = arith.constant 0 : index
      %16 = vector.load %arg6[%c0_14, %c0_15] : memref<16x32xbf16, #tpu.memory_space<vmem>>, vector<16x32xbf16>
      %17 = arith.extf %16 : vector<16x32xbf16> to vector<16x32xf32>
      %18 = arith.addf %15, %17 : vector<16x32xf32>
      %19 = arith.truncf %18 : vector<16x32xf32> to vector<16x32xbf16>
      %c0_16 = arith.constant 0 : index
      %c0_17 = arith.constant 0 : index
      %20 = vector.load %arg7[%c0_16, %c0_17] : memref<16x32xbf16, #tpu.memory_space<vmem>>, vector<16x32xbf16>
      tpu.vector_store %arg7[%c0_16, %c0_17], %19 {strides = array<i32>} : memref<16x32xbf16, #tpu.memory_space<vmem>>, vector<16x32xbf16>,
    } else {
    }
    return
  }
  func.func @transform_0(%arg0: i32, %arg1: i32, %arg2: i32) -> (i32, i32) {
    %c0_i32 = arith.constant 0 : i32
    return %arg0, %arg2 : i32, i32
  }
  func.func @transform_1(%arg0: i32, %arg1: i32, %arg2: i32) -> (i32, i32) {
    %c0_i32 = arith.constant 0 : i32
    return %arg2, %arg1 : i32, i32
  }
  func.func @transform_2(%arg0: i32, %arg1: i32, %arg2: i32) -> (i32, i32) {
    %c0_i32 = arith.constant 0 : i32
    %c0_i32_0 = arith.constant 0 : i32
    return %c0_i32, %arg1 : i32, i32
  }
  func.func @transform_3(%arg0: i32, %arg1: i32, %arg2: i32) -> (i32, i32) {
    %c0_i32 = arith.constant 0 : i32
    return %arg0, %arg1 : i32, i32
  }
  func.func @transform_4(%arg0: i32, %arg1: i32, %arg2: i32) -> (i32, i32) {
    %c0_i32 = arith.constant 0 : i32
    return %arg0, %arg1 : i32, i32
  }
}

module attributes {stable_mosaic.version = 11 : i64} {
  func.func @_ln_matmul_kernel(%arg0: i32, %arg1: i32, %arg2: memref<16x32xbf16, #tpu.memory_space<vmem>>, %arg3: memref<1x32xf32, #tpu.memory_space<vmem>>, %arg4: memref<1x32xf32, #tpu.memory_space<vmem>>, %arg5: memref<32x32xbf16, #tpu.memory_space<vmem>>, %arg6: memref<32x32xbf16, #tpu.memory_space<vmem>>, %arg7: memref<32x32xbf16, #tpu.memory_space<vmem>>, %arg8: memref<1x32xf32, #tpu.memory_space<vmem>>, %arg9: memref<1x32xf32, #tpu.memory_space<vmem>>, %arg10: memref<1x32xf32, #tpu.memory_space<vmem>>, %arg11: memref<16x32xbf16, #tpu.memory_space<vmem>>, %arg12: memref<16x32xbf16, #tpu.memory_space<vmem>>, %arg13: memref<16x32xbf16, #tpu.memory_space<vmem>>, %arg14: memref<16x32xbf16, #tpu.memory_space<vmem>>) attributes {dimension_semantics = [#tpu.dimension_semantics<parallel>, #tpu.dimension_semantics<arbitrary>], iteration_bounds = array<i64: 1, 1>, scalar_prefetch = 0 : i64, scratch_operands = 1 : i64, tpu.core_type = #tpu.core_type<tc>, window_params = [{transform_indices = @transform_0, window_bounds = array<i64: 16, 32>}, {pipeline_mode = #tpu.pipeline_mode<synchronous>, transform_indices = @transform_1, window_bounds = array<i64: 1, 32>}, {pipeline_mode = #tpu.pipeline_mode<synchronous>, transform_indices = @transform_2, window_bounds = array<i64: 1, 32>}, {transform_indices = @transform_3, window_bounds = array<i64: 32, 32>}, {transform_indices = @transform_4, window_bounds = array<i64: 32, 32>}, {transform_indices = @transform_5, window_bounds = array<i64: 32, 32>}, {transform_indices = @transform_6, window_bounds = array<i64: 1, 32>}, {transform_indices = @transform_7, window_bounds = array<i64: 1, 32>}, {transform_indices = @transform_8, window_bounds = array<i64: 1, 32>}, {transform_indices = @transform_9, window_bounds = array<i64: 16, 32>}, {transform_indices = @transform_10, window_bounds = array<i64: 16, 32>}, {transform_indices = @transform_11, window_bounds = array<i64: 16, 32>}]} {
    %c0_i32 = arith.constant 0 : i32
    %0 = arith.cmpi eq, %arg1, %c0_i32 : i32
    %1 = arith.extui %0 : i1 to i32
    %c0_i32_0 = arith.constant 0 : i32
    %2 = arith.cmpi ne, %1, %c0_i32_0 : i32
    scf.if %2 {
      %c0_22 = arith.constant 0 : index
      %c0_23 = arith.constant 0 : index
      %25 = vector.load %arg2[%c0_22, %c0_23] : memref<16x32xbf16, #tpu.memory_space<vmem>>, vector<16x32xbf16>
      %26 = arith.extf %25 : vector<16x32xbf16> to vector<16x32xf32>
      %cst_24 = arith.constant dense<0.000000e+00> : vector<16xf32>
      %27 = vector.multi_reduction <add>, %26, %cst_24 [1] : vector<16x32xf32> to vector<16xf32>
      %28 = vector.shape_cast %27 : vector<16xf32> to vector<16x1xf32>
      %cst_25 = arith.constant 3.200000e+01 : f32
      %29 = vector.broadcast %cst_25 : f32 to vector<16x1xf32>
      %30 = arith.divf %28, %29 : vector<16x1xf32>
      %31 = vector.broadcast %30 : vector<16x1xf32> to vector<16x32xf32>
      %32 = arith.subf %26, %31 : vector<16x32xf32>
      %33 = arith.mulf %32, %32 : vector<16x32xf32>
      %cst_26 = arith.constant dense<0.000000e+00> : vector<16xf32>
      %34 = vector.multi_reduction <add>, %33, %cst_26 [1] : vector<16x32xf32> to vector<16xf32>
      %35 = vector.shape_cast %34 : vector<16xf32> to vector<16x1xf32>
      %cst_27 = arith.constant 3.200000e+01 : f32
      %36 = vector.broadcast %cst_27 : f32 to vector<16x1xf32>
      %37 = arith.divf %35, %36 : vector<16x1xf32>
      %cst_28 = arith.constant 9.99999974E-6 : f32
      %38 = vector.broadcast %cst_28 : f32 to vector<16x1xf32>
      %39 = arith.addf %37, %38 : vector<16x1xf32>
      %40 = math.rsqrt %39 : vector<16x1xf32>
      %41 = vector.broadcast %30 : vector<16x1xf32> to vector<16x32xf32>
      %42 = arith.subf %26, %41 : vector<16x32xf32>
      %43 = vector.broadcast %40 : vector<16x1xf32> to vector<16x32xf32>
      %44 = arith.mulf %42, %43 : vector<16x32xf32>
      %c0_29 = arith.constant 0 : index
      %c0_30 = arith.constant 0 : index
      %45 = vector.load %arg3[%c0_29, %c0_30] : memref<1x32xf32, #tpu.memory_space<vmem>>, vector<1x32xf32>
      %46 = vector.broadcast %45 : vector<1x32xf32> to vector<16x32xf32>
      %47 = arith.mulf %44, %46 : vector<16x32xf32>
      %c0_31 = arith.constant 0 : index
      %c0_32 = arith.constant 0 : index
      %48 = vector.load %arg4[%c0_31, %c0_32] : memref<1x32xf32, #tpu.memory_space<vmem>>, vector<1x32xf32>
      %49 = vector.broadcast %48 : vector<1x32xf32> to vector<16x32xf32>
      %50 = arith.addf %47, %49 : vector<16x32xf32>
      %51 = arith.truncf %50 : vector<16x32xf32> to vector<16x32xbf16>
      %c0_33 = arith.constant 0 : index
      %c0_34 = arith.constant 0 : index
      %52 = vector.load %arg14[%c0_33, %c0_34] : memref<16x32xbf16, #tpu.memory_space<vmem>>, vector<16x32xbf16>
      tpu.vector_store %arg14[%c0_33, %c0_34], %51 {strides = array<i32>} : memref<16x32xbf16, #tpu.memory_space<vmem>>, vector<16x32xbf16>,
    } else {
    }
    %c0 = arith.constant 0 : index
    %c0_1 = arith.constant 0 : index
    %3 = vector.load %arg14[%c0, %c0_1] : memref<16x32xbf16, #tpu.memory_space<vmem>>, vector<16x32xbf16>
    %c0_2 = arith.constant 0 : index
    %c0_3 = arith.constant 0 : index
    %4 = vector.load %arg5[%c0_2, %c0_3] : memref<32x32xbf16, #tpu.memory_space<vmem>>, vector<32x32xbf16>
    %cst = arith.constant dense<0.000000e+00> : vector<16x32xf32>
    %5 = tpu.matmul %3, %4, %cst {dimension_numbers = #tpu.dot_dimension_numbers<[1], [0], [0], [1], [0, 0, 1, 1], [], []>} : vector<16x32xbf16>, vector<32x32xbf16>, vector<16x32xf32> -> vector<16x32xf32>
    %c0_4 = arith.constant 0 : index
    %c0_5 = arith.constant 0 : index
    %6 = vector.load %arg8[%c0_4, %c0_5] : memref<1x32xf32, #tpu.memory_space<vmem>>, vector<1x32xf32>
    %7 = vector.broadcast %6 : vector<1x32xf32> to vector<16x32xf32>
    %8 = arith.addf %5, %7 : vector<16x32xf32>
    %9 = arith.truncf %8 : vector<16x32xf32> to vector<16x32xbf16>
    %c0_6 = arith.constant 0 : index
    %c0_7 = arith.constant 0 : index
    %10 = vector.load %arg11[%c0_6, %c0_7] : memref<16x32xbf16, #tpu.memory_space<vmem>>, vector<16x32xbf16>
    tpu.vector_store %arg11[%c0_6, %c0_7], %9 {strides = array<i32>} : memref<16x32xbf16, #tpu.memory_space<vmem>>, vector<16x32xbf16>,
    %c0_8 = arith.constant 0 : index
    %c0_9 = arith.constant 0 : index
    %11 = vector.load %arg6[%c0_8, %c0_9] : memref<32x32xbf16, #tpu.memory_space<vmem>>, vector<32x32xbf16>
    %cst_10 = arith.constant dense<0.000000e+00> : vector<16x32xf32>
    %12 = tpu.matmul %3, %11, %cst_10 {dimension_numbers = #tpu.dot_dimension_numbers<[1], [0], [0], [1], [0, 0, 1, 1], [], []>} : vector<16x32xbf16>, vector<32x32xbf16>, vector<16x32xf32> -> vector<16x32xf32>
    %c0_11 = arith.constant 0 : index
    %c0_12 = arith.constant 0 : index
    %13 = vector.load %arg9[%c0_11, %c0_12] : memref<1x32xf32, #tpu.memory_space<vmem>>, vector<1x32xf32>
    %14 = vector.broadcast %13 : vector<1x32xf32> to vector<16x32xf32>
    %15 = arith.addf %12, %14 : vector<16x32xf32>
    %16 = arith.truncf %15 : vector<16x32xf32> to vector<16x32xbf16>
    %c0_13 = arith.constant 0 : index
    %c0_14 = arith.constant 0 : index
    %17 = vector.load %arg12[%c0_13, %c0_14] : memref<16x32xbf16, #tpu.memory_space<vmem>>, vector<16x32xbf16>
    tpu.vector_store %arg12[%c0_13, %c0_14], %16 {strides = array<i32>} : memref<16x32xbf16, #tpu.memory_space<vmem>>, vector<16x32xbf16>,
    %c0_15 = arith.constant 0 : index
    %c0_16 = arith.constant 0 : index
    %18 = vector.load %arg7[%c0_15, %c0_16] : memref<32x32xbf16, #tpu.memory_space<vmem>>, vector<32x32xbf16>
    %cst_17 = arith.constant dense<0.000000e+00> : vector<16x32xf32>
    %19 = tpu.matmul %3, %18, %cst_17 {dimension_numbers = #tpu.dot_dimension_numbers<[1], [0], [0], [1], [0, 0, 1, 1], [], []>} : vector<16x32xbf16>, vector<32x32xbf16>, vector<16x32xf32> -> vector<16x32xf32>
    %c0_18 = arith.constant 0 : index
    %c0_19 = arith.constant 0 : index
    %20 = vector.load %arg10[%c0_18, %c0_19] : memref<1x32xf32, #tpu.memory_space<vmem>>, vector<1x32xf32>
    %21 = vector.broadcast %20 : vector<1x32xf32> to vector<16x32xf32>
    %22 = arith.addf %19, %21 : vector<16x32xf32>
    %23 = arith.truncf %22 : vector<16x32xf32> to vector<16x32xbf16>
    %c0_20 = arith.constant 0 : index
    %c0_21 = arith.constant 0 : index
    %24 = vector.load %arg13[%c0_20, %c0_21] : memref<16x32xbf16, #tpu.memory_space<vmem>>, vector<16x32xbf16>
    tpu.vector_store %arg13[%c0_20, %c0_21], %23 {strides = array<i32>} : memref<16x32xbf16, #tpu.memory_space<vmem>>, vector<16x32xbf16>,
    return
  }
  func.func @transform_0(%arg0: i32, %arg1: i32) -> (i32, i32) {
    %c0_i32 = arith.constant 0 : i32
    %c0_i32_0 = arith.constant 0 : i32
    return %arg0, %c0_i32 : i32, i32
  }
  func.func @transform_1(%arg0: i32, %arg1: i32) -> (i32, i32) {
    %c0_i32 = arith.constant 0 : i32
    %c0_i32_0 = arith.constant 0 : i32
    %c0_i32_1 = arith.constant 0 : i32
    return %c0_i32, %c0_i32_0 : i32, i32
  }
  func.func @transform_2(%arg0: i32, %arg1: i32) -> (i32, i32) {
    %c0_i32 = arith.constant 0 : i32
    %c0_i32_0 = arith.constant 0 : i32
    %c0_i32_1 = arith.constant 0 : i32
    return %c0_i32, %c0_i32_0 : i32, i32
  }
  func.func @transform_3(%arg0: i32, %arg1: i32) -> (i32, i32) {
    %c0_i32 = arith.constant 0 : i32
    %c0_i32_0 = arith.constant 0 : i32
    return %c0_i32, %arg1 : i32, i32
  }
  func.func @transform_4(%arg0: i32, %arg1: i32) -> (i32, i32) {
    %c0_i32 = arith.constant 0 : i32
    %c0_i32_0 = arith.constant 0 : i32
    return %c0_i32, %arg1 : i32, i32
  }
  func.func @transform_5(%arg0: i32, %arg1: i32) -> (i32, i32) {
    %c0_i32 = arith.constant 0 : i32
    %c0_i32_0 = arith.constant 0 : i32
    return %c0_i32, %arg1 : i32, i32
  }
  func.func @transform_6(%arg0: i32, %arg1: i32) -> (i32, i32) {
    %c0_i32 = arith.constant 0 : i32
    %c0_i32_0 = arith.constant 0 : i32
    return %c0_i32, %arg1 : i32, i32
  }
  func.func @transform_7(%arg0: i32, %arg1: i32) -> (i32, i32) {
    %c0_i32 = arith.constant 0 : i32
    %c0_i32_0 = arith.constant 0 : i32
    return %c0_i32, %arg1 : i32, i32
  }
  func.func @transform_8(%arg0: i32, %arg1: i32) -> (i32, i32) {
    %c0_i32 = arith.constant 0 : i32
    %c0_i32_0 = arith.constant 0 : i32
    return %c0_i32, %arg1 : i32, i32
  }
  func.func @transform_9(%arg0: i32, %arg1: i32) -> (i32, i32) {
    %c0_i32 = arith.constant 0 : i32
    return %arg0, %arg1 : i32, i32
  }
  func.func @transform_10(%arg0: i32, %arg1: i32) -> (i32, i32) {
    %c0_i32 = arith.constant 0 : i32
    return %arg0, %arg1 : i32, i32
  }
  func.func @transform_11(%arg0: i32, %arg1: i32) -> (i32, i32) {
    %c0_i32 = arith.constant 0 : i32
    return %arg0, %arg1 : i32, i32
  }
}

module attributes {stable_mosaic.version = 11 : i64} {
  func.func @_ln_matmul_kernel(%arg0: i32, %arg1: i32, %arg2: memref<16x32xbf16, #tpu.memory_space<vmem>>, %arg3: memref<16x32xbf16, #tpu.memory_space<vmem>>, %arg4: memref<1x32xf32, #tpu.memory_space<vmem>>, %arg5: memref<1x32xf32, #tpu.memory_space<vmem>>, %arg6: memref<1x32xf32, #tpu.memory_space<vmem>>, %arg7: memref<1x32xf32, #tpu.memory_space<vmem>>, %arg8: memref<64x64xbf16, #tpu.memory_space<vmem>>, %arg9: memref<64x64xbf16, #tpu.memory_space<vmem>>, %arg10: memref<64x64xbf16, #tpu.memory_space<vmem>>, %arg11: memref<1x64xf32, #tpu.memory_space<vmem>>, %arg12: memref<1x64xf32, #tpu.memory_space<vmem>>, %arg13: memref<1x64xf32, #tpu.memory_space<vmem>>, %arg14: memref<16x64xbf16, #tpu.memory_space<vmem>>, %arg15: memref<16x64xbf16, #tpu.memory_space<vmem>>, %arg16: memref<16x64xbf16, #tpu.memory_space<vmem>>, %arg17: memref<16x64xbf16, #tpu.memory_space<vmem>>) attributes {dimension_semantics = [#tpu.dimension_semantics<parallel>, #tpu.dimension_semantics<arbitrary>], iteration_bounds = array<i64: 1, 1>, scalar_prefetch = 0 : i64, scratch_operands = 1 : i64, tpu.core_type = #tpu.core_type<tc>, window_params = [{transform_indices = @transform_0, window_bounds = array<i64: 16, 32>}, {transform_indices = @transform_1, window_bounds = array<i64: 16, 32>}, {pipeline_mode = #tpu.pipeline_mode<synchronous>, transform_indices = @transform_2, window_bounds = array<i64: 1, 32>}, {pipeline_mode = #tpu.pipeline_mode<synchronous>, transform_indices = @transform_3, window_bounds = array<i64: 1, 32>}, {pipeline_mode = #tpu.pipeline_mode<synchronous>, transform_indices = @transform_4, window_bounds = array<i64: 1, 32>}, {pipeline_mode = #tpu.pipeline_mode<synchronous>, transform_indices = @transform_5, window_bounds = array<i64: 1, 32>}, {transform_indices = @transform_6, window_bounds = array<i64: 64, 64>}, {transform_indices = @transform_7, window_bounds = array<i64: 64, 64>}, {transform_indices = @transform_8, window_bounds = array<i64: 64, 64>}, {transform_indices = @transform_9, window_bounds = array<i64: 1, 64>}, {transform_indices = @transform_10, window_bounds = array<i64: 1, 64>}, {transform_indices = @transform_11, window_bounds = array<i64: 1, 64>}, {transform_indices = @transform_12, window_bounds = array<i64: 16, 64>}, {transform_indices = @transform_13, window_bounds = array<i64: 16, 64>}, {transform_indices = @transform_14, window_bounds = array<i64: 16, 64>}]} {
    %c0_i32 = arith.constant 0 : i32
    %0 = arith.cmpi eq, %arg1, %c0_i32 : i32
    %1 = arith.extui %0 : i1 to i32
    %c0_i32_0 = arith.constant 0 : i32
    %2 = arith.cmpi ne, %1, %c0_i32_0 : i32
    scf.if %2 {
      %c0_22 = arith.constant 0 : index
      %c0_23 = arith.constant 0 : index
      %25 = vector.load %arg2[%c0_22, %c0_23] : memref<16x32xbf16, #tpu.memory_space<vmem>>, vector<16x32xbf16>
      %26 = arith.extf %25 : vector<16x32xbf16> to vector<16x32xf32>
      %c0_24 = arith.constant 0 : index
      %c0_25 = arith.constant 0 : index
      %27 = vector.load %arg3[%c0_24, %c0_25] : memref<16x32xbf16, #tpu.memory_space<vmem>>, vector<16x32xbf16>
      %28 = arith.extf %27 : vector<16x32xbf16> to vector<16x32xf32>
      %cst_26 = arith.constant dense<0.000000e+00> : vector<16xf32>
      %29 = vector.multi_reduction <add>, %26, %cst_26 [1] : vector<16x32xf32> to vector<16xf32>
      %30 = vector.shape_cast %29 : vector<16xf32> to vector<16x1xf32>
      %cst_27 = arith.constant dense<0.000000e+00> : vector<16xf32>
      %31 = vector.multi_reduction <add>, %28, %cst_27 [1] : vector<16x32xf32> to vector<16xf32>
      %32 = vector.shape_cast %31 : vector<16xf32> to vector<16x1xf32>
      %33 = arith.addf %30, %32 : vector<16x1xf32>
      %cst_28 = arith.constant 6.400000e+01 : f32
      %34 = vector.broadcast %cst_28 : f32 to vector<16x1xf32>
      %35 = arith.divf %33, %34 : vector<16x1xf32>
      %36 = vector.broadcast %35 : vector<16x1xf32> to vector<16x32xf32>
      %37 = arith.subf %26, %36 : vector<16x32xf32>
      %38 = arith.mulf %37, %37 : vector<16x32xf32>
      %cst_29 = arith.constant dense<0.000000e+00> : vector<16xf32>
      %39 = vector.multi_reduction <add>, %38, %cst_29 [1] : vector<16x32xf32> to vector<16xf32>
      %40 = vector.shape_cast %39 : vector<16xf32> to vector<16x1xf32>
      %41 = vector.broadcast %35 : vector<16x1xf32> to vector<16x32xf32>
      %42 = arith.subf %28, %41 : vector<16x32xf32>
      %43 = arith.mulf %42, %42 : vector<16x32xf32>
      %cst_30 = arith.constant dense<0.000000e+00> : vector<16xf32>
      %44 = vector.multi_reduction <add>, %43, %cst_30 [1] : vector<16x32xf32> to vector<16xf32>
      %45 = vector.shape_cast %44 : vector<16xf32> to vector<16x1xf32>
      %46 = arith.addf %40, %45 : vector<16x1xf32>
      %cst_31 = arith.constant 6.400000e+01 : f32
      %47 = vector.broadcast %cst_31 : f32 to vector<16x1xf32>
      %48 = arith.divf %46, %47 : vector<16x1xf32>
      %cst_32 = arith.constant 9.99999974E-6 : f32
      %49 = vector.broadcast %cst_32 : f32 to vector<16x1xf32>
      %50 = arith.addf %48, %49 : vector<16x1xf32>
      %51 = math.rsqrt %50 : vector<16x1xf32>
      %52 = vector.broadcast %35 : vector<16x1xf32> to vector<16x32xf32>
      %53 = arith.subf %26, %52 : vector<16x32xf32>
      %54 = vector.broadcast %51 : vector<16x1xf32> to vector<16x32xf32>
      %55 = arith.mulf %53, %54 : vector<16x32xf32>
      %c0_33 = arith.constant 0 : index
      %c0_34 = arith.constant 0 : index
      %56 = vector.load %arg4[%c0_33, %c0_34] : memref<1x32xf32, #tpu.memory_space<vmem>>, vector<1x32xf32>
      %57 = vector.broadcast %56 : vector<1x32xf32> to vector<16x32xf32>
      %58 = arith.mulf %55, %57 : vector<16x32xf32>
      %c0_35 = arith.constant 0 : index
      %c0_36 = arith.constant 0 : index
      %59 = vector.load %arg6[%c0_35, %c0_36] : memref<1x32xf32, #tpu.memory_space<vmem>>, vector<1x32xf32>
      %60 = vector.broadcast %59 : vector<1x32xf32> to vector<16x32xf32>
      %61 = arith.addf %58, %60 : vector<16x32xf32>
      %62 = arith.truncf %61 : vector<16x32xf32> to vector<16x32xbf16>
      %c0_37 = arith.constant 0 : index
      %c0_38 = arith.constant 0 : index
      %63 = vector.load %arg17[%c0_37, %c0_38] : memref<16x64xbf16, #tpu.memory_space<vmem>>, vector<16x32xbf16>
      tpu.vector_store %arg17[%c0_37, %c0_38], %62 {strides = array<i32>} : memref<16x64xbf16, #tpu.memory_space<vmem>>, vector<16x32xbf16>,
      %64 = vector.broadcast %35 : vector<16x1xf32> to vector<16x32xf32>
      %65 = arith.subf %28, %64 : vector<16x32xf32>
      %66 = vector.broadcast %51 : vector<16x1xf32> to vector<16x32xf32>
      %67 = arith.mulf %65, %66 : vector<16x32xf32>
      %c0_39 = arith.constant 0 : index
      %c0_40 = arith.constant 0 : index
      %68 = vector.load %arg5[%c0_39, %c0_40] : memref<1x32xf32, #tpu.memory_space<vmem>>, vector<1x32xf32>
      %69 = vector.broadcast %68 : vector<1x32xf32> to vector<16x32xf32>
      %70 = arith.mulf %67, %69 : vector<16x32xf32>
      %c0_41 = arith.constant 0 : index
      %c0_42 = arith.constant 0 : index
      %71 = vector.load %arg7[%c0_41, %c0_42] : memref<1x32xf32, #tpu.memory_space<vmem>>, vector<1x32xf32>
      %72 = vector.broadcast %71 : vector<1x32xf32> to vector<16x32xf32>
      %73 = arith.addf %70, %72 : vector<16x32xf32>
      %74 = arith.truncf %73 : vector<16x32xf32> to vector<16x32xbf16>
      %c0_43 = arith.constant 0 : index
      %c32 = arith.constant 32 : index
      %75 = vector.load %arg17[%c0_43, %c32] : memref<16x64xbf16, #tpu.memory_space<vmem>>, vector<16x32xbf16>
      tpu.vector_store %arg17[%c0_43, %c32], %74 {strides = array<i32>} : memref<16x64xbf16, #tpu.memory_space<vmem>>, vector<16x32xbf16>,
    } else {
    }
    %c0 = arith.constant 0 : index
    %c0_1 = arith.constant 0 : index
    %3 = vector.load %arg17[%c0, %c0_1] : memref<16x64xbf16, #tpu.memory_space<vmem>>, vector<16x64xbf16>
    %c0_2 = arith.constant 0 : index
    %c0_3 = arith.constant 0 : index
    %4 = vector.load %arg8[%c0_2, %c0_3] : memref<64x64xbf16, #tpu.memory_space<vmem>>, vector<64x64xbf16>
    %cst = arith.constant dense<0.000000e+00> : vector<16x64xf32>
    %5 = tpu.matmul %3, %4, %cst {dimension_numbers = #tpu.dot_dimension_numbers<[1], [0], [0], [1], [0, 0, 1, 1], [], []>} : vector<16x64xbf16>, vector<64x64xbf16>, vector<16x64xf32> -> vector<16x64xf32>
    %c0_4 = arith.constant 0 : index
    %c0_5 = arith.constant 0 : index
    %6 = vector.load %arg11[%c0_4, %c0_5] : memref<1x64xf32, #tpu.memory_space<vmem>>, vector<1x64xf32>
    %7 = vector.broadcast %6 : vector<1x64xf32> to vector<16x64xf32>
    %8 = arith.addf %5, %7 : vector<16x64xf32>
    %9 = arith.truncf %8 : vector<16x64xf32> to vector<16x64xbf16>
    %c0_6 = arith.constant 0 : index
    %c0_7 = arith.constant 0 : index
    %10 = vector.load %arg14[%c0_6, %c0_7] : memref<16x64xbf16, #tpu.memory_space<vmem>>, vector<16x64xbf16>
    tpu.vector_store %arg14[%c0_6, %c0_7], %9 {strides = array<i32>} : memref<16x64xbf16, #tpu.memory_space<vmem>>, vector<16x64xbf16>,
    %c0_8 = arith.constant 0 : index
    %c0_9 = arith.constant 0 : index
    %11 = vector.load %arg9[%c0_8, %c0_9] : memref<64x64xbf16, #tpu.memory_space<vmem>>, vector<64x64xbf16>
    %cst_10 = arith.constant dense<0.000000e+00> : vector<16x64xf32>
    %12 = tpu.matmul %3, %11, %cst_10 {dimension_numbers = #tpu.dot_dimension_numbers<[1], [0], [0], [1], [0, 0, 1, 1], [], []>} : vector<16x64xbf16>, vector<64x64xbf16>, vector<16x64xf32> -> vector<16x64xf32>
    %c0_11 = arith.constant 0 : index
    %c0_12 = arith.constant 0 : index
    %13 = vector.load %arg12[%c0_11, %c0_12] : memref<1x64xf32, #tpu.memory_space<vmem>>, vector<1x64xf32>
    %14 = vector.broadcast %13 : vector<1x64xf32> to vector<16x64xf32>
    %15 = arith.addf %12, %14 : vector<16x64xf32>
    %16 = arith.truncf %15 : vector<16x64xf32> to vector<16x64xbf16>
    %c0_13 = arith.constant 0 : index
    %c0_14 = arith.constant 0 : index
    %17 = vector.load %arg15[%c0_13, %c0_14] : memref<16x64xbf16, #tpu.memory_space<vmem>>, vector<16x64xbf16>
    tpu.vector_store %arg15[%c0_13, %c0_14], %16 {strides = array<i32>} : memref<16x64xbf16, #tpu.memory_space<vmem>>, vector<16x64xbf16>,
    %c0_15 = arith.constant 0 : index
    %c0_16 = arith.constant 0 : index
    %18 = vector.load %arg10[%c0_15, %c0_16] : memref<64x64xbf16, #tpu.memory_space<vmem>>, vector<64x64xbf16>
    %cst_17 = arith.constant dense<0.000000e+00> : vector<16x64xf32>
    %19 = tpu.matmul %3, %18, %cst_17 {dimension_numbers = #tpu.dot_dimension_numbers<[1], [0], [0], [1], [0, 0, 1, 1], [], []>} : vector<16x64xbf16>, vector<64x64xbf16>, vector<16x64xf32> -> vector<16x64xf32>
    %c0_18 = arith.constant 0 : index
    %c0_19 = arith.constant 0 : index
    %20 = vector.load %arg13[%c0_18, %c0_19] : memref<1x64xf32, #tpu.memory_space<vmem>>, vector<1x64xf32>
    %21 = vector.broadcast %20 : vector<1x64xf32> to vector<16x64xf32>
    %22 = arith.addf %19, %21 : vector<16x64xf32>
    %23 = arith.truncf %22 : vector<16x64xf32> to vector<16x64xbf16>
    %c0_20 = arith.constant 0 : index
    %c0_21 = arith.constant 0 : index
    %24 = vector.load %arg16[%c0_20, %c0_21] : memref<16x64xbf16, #tpu.memory_space<vmem>>, vector<16x64xbf16>
    tpu.vector_store %arg16[%c0_20, %c0_21], %23 {strides = array<i32>} : memref<16x64xbf16, #tpu.memory_space<vmem>>, vector<16x64xbf16>,
    return
  }
  func.func @transform_0(%arg0: i32, %arg1: i32) -> (i32, i32) {
    %c0_i32 = arith.constant 0 : i32
    %c0_i32_0 = arith.constant 0 : i32
    return %arg0, %c0_i32 : i32, i32
  }
  func.func @transform_1(%arg0: i32, %arg1: i32) -> (i32, i32) {
    %c0_i32 = arith.constant 0 : i32
    %c0_i32_0 = arith.constant 0 : i32
    return %arg0, %c0_i32 : i32, i32
  }
  func.func @transform_2(%arg0: i32, %arg1: i32) -> (i32, i32) {
    %c0_i32 = arith.constant 0 : i32
    %c0_i32_0 = arith.constant 0 : i32
    %c0_i32_1 = arith.constant 0 : i32
    return %c0_i32, %c0_i32_0 : i32, i32
  }
  func.func @transform_3(%arg0: i32, %arg1: i32) -> (i32, i32) {
    %c0_i32 = arith.constant 0 : i32
    %c0_i32_0 = arith.constant 0 : i32
    %c0_i32_1 = arith.constant 0 : i32
    return %c0_i32, %c0_i32_0 : i32, i32
  }
  func.func @transform_4(%arg0: i32, %arg1: i32) -> (i32, i32) {
    %c0_i32 = arith.constant 0 : i32
    %c0_i32_0 = arith.constant 0 : i32
    %c0_i32_1 = arith.constant 0 : i32
    return %c0_i32, %c0_i32_0 : i32, i32
  }
  func.func @transform_5(%arg0: i32, %arg1: i32) -> (i32, i32) {
    %c0_i32 = arith.constant 0 : i32
    %c0_i32_0 = arith.constant 0 : i32
    %c0_i32_1 = arith.constant 0 : i32
    return %c0_i32, %c0_i32_0 : i32, i32
  }
  func.func @transform_6(%arg0: i32, %arg1: i32) -> (i32, i32) {
    %c0_i32 = arith.constant 0 : i32
    %c0_i32_0 = arith.constant 0 : i32
    return %c0_i32, %arg1 : i32, i32
  }
  func.func @transform_7(%arg0: i32, %arg1: i32) -> (i32, i32) {
    %c0_i32 = arith.constant 0 : i32
    %c0_i32_0 = arith.constant 0 : i32
    return %c0_i32, %arg1 : i32, i32
  }
  func.func @transform_8(%arg0: i32, %arg1: i32) -> (i32, i32) {
    %c0_i32 = arith.constant 0 : i32
    %c0_i32_0 = arith.constant 0 : i32
    return %c0_i32, %arg1 : i32, i32
  }
  func.func @transform_9(%arg0: i32, %arg1: i32) -> (i32, i32) {
    %c0_i32 = arith.constant 0 : i32
    %c0_i32_0 = arith.constant 0 : i32
    return %c0_i32, %arg1 : i32, i32
  }
  func.func @transform_10(%arg0: i32, %arg1: i32) -> (i32, i32) {
    %c0_i32 = arith.constant 0 : i32
    %c0_i32_0 = arith.constant 0 : i32
    return %c0_i32, %arg1 : i32, i32
  }
  func.func @transform_11(%arg0: i32, %arg1: i32) -> (i32, i32) {
    %c0_i32 = arith.constant 0 : i32
    %c0_i32_0 = arith.constant 0 : i32
    return %c0_i32, %arg1 : i32, i32
  }
  func.func @transform_12(%arg0: i32, %arg1: i32) -> (i32, i32) {
    %c0_i32 = arith.constant 0 : i32
    return %arg0, %arg1 : i32, i32
  }
  func.func @transform_13(%arg0: i32, %arg1: i32) -> (i32, i32) {
    %c0_i32 = arith.constant 0 : i32
    return %arg0, %arg1 : i32, i32
  }
  func.func @transform_14(%arg0: i32, %arg1: i32) -> (i32, i32) {
    %c0_i32 = arith.constant 0 : i32
    return %arg0, %arg1 : i32, i32
  }
}

module attributes {stable_mosaic.version = 11 : i64} {
  func.func @_matmul_kernel(%arg0: i32, %arg1: i32, %arg2: i32, %arg3: memref<16x64xbf16, #tpu.memory_space<vmem>>, %arg4: memref<64x32xbf16, #tpu.memory_space<vmem>>, %arg5: memref<1x32xf32, #tpu.memory_space<vmem>>, %arg6: memref<16x32xbf16, #tpu.memory_space<vmem>>, %arg7: memref<16x32xbf16, #tpu.memory_space<vmem>>, %arg8: memref<16x32xf32, #tpu.memory_space<vmem>>) attributes {dimension_semantics = [#tpu.dimension_semantics<parallel>, #tpu.dimension_semantics<parallel>, #tpu.dimension_semantics<arbitrary>], iteration_bounds = array<i64: 1, 1, 1>, scalar_prefetch = 0 : i64, scratch_operands = 1 : i64, tpu.core_type = #tpu.core_type<tc>, window_params = [{transform_indices = @transform_0, window_bounds = array<i64: 16, 64>}, {transform_indices = @transform_1, window_bounds = array<i64: 64, 32>}, {transform_indices = @transform_2, window_bounds = array<i64: 1, 32>}, {transform_indices = @transform_3, window_bounds = array<i64: 16, 32>}, {transform_indices = @transform_4, window_bounds = array<i64: 16, 32>}]} {
    %c0_i32 = arith.constant 0 : i32
    %0 = arith.cmpi eq, %arg2, %c0_i32 : i32
    %1 = arith.extui %0 : i1 to i32
    %c0_i32_0 = arith.constant 0 : i32
    %2 = arith.cmpi ne, %1, %c0_i32_0 : i32
    scf.if %2 {
      %cst_10 = arith.constant 0.000000e+00 : f32
      %12 = vector.broadcast %cst_10 : f32 to vector<16x32xf32>
      %c0_11 = arith.constant 0 : index
      %c0_12 = arith.constant 0 : index
      %13 = vector.load %arg8[%c0_11, %c0_12] : memref<16x32xf32, #tpu.memory_space<vmem>>, vector<16x32xf32>
      tpu.vector_store %arg8[%c0_11, %c0_12], %12 {strides = array<i32>} : memref<16x32xf32, #tpu.memory_space<vmem>>, vector<16x32xf32>,
    } else {
    }
    %c0 = arith.constant 0 : index
    %c0_1 = arith.constant 0 : index
    %3 = vector.load %arg4[%c0, %c0_1] : memref<64x32xbf16, #tpu.memory_space<vmem>>, vector<64x32xbf16>
    %c0_2 = arith.constant 0 : index
    %c0_3 = arith.constant 0 : index
    %4 = vector.load %arg8[%c0_2, %c0_3] : memref<16x32xf32, #tpu.memory_space<vmem>>, vector<16x32xf32>
    %c0_4 = arith.constant 0 : index
    %c0_5 = arith.constant 0 : index
    %5 = vector.load %arg3[%c0_4, %c0_5] : memref<16x64xbf16, #tpu.memory_space<vmem>>, vector<16x64xbf16>
    %cst = arith.constant dense<0.000000e+00> : vector<16x32xf32>
    %6 = tpu.matmul %5, %3, %cst {dimension_numbers = #tpu.dot_dimension_numbers<[1], [0], [0], [1], [0, 0, 1, 1], [], []>} : vector<16x64xbf16>, vector<64x32xbf16>, vector<16x32xf32> -> vector<16x32xf32>
    %7 = arith.addf %4, %6 : vector<16x32xf32>
    %c0_6 = arith.constant 0 : index
    %c0_7 = arith.constant 0 : index
    %8 = vector.load %arg8[%c0_6, %c0_7] : memref<16x32xf32, #tpu.memory_space<vmem>>, vector<16x32xf32>
    tpu.vector_store %arg8[%c0_6, %c0_7], %7 {strides = array<i32>} : memref<16x32xf32, #tpu.memory_space<vmem>>, vector<16x32xf32>,
    %c0_i32_8 = arith.constant 0 : i32
    %9 = arith.cmpi eq, %arg2, %c0_i32_8 : i32
    %10 = arith.extui %9 : i1 to i32
    %c0_i32_9 = arith.constant 0 : i32
    %11 = arith.cmpi ne, %10, %c0_i32_9 : i32
    scf.if %11 {
      %c0_10 = arith.constant 0 : index
      %c0_11 = arith.constant 0 : index
      %12 = vector.load %arg8[%c0_10, %c0_11] : memref<16x32xf32, #tpu.memory_space<vmem>>, vector<16x32xf32>
      %c0_12 = arith.constant 0 : index
      %c0_13 = arith.constant 0 : index
      %13 = vector.load %arg5[%c0_12, %c0_13] : memref<1x32xf32, #tpu.memory_space<vmem>>, vector<1x32xf32>
      %14 = vector.broadcast %13 : vector<1x32xf32> to vector<16x32xf32>
      %15 = arith.addf %12, %14 : vector<16x32xf32>
      %c0_14 = arith.constant 0 : index
      %c0_15 = arith.constant 0 : index
      %16 = vector.load %arg6[%c0_14, %c0_15] : memref<16x32xbf16, #tpu.memory_space<vmem>>, vector<16x32xbf16>
      %17 = arith.extf %16 : vector<16x32xbf16> to vector<16x32xf32>
      %18 = arith.addf %15, %17 : vector<16x32xf32>
      %19 = arith.truncf %18 : vector<16x32xf32> to vector<16x32xbf16>
      %c0_16 = arith.constant 0 : index
      %c0_17 = arith.constant 0 : index
      %20 = vector.load %arg7[%c0_16, %c0_17] : memref<16x32xbf16, #tpu.memory_space<vmem>>, vector<16x32xbf16>
      tpu.vector_store %arg7[%c0_16, %c0_17], %19 {strides = array<i32>} : memref<16x32xbf16, #tpu.memory_space<vmem>>, vector<16x32xbf16>,
    } else {
    }
    return
  }
  func.func @transform_0(%arg0: i32, %arg1: i32, %arg2: i32) -> (i32, i32) {
    %c0_i32 = arith.constant 0 : i32
    return %arg0, %arg2 : i32, i32
  }
  func.func @transform_1(%arg0: i32, %arg1: i32, %arg2: i32) -> (i32, i32) {
    %c0_i32 = arith.constant 0 : i32
    return %arg2, %arg1 : i32, i32
  }
  func.func @transform_2(%arg0: i32, %arg1: i32, %arg2: i32) -> (i32, i32) {
    %c0_i32 = arith.constant 0 : i32
    %c0_i32_0 = arith.constant 0 : i32
    return %c0_i32, %arg1 : i32, i32
  }
  func.func @transform_3(%arg0: i32, %arg1: i32, %arg2: i32) -> (i32, i32) {
    %c0_i32 = arith.constant 0 : i32
    return %arg0, %arg1 : i32, i32
  }
  func.func @transform_4(%arg0: i32, %arg1: i32, %arg2: i32) -> (i32, i32) {
    %c0_i32 = arith.constant 0 : i32
    return %arg0, %arg1 : i32, i32
  }
}

module attributes {stable_mosaic.version = 11 : i64} {
  func.func @_flash_attn_kernel(%arg0: i32, %arg1: i32, %arg2: i32, %arg3: memref<1x8x64xbf16, #tpu.memory_space<vmem>>, %arg4: memref<1x8x64xbf16, #tpu.memory_space<vmem>>, %arg5: memref<1x8x64xbf16, #tpu.memory_space<vmem>>, %arg6: memref<1x8x64xbf16, #tpu.memory_space<vmem>>, %arg7: memref<8x4xf32, #tpu.memory_space<vmem>>, %arg8: memref<8x4xf32, #tpu.memory_space<vmem>>, %arg9: memref<8x64xf32, #tpu.memory_space<vmem>>) attributes {dimension_semantics = [#tpu.dimension_semantics<parallel>, #tpu.dimension_semantics<parallel>, #tpu.dimension_semantics<arbitrary>], iteration_bounds = array<i64: 2, 1, 1>, scalar_prefetch = 0 : i64, scratch_operands = 3 : i64, tpu.core_type = #tpu.core_type<tc>, window_params = [{transform_indices = @transform_0, window_bounds = array<i64: 1, 8, 64>}, {transform_indices = @transform_1, window_bounds = array<i64: 1, 8, 64>}, {transform_indices = @transform_2, window_bounds = array<i64: 1, 8, 64>}, {transform_indices = @transform_3, window_bounds = array<i64: 1, 8, 64>}]} {
    %c0_i32 = arith.constant 0 : i32
    %0 = arith.cmpi eq, %arg2, %c0_i32 : i32
    %1 = arith.extui %0 : i1 to i32
    %c0_i32_0 = arith.constant 0 : i32
    %2 = arith.cmpi ne, %1, %c0_i32_0 : i32
    scf.if %2 {
      %cst_65 = arith.constant 0xFF800000 : f32
      %125 = vector.broadcast %cst_65 : f32 to vector<8x4xf32>
      %c0_66 = arith.constant 0 : index
      %c0_67 = arith.constant 0 : index
      %126 = vector.load %arg7[%c0_66, %c0_67] : memref<8x4xf32, #tpu.memory_space<vmem>>, vector<8x4xf32>
      tpu.vector_store %arg7[%c0_66, %c0_67], %125 {strides = array<i32>} : memref<8x4xf32, #tpu.memory_space<vmem>>, vector<8x4xf32>,
      %cst_68 = arith.constant 0.000000e+00 : f32
      %127 = vector.broadcast %cst_68 : f32 to vector<8x4xf32>
      %c0_69 = arith.constant 0 : index
      %c0_70 = arith.constant 0 : index
      %128 = vector.load %arg8[%c0_69, %c0_70] : memref<8x4xf32, #tpu.memory_space<vmem>>, vector<8x4xf32>
      tpu.vector_store %arg8[%c0_69, %c0_70], %127 {strides = array<i32>} : memref<8x4xf32, #tpu.memory_space<vmem>>, vector<8x4xf32>,
      %cst_71 = arith.constant 0.000000e+00 : f32
      %129 = vector.broadcast %cst_71 : f32 to vector<8x64xf32>
      %c0_72 = arith.constant 0 : index
      %c0_73 = arith.constant 0 : index
      %130 = vector.load %arg9[%c0_72, %c0_73] : memref<8x64xf32, #tpu.memory_space<vmem>>, vector<8x64xf32>
      tpu.vector_store %arg9[%c0_72, %c0_73], %129 {strides = array<i32>} : memref<8x64xf32, #tpu.memory_space<vmem>>, vector<8x64xf32>,
    } else {
    }
    %c0 = arith.constant 0 : index
    %c0_1 = arith.constant 0 : index
    %c0_2 = arith.constant 0 : index
    %3 = vector.load %arg3[%c0, %c0_1, %c0_2] : memref<1x8x64xbf16, #tpu.memory_space<vmem>>, vector<1x8x64xbf16>
    %4 = vector.shape_cast %3 : vector<1x8x64xbf16> to vector<8x64xbf16>
    %c0_3 = arith.constant 0 : index
    %c0_4 = arith.constant 0 : index
    %c0_5 = arith.constant 0 : index
    %5 = vector.load %arg4[%c0_3, %c0_4, %c0_5] : memref<1x8x64xbf16, #tpu.memory_space<vmem>>, vector<1x8x64xbf16>
    %6 = vector.shape_cast %5 : vector<1x8x64xbf16> to vector<8x64xbf16>
    %c0_6 = arith.constant 0 : index
    %c0_7 = arith.constant 0 : index
    %c0_8 = arith.constant 0 : index
    %7 = vector.load %arg5[%c0_6, %c0_7, %c0_8] : memref<1x8x64xbf16, #tpu.memory_space<vmem>>, vector<1x8x64xbf16>
    %8 = vector.shape_cast %7 : vector<1x8x64xbf16> to vector<8x64xbf16>
    %cst = arith.constant 1.000000e+00 : bf16
    %9 = vector.broadcast %cst : bf16 to vector<8x1xbf16>
    %10 = vector.extract_strided_slice %4 {offsets = [0, 0], sizes = [8, 16], strides = [1, 1]} : vector<8x64xbf16> to vector<8x16xbf16>
    %11 = vector.extract_strided_slice %6 {offsets = [0, 0], sizes = [8, 16], strides = [1, 1]} : vector<8x64xbf16> to vector<8x16xbf16>
    %cst_9 = arith.constant dense<0.000000e+00> : vector<8x8xf32>
    %12 = tpu.matmul %10, %11, %cst_9 {dimension_numbers = #tpu.dot_dimension_numbers<[1], [1], [0], [0], [0, 0, 1, 0], [], []>} : vector<8x16xbf16>, vector<8x16xbf16>, vector<8x8xf32> -> vector<8x8xf32>
    %c0_10 = arith.constant 0 : index
    %c0_11 = arith.constant 0 : index
    %13 = vector.load %arg7[%c0_10, %c0_11] : memref<8x4xf32, #tpu.memory_space<vmem>>, vector<8x1xf32>
    %cst_12 = arith.constant dense<0xFF800000> : vector<8xf32>
    %14 = vector.multi_reduction <maximumf>, %12, %cst_12 [1] : vector<8x8xf32> to vector<8xf32>
    %15 = vector.shape_cast %14 : vector<8xf32> to vector<8x1xf32>
    %16 = arith.maximumf %13, %15 : vector<8x1xf32>
    %17 = arith.subf %13, %16 : vector<8x1xf32>
    %18 = math.exp %17 : vector<8x1xf32>
    %19 = vector.broadcast %16 : vector<8x1xf32> to vector<8x8xf32>
    %20 = arith.subf %12, %19 : vector<8x8xf32>
    %21 = math.exp %20 : vector<8x8xf32>
    %22 = vector.extract_strided_slice %8 {offsets = [0, 0], sizes = [8, 16], strides = [1, 1]} : vector<8x64xbf16> to vector<8x16xbf16>
    %23 = tpu.concatenate %22, %9 in 1 : vector<8x16xbf16>, vector<8x1xbf16> -> vector<8x17xbf16>
    %24 = arith.truncf %21 : vector<8x8xf32> to vector<8x8xbf16>
    %cst_13 = arith.constant dense<0.000000e+00> : vector<8x17xf32>
    %25 = tpu.matmul %24, %23, %cst_13 {dimension_numbers = #tpu.dot_dimension_numbers<[1], [0], [0], [1], [0, 0, 1, 1], [], []>} : vector<8x8xbf16>, vector<8x17xbf16>, vector<8x17xf32> -> vector<8x17xf32>
    %c0_14 = arith.constant 0 : index
    %c0_15 = arith.constant 0 : index
    %26 = vector.load %arg9[%c0_14, %c0_15] : memref<8x64xf32, #tpu.memory_space<vmem>>, vector<8x16xf32>
    %27 = vector.broadcast %18 : vector<8x1xf32> to vector<8x16xf32>
    %28 = arith.mulf %27, %26 : vector<8x16xf32>
    %29 = vector.extract_strided_slice %25 {offsets = [0, 0], sizes = [8, 16], strides = [1, 1]} : vector<8x17xf32> to vector<8x16xf32>
    %30 = arith.addf %28, %29 : vector<8x16xf32>
    %c0_16 = arith.constant 0 : index
    %c0_17 = arith.constant 0 : index
    %31 = vector.load %arg9[%c0_16, %c0_17] : memref<8x64xf32, #tpu.memory_space<vmem>>, vector<8x16xf32>
    tpu.vector_store %arg9[%c0_16, %c0_17], %30 {strides = array<i32>} : memref<8x64xf32, #tpu.memory_space<vmem>>, vector<8x16xf32>,
    %c0_18 = arith.constant 0 : index
    %c0_19 = arith.constant 0 : index
    %32 = vector.load %arg8[%c0_18, %c0_19] : memref<8x4xf32, #tpu.memory_space<vmem>>, vector<8x1xf32>
    %33 = arith.mulf %18, %32 : vector<8x1xf32>
    %34 = vector.extract_strided_slice %25 {offsets = [0, 16], sizes = [8, 1], strides = [1, 1]} : vector<8x17xf32> to vector<8x1xf32>
    %35 = arith.addf %33, %34 : vector<8x1xf32>
    %c0_20 = arith.constant 0 : index
    %c0_21 = arith.constant 0 : index
    %36 = vector.load %arg8[%c0_20, %c0_21] : memref<8x4xf32, #tpu.memory_space<vmem>>, vector<8x1xf32>
    tpu.vector_store %arg8[%c0_20, %c0_21], %35 {strides = array<i32>} : memref<8x4xf32, #tpu.memory_space<vmem>>, vector<8x1xf32>,
    %c0_22 = arith.constant 0 : index
    %c0_23 = arith.constant 0 : index
    %37 = vector.load %arg7[%c0_22, %c0_23] : memref<8x4xf32, #tpu.memory_space<vmem>>, vector<8x1xf32>
    tpu.vector_store %arg7[%c0_22, %c0_23], %16 {strides = array<i32>} : memref<8x4xf32, #tpu.memory_space<vmem>>, vector<8x1xf32>,
    %38 = vector.extract_strided_slice %4 {offsets = [0, 16], sizes = [8, 16], strides = [1, 1]} : vector<8x64xbf16> to vector<8x16xbf16>
    %39 = vector.extract_strided_slice %6 {offsets = [0, 16], sizes = [8, 16], strides = [1, 1]} : vector<8x64xbf16> to vector<8x16xbf16>
    %cst_24 = arith.constant dense<0.000000e+00> : vector<8x8xf32>
    %40 = tpu.matmul %38, %39, %cst_24 {dimension_numbers = #tpu.dot_dimension_numbers<[1], [1], [0], [0], [0, 0, 1, 0], [], []>} : vector<8x16xbf16>, vector<8x16xbf16>, vector<8x8xf32> -> vector<8x8xf32>
    %c0_25 = arith.constant 0 : index
    %c1 = arith.constant 1 : index
    %41 = vector.load %arg7[%c0_25, %c1] : memref<8x4xf32, #tpu.memory_space<vmem>>, vector<8x1xf32>
    %cst_26 = arith.constant dense<0xFF800000> : vector<8xf32>
    %42 = vector.multi_reduction <maximumf>, %40, %cst_26 [1] : vector<8x8xf32> to vector<8xf32>
    %43 = vector.shape_cast %42 : vector<8xf32> to vector<8x1xf32>
    %44 = arith.maximumf %41, %43 : vector<8x1xf32>
    %45 = arith.subf %41, %44 : vector<8x1xf32>
    %46 = math.exp %45 : vector<8x1xf32>
    %47 = vector.broadcast %44 : vector<8x1xf32> to vector<8x8xf32>
    %48 = arith.subf %40, %47 : vector<8x8xf32>
    %49 = math.exp %48 : vector<8x8xf32>
    %50 = vector.extract_strided_slice %8 {offsets = [0, 16], sizes = [8, 16], strides = [1, 1]} : vector<8x64xbf16> to vector<8x16xbf16>
    %51 = tpu.concatenate %50, %9 in 1 : vector<8x16xbf16>, vector<8x1xbf16> -> vector<8x17xbf16>
    %52 = arith.truncf %49 : vector<8x8xf32> to vector<8x8xbf16>
    %cst_27 = arith.constant dense<0.000000e+00> : vector<8x17xf32>
    %53 = tpu.matmul %52, %51, %cst_27 {dimension_numbers = #tpu.dot_dimension_numbers<[1], [0], [0], [1], [0, 0, 1, 1], [], []>} : vector<8x8xbf16>, vector<8x17xbf16>, vector<8x17xf32> -> vector<8x17xf32>
    %c0_28 = arith.constant 0 : index
    %c16 = arith.constant 16 : index
    %54 = vector.load %arg9[%c0_28, %c16] : memref<8x64xf32, #tpu.memory_space<vmem>>, vector<8x16xf32>
    %55 = vector.broadcast %46 : vector<8x1xf32> to vector<8x16xf32>
    %56 = arith.mulf %55, %54 : vector<8x16xf32>
    %57 = vector.extract_strided_slice %53 {offsets = [0, 0], sizes = [8, 16], strides = [1, 1]} : vector<8x17xf32> to vector<8x16xf32>
    %58 = arith.addf %56, %57 : vector<8x16xf32>
    %c0_29 = arith.constant 0 : index
    %c16_30 = arith.constant 16 : index
    %59 = vector.load %arg9[%c0_29, %c16_30] : memref<8x64xf32, #tpu.memory_space<vmem>>, vector<8x16xf32>
    tpu.vector_store %arg9[%c0_29, %c16_30], %58 {strides = array<i32>} : memref<8x64xf32, #tpu.memory_space<vmem>>, vector<8x16xf32>,
    %c0_31 = arith.constant 0 : index
    %c1_32 = arith.constant 1 : index
    %60 = vector.load %arg8[%c0_31, %c1_32] : memref<8x4xf32, #tpu.memory_space<vmem>>, vector<8x1xf32>
    %61 = arith.mulf %46, %60 : vector<8x1xf32>
    %62 = vector.extract_strided_slice %53 {offsets = [0, 16], sizes = [8, 1], strides = [1, 1]} : vector<8x17xf32> to vector<8x1xf32>
    %63 = arith.addf %61, %62 : vector<8x1xf32>
    %c0_33 = arith.constant 0 : index
    %c1_34 = arith.constant 1 : index
    %64 = vector.load %arg8[%c0_33, %c1_34] : memref<8x4xf32, #tpu.memory_space<vmem>>, vector<8x1xf32>
    tpu.vector_store %arg8[%c0_33, %c1_34], %63 {strides = array<i32>} : memref<8x4xf32, #tpu.memory_space<vmem>>, vector<8x1xf32>,
    %c0_35 = arith.constant 0 : index
    %c1_36 = arith.constant 1 : index
    %65 = vector.load %arg7[%c0_35, %c1_36] : memref<8x4xf32, #tpu.memory_space<vmem>>, vector<8x1xf32>
    tpu.vector_store %arg7[%c0_35, %c1_36], %44 {strides = array<i32>} : memref<8x4xf32, #tpu.memory_space<vmem>>, vector<8x1xf32>,
    %66 = vector.extract_strided_slice %4 {offsets = [0, 32], sizes = [8, 16], strides = [1, 1]} : vector<8x64xbf16> to vector<8x16xbf16>
    %67 = vector.extract_strided_slice %6 {offsets = [0, 32], sizes = [8, 16], strides = [1, 1]} : vector<8x64xbf16> to vector<8x16xbf16>
    %cst_37 = arith.constant dense<0.000000e+00> : vector<8x8xf32>
    %68 = tpu.matmul %66, %67, %cst_37 {dimension_numbers = #tpu.dot_dimension_numbers<[1], [1], [0], [0], [0, 0, 1, 0], [], []>} : vector<8x16xbf16>, vector<8x16xbf16>, vector<8x8xf32> -> vector<8x8xf32>
    %c0_38 = arith.constant 0 : index
    %c2 = arith.constant 2 : index
    %69 = vector.load %arg7[%c0_38, %c2] : memref<8x4xf32, #tpu.memory_space<vmem>>, vector<8x1xf32>
    %cst_39 = arith.constant dense<0xFF800000> : vector<8xf32>
    %70 = vector.multi_reduction <maximumf>, %68, %cst_39 [1] : vector<8x8xf32> to vector<8xf32>
    %71 = vector.shape_cast %70 : vector<8xf32> to vector<8x1xf32>
    %72 = arith.maximumf %69, %71 : vector<8x1xf32>
    %73 = arith.subf %69, %72 : vector<8x1xf32>
    %74 = math.exp %73 : vector<8x1xf32>
    %75 = vector.broadcast %72 : vector<8x1xf32> to vector<8x8xf32>
    %76 = arith.subf %68, %75 : vector<8x8xf32>
    %77 = math.exp %76 : vector<8x8xf32>
    %78 = vector.extract_strided_slice %8 {offsets = [0, 32], sizes = [8, 16], strides = [1, 1]} : vector<8x64xbf16> to vector<8x16xbf16>
    %79 = tpu.concatenate %78, %9 in 1 : vector<8x16xbf16>, vector<8x1xbf16> -> vector<8x17xbf16>
    %80 = arith.truncf %77 : vector<8x8xf32> to vector<8x8xbf16>
    %cst_40 = arith.constant dense<0.000000e+00> : vector<8x17xf32>
    %81 = tpu.matmul %80, %79, %cst_40 {dimension_numbers = #tpu.dot_dimension_numbers<[1], [0], [0], [1], [0, 0, 1, 1], [], []>} : vector<8x8xbf16>, vector<8x17xbf16>, vector<8x17xf32> -> vector<8x17xf32>
    %c0_41 = arith.constant 0 : index
    %c32 = arith.constant 32 : index
    %82 = vector.load %arg9[%c0_41, %c32] : memref<8x64xf32, #tpu.memory_space<vmem>>, vector<8x16xf32>
    %83 = vector.broadcast %74 : vector<8x1xf32> to vector<8x16xf32>
    %84 = arith.mulf %83, %82 : vector<8x16xf32>
    %85 = vector.extract_strided_slice %81 {offsets = [0, 0], sizes = [8, 16], strides = [1, 1]} : vector<8x17xf32> to vector<8x16xf32>
    %86 = arith.addf %84, %85 : vector<8x16xf32>
    %c0_42 = arith.constant 0 : index
    %c32_43 = arith.constant 32 : index
    %87 = vector.load %arg9[%c0_42, %c32_43] : memref<8x64xf32, #tpu.memory_space<vmem>>, vector<8x16xf32>
    tpu.vector_store %arg9[%c0_42, %c32_43], %86 {strides = array<i32>} : memref<8x64xf32, #tpu.memory_space<vmem>>, vector<8x16xf32>,
    %c0_44 = arith.constant 0 : index
    %c2_45 = arith.constant 2 : index
    %88 = vector.load %arg8[%c0_44, %c2_45] : memref<8x4xf32, #tpu.memory_space<vmem>>, vector<8x1xf32>
    %89 = arith.mulf %74, %88 : vector<8x1xf32>
    %90 = vector.extract_strided_slice %81 {offsets = [0, 16], sizes = [8, 1], strides = [1, 1]} : vector<8x17xf32> to vector<8x1xf32>
    %91 = arith.addf %89, %90 : vector<8x1xf32>
    %c0_46 = arith.constant 0 : index
    %c2_47 = arith.constant 2 : index
    %92 = vector.load %arg8[%c0_46, %c2_47] : memref<8x4xf32, #tpu.memory_space<vmem>>, vector<8x1xf32>
    tpu.vector_store %arg8[%c0_46, %c2_47], %91 {strides = array<i32>} : memref<8x4xf32, #tpu.memory_space<vmem>>, vector<8x1xf32>,
    %c0_48 = arith.constant 0 : index
    %c2_49 = arith.constant 2 : index
    %93 = vector.load %arg7[%c0_48, %c2_49] : memref<8x4xf32, #tpu.memory_space<vmem>>, vector<8x1xf32>
    tpu.vector_store %arg7[%c0_48, %c2_49], %72 {strides = array<i32>} : memref<8x4xf32, #tpu.memory_space<vmem>>, vector<8x1xf32>,
    %94 = vector.extract_strided_slice %4 {offsets = [0, 48], sizes = [8, 16], strides = [1, 1]} : vector<8x64xbf16> to vector<8x16xbf16>
    %95 = vector.extract_strided_slice %6 {offsets = [0, 48], sizes = [8, 16], strides = [1, 1]} : vector<8x64xbf16> to vector<8x16xbf16>
    %cst_50 = arith.constant dense<0.000000e+00> : vector<8x8xf32>
    %96 = tpu.matmul %94, %95, %cst_50 {dimension_numbers = #tpu.dot_dimension_numbers<[1], [1], [0], [0], [0, 0, 1, 0], [], []>} : vector<8x16xbf16>, vector<8x16xbf16>, vector<8x8xf32> -> vector<8x8xf32>
    %c0_51 = arith.constant 0 : index
    %c3 = arith.constant 3 : index
    %97 = vector.load %arg7[%c0_51, %c3] : memref<8x4xf32, #tpu.memory_space<vmem>>, vector<8x1xf32>
    %cst_52 = arith.constant dense<0xFF800000> : vector<8xf32>
    %98 = vector.multi_reduction <maximumf>, %96, %cst_52 [1] : vector<8x8xf32> to vector<8xf32>
    %99 = vector.shape_cast %98 : vector<8xf32> to vector<8x1xf32>
    %100 = arith.maximumf %97, %99 : vector<8x1xf32>
    %101 = arith.subf %97, %100 : vector<8x1xf32>
    %102 = math.exp %101 : vector<8x1xf32>
    %103 = vector.broadcast %100 : vector<8x1xf32> to vector<8x8xf32>
    %104 = arith.subf %96, %103 : vector<8x8xf32>
    %105 = math.exp %104 : vector<8x8xf32>
    %106 = vector.extract_strided_slice %8 {offsets = [0, 48], sizes = [8, 16], strides = [1, 1]} : vector<8x64xbf16> to vector<8x16xbf16>
    %107 = tpu.concatenate %106, %9 in 1 : vector<8x16xbf16>, vector<8x1xbf16> -> vector<8x17xbf16>
    %108 = arith.truncf %105 : vector<8x8xf32> to vector<8x8xbf16>
    %cst_53 = arith.constant dense<0.000000e+00> : vector<8x17xf32>
    %109 = tpu.matmul %108, %107, %cst_53 {dimension_numbers = #tpu.dot_dimension_numbers<[1], [0], [0], [1], [0, 0, 1, 1], [], []>} : vector<8x8xbf16>, vector<8x17xbf16>, vector<8x17xf32> -> vector<8x17xf32>
    %c0_54 = arith.constant 0 : index
    %c48 = arith.constant 48 : index
    %110 = vector.load %arg9[%c0_54, %c48] : memref<8x64xf32, #tpu.memory_space<vmem>>, vector<8x16xf32>
    %111 = vector.broadcast %102 : vector<8x1xf32> to vector<8x16xf32>
    %112 = arith.mulf %111, %110 : vector<8x16xf32>
    %113 = vector.extract_strided_slice %109 {offsets = [0, 0], sizes = [8, 16], strides = [1, 1]} : vector<8x17xf32> to vector<8x16xf32>
    %114 = arith.addf %112, %113 : vector<8x16xf32>
    %c0_55 = arith.constant 0 : index
    %c48_56 = arith.constant 48 : index
    %115 = vector.load %arg9[%c0_55, %c48_56] : memref<8x64xf32, #tpu.memory_space<vmem>>, vector<8x16xf32>
    tpu.vector_store %arg9[%c0_55, %c48_56], %114 {strides = array<i32>} : memref<8x64xf32, #tpu.memory_space<vmem>>, vector<8x16xf32>,
    %c0_57 = arith.constant 0 : index
    %c3_58 = arith.constant 3 : index
    %116 = vector.load %arg8[%c0_57, %c3_58] : memref<8x4xf32, #tpu.memory_space<vmem>>, vector<8x1xf32>
    %117 = arith.mulf %102, %116 : vector<8x1xf32>
    %118 = vector.extract_strided_slice %109 {offsets = [0, 16], sizes = [8, 1], strides = [1, 1]} : vector<8x17xf32> to vector<8x1xf32>
    %119 = arith.addf %117, %118 : vector<8x1xf32>
    %c0_59 = arith.constant 0 : index
    %c3_60 = arith.constant 3 : index
    %120 = vector.load %arg8[%c0_59, %c3_60] : memref<8x4xf32, #tpu.memory_space<vmem>>, vector<8x1xf32>
    tpu.vector_store %arg8[%c0_59, %c3_60], %119 {strides = array<i32>} : memref<8x4xf32, #tpu.memory_space<vmem>>, vector<8x1xf32>,
    %c0_61 = arith.constant 0 : index
    %c3_62 = arith.constant 3 : index
    %121 = vector.load %arg7[%c0_61, %c3_62] : memref<8x4xf32, #tpu.memory_space<vmem>>, vector<8x1xf32>
    tpu.vector_store %arg7[%c0_61, %c3_62], %100 {strides = array<i32>} : memref<8x4xf32, #tpu.memory_space<vmem>>, vector<8x1xf32>,
    %c0_i32_63 = arith.constant 0 : i32
    %122 = arith.cmpi eq, %arg2, %c0_i32_63 : i32
    %123 = arith.extui %122 : i1 to i32
    %c0_i32_64 = arith.constant 0 : i32
    %124 = arith.cmpi ne, %123, %c0_i32_64 : i32
    scf.if %124 {
      %c0_65 = arith.constant 0 : index
      %c0_66 = arith.constant 0 : index
      %125 = vector.load %arg8[%c0_65, %c0_66] : memref<8x4xf32, #tpu.memory_space<vmem>>, vector<8x1xf32>
      %126 = tpu.reciprocal %125 {approx = true} : vector<8x1xf32> -> vector<8x1xf32>
      %127 = vector.shape_cast %126 : vector<8x1xf32> to vector<8x1xf32>
      %128 = vector.broadcast %127 : vector<8x1xf32> to vector<8x16xf32>
      %c0_67 = arith.constant 0 : index
      %c1_68 = arith.constant 1 : index
      %129 = vector.load %arg8[%c0_67, %c1_68] : memref<8x4xf32, #tpu.memory_space<vmem>>, vector<8x1xf32>
      %130 = tpu.reciprocal %129 {approx = true} : vector<8x1xf32> -> vector<8x1xf32>
      %131 = vector.shape_cast %130 : vector<8x1xf32> to vector<8x1xf32>
      %132 = vector.broadcast %131 : vector<8x1xf32> to vector<8x16xf32>
      %c0_69 = arith.constant 0 : index
      %c2_70 = arith.constant 2 : index
      %133 = vector.load %arg8[%c0_69, %c2_70] : memref<8x4xf32, #tpu.memory_space<vmem>>, vector<8x1xf32>
      %134 = tpu.reciprocal %133 {approx = true} : vector<8x1xf32> -> vector<8x1xf32>
      %135 = vector.shape_cast %134 : vector<8x1xf32> to vector<8x1xf32>
      %136 = vector.broadcast %135 : vector<8x1xf32> to vector<8x16xf32>
      %c0_71 = arith.constant 0 : index
      %c3_72 = arith.constant 3 : index
      %137 = vector.load %arg8[%c0_71, %c3_72] : memref<8x4xf32, #tpu.memory_space<vmem>>, vector<8x1xf32>
      %138 = tpu.reciprocal %137 {approx = true} : vector<8x1xf32> -> vector<8x1xf32>
      %139 = vector.shape_cast %138 : vector<8x1xf32> to vector<8x1xf32>
      %140 = vector.broadcast %139 : vector<8x1xf32> to vector<8x16xf32>
      %141 = tpu.concatenate %128, %132, %136, %140 in 1 : vector<8x16xf32>, vector<8x16xf32>, vector<8x16xf32>, vector<8x16xf32> -> vector<8x64xf32>
      %c0_73 = arith.constant 0 : index
      %c0_74 = arith.constant 0 : index
      %142 = vector.load %arg9[%c0_73, %c0_74] : memref<8x64xf32, #tpu.memory_space<vmem>>, vector<8x64xf32>
      %143 = arith.mulf %142, %141 : vector<8x64xf32>
      %144 = arith.truncf %143 : vector<8x64xf32> to vector<8x64xbf16>
      %c0_75 = arith.constant 0 : index
      %c0_76 = arith.constant 0 : index
      %c0_77 = arith.constant 0 : index
      %145 = vector.load %arg6[%c0_75, %c0_76, %c0_77] : memref<1x8x64xbf16, #tpu.memory_space<vmem>>, vector<1x8x64xbf16>
      %146 = vector.shape_cast %145 : vector<1x8x64xbf16> to vector<8x64xbf16>
      %147 = vector.shape_cast %144 : vector<8x64xbf16> to vector<1x8x64xbf16>
      tpu.vector_store %arg6[%c0_75, %c0_76, %c0_77], %147 {strides = array<i32>} : memref<1x8x64xbf16, #tpu.memory_space<vmem>>, vector<1x8x64xbf16>,
    } else {
    }
    return
  }
  func.func @transform_0(%arg0: i32, %arg1: i32, %arg2: i32) -> (i32, i32, i32) {
    %c0_i32 = arith.constant 0 : i32
    %c0_i32_0 = arith.constant 0 : i32
    return %arg0, %arg1, %c0_i32 : i32, i32, i32
  }
  func.func @transform_1(%arg0: i32, %arg1: i32, %arg2: i32) -> (i32, i32, i32) {
    %c0_i32 = arith.constant 0 : i32
    %c0_i32_0 = arith.constant 0 : i32
    return %arg0, %arg2, %c0_i32 : i32, i32, i32
  }
  func.func @transform_2(%arg0: i32, %arg1: i32, %arg2: i32) -> (i32, i32, i32) {
    %c0_i32 = arith.constant 0 : i32
    %c0_i32_0 = arith.constant 0 : i32
    return %arg0, %arg2, %c0_i32 : i32, i32, i32
  }
  func.func @transform_3(%arg0: i32, %arg1: i32, %arg2: i32) -> (i32, i32, i32) {
    %c0_i32 = arith.constant 0 : i32
    %c0_i32_0 = arith.constant 0 : i32
    return %arg0, %arg1, %c0_i32 : i32, i32, i32
  }
}

module attributes {stable_mosaic.version = 11 : i64} {
  func.func @_ln_matmul_kernel(%arg0: i32, %arg1: i32, %arg2: memref<16x32xbf16, #tpu.memory_space<vmem>>, %arg3: memref<16x32xbf16, #tpu.memory_space<vmem>>, %arg4: memref<1x32xf32, #tpu.memory_space<vmem>>, %arg5: memref<1x32xf32, #tpu.memory_space<vmem>>, %arg6: memref<1x32xf32, #tpu.memory_space<vmem>>, %arg7: memref<1x32xf32, #tpu.memory_space<vmem>>, %arg8: memref<64x256xbf16, #tpu.memory_space<vmem>>, %arg9: memref<1x256xf32, #tpu.memory_space<vmem>>, %arg10: memref<16x256xbf16, #tpu.memory_space<vmem>>, %arg11: memref<16x64xbf16, #tpu.memory_space<vmem>>) attributes {dimension_semantics = [#tpu.dimension_semantics<parallel>, #tpu.dimension_semantics<arbitrary>], iteration_bounds = array<i64: 1, 1>, scalar_prefetch = 0 : i64, scratch_operands = 1 : i64, tpu.core_type = #tpu.core_type<tc>, window_params = [{transform_indices = @transform_0, window_bounds = array<i64: 16, 32>}, {transform_indices = @transform_1, window_bounds = array<i64: 16, 32>}, {pipeline_mode = #tpu.pipeline_mode<synchronous>, transform_indices = @transform_2, window_bounds = array<i64: 1, 32>}, {pipeline_mode = #tpu.pipeline_mode<synchronous>, transform_indices = @transform_3, window_bounds = array<i64: 1, 32>}, {pipeline_mode = #tpu.pipeline_mode<synchronous>, transform_indices = @transform_4, window_bounds = array<i64: 1, 32>}, {pipeline_mode = #tpu.pipeline_mode<synchronous>, transform_indices = @transform_5, window_bounds = array<i64: 1, 32>}, {transform_indices = @transform_6, window_bounds = array<i64: 64, 256>}, {transform_indices = @transform_7, window_bounds = array<i64: 1, 256>}, {transform_indices = @transform_8, window_bounds = array<i64: 16, 256>}]} {
    %c0_i32 = arith.constant 0 : i32
    %0 = arith.cmpi eq, %arg1, %c0_i32 : i32
    %1 = arith.extui %0 : i1 to i32
    %c0_i32_0 = arith.constant 0 : i32
    %2 = arith.cmpi ne, %1, %c0_i32_0 : i32
    scf.if %2 {
      %c0_23 = arith.constant 0 : index
      %c0_24 = arith.constant 0 : index
      %51 = vector.load %arg2[%c0_23, %c0_24] : memref<16x32xbf16, #tpu.memory_space<vmem>>, vector<16x32xbf16>
      %52 = arith.extf %51 : vector<16x32xbf16> to vector<16x32xf32>
      %c0_25 = arith.constant 0 : index
      %c0_26 = arith.constant 0 : index
      %53 = vector.load %arg3[%c0_25, %c0_26] : memref<16x32xbf16, #tpu.memory_space<vmem>>, vector<16x32xbf16>
      %54 = arith.extf %53 : vector<16x32xbf16> to vector<16x32xf32>
      %cst_27 = arith.constant dense<0.000000e+00> : vector<16xf32>
      %55 = vector.multi_reduction <add>, %52, %cst_27 [1] : vector<16x32xf32> to vector<16xf32>
      %56 = vector.shape_cast %55 : vector<16xf32> to vector<16x1xf32>
      %cst_28 = arith.constant dense<0.000000e+00> : vector<16xf32>
      %57 = vector.multi_reduction <add>, %54, %cst_28 [1] : vector<16x32xf32> to vector<16xf32>
      %58 = vector.shape_cast %57 : vector<16xf32> to vector<16x1xf32>
      %59 = arith.addf %56, %58 : vector<16x1xf32>
      %cst_29 = arith.constant 6.400000e+01 : f32
      %60 = vector.broadcast %cst_29 : f32 to vector<16x1xf32>
      %61 = arith.divf %59, %60 : vector<16x1xf32>
      %62 = vector.broadcast %61 : vector<16x1xf32> to vector<16x32xf32>
      %63 = arith.subf %52, %62 : vector<16x32xf32>
      %64 = arith.mulf %63, %63 : vector<16x32xf32>
      %cst_30 = arith.constant dense<0.000000e+00> : vector<16xf32>
      %65 = vector.multi_reduction <add>, %64, %cst_30 [1] : vector<16x32xf32> to vector<16xf32>
      %66 = vector.shape_cast %65 : vector<16xf32> to vector<16x1xf32>
      %67 = vector.broadcast %61 : vector<16x1xf32> to vector<16x32xf32>
      %68 = arith.subf %54, %67 : vector<16x32xf32>
      %69 = arith.mulf %68, %68 : vector<16x32xf32>
      %cst_31 = arith.constant dense<0.000000e+00> : vector<16xf32>
      %70 = vector.multi_reduction <add>, %69, %cst_31 [1] : vector<16x32xf32> to vector<16xf32>
      %71 = vector.shape_cast %70 : vector<16xf32> to vector<16x1xf32>
      %72 = arith.addf %66, %71 : vector<16x1xf32>
      %cst_32 = arith.constant 6.400000e+01 : f32
      %73 = vector.broadcast %cst_32 : f32 to vector<16x1xf32>
      %74 = arith.divf %72, %73 : vector<16x1xf32>
      %cst_33 = arith.constant 9.99999974E-6 : f32
      %75 = vector.broadcast %cst_33 : f32 to vector<16x1xf32>
      %76 = arith.addf %74, %75 : vector<16x1xf32>
      %77 = math.rsqrt %76 : vector<16x1xf32>
      %78 = vector.broadcast %61 : vector<16x1xf32> to vector<16x32xf32>
      %79 = arith.subf %52, %78 : vector<16x32xf32>
      %80 = vector.broadcast %77 : vector<16x1xf32> to vector<16x32xf32>
      %81 = arith.mulf %79, %80 : vector<16x32xf32>
      %c0_34 = arith.constant 0 : index
      %c0_35 = arith.constant 0 : index
      %82 = vector.load %arg4[%c0_34, %c0_35] : memref<1x32xf32, #tpu.memory_space<vmem>>, vector<1x32xf32>
      %83 = vector.broadcast %82 : vector<1x32xf32> to vector<16x32xf32>
      %84 = arith.mulf %81, %83 : vector<16x32xf32>
      %c0_36 = arith.constant 0 : index
      %c0_37 = arith.constant 0 : index
      %85 = vector.load %arg6[%c0_36, %c0_37] : memref<1x32xf32, #tpu.memory_space<vmem>>, vector<1x32xf32>
      %86 = vector.broadcast %85 : vector<1x32xf32> to vector<16x32xf32>
      %87 = arith.addf %84, %86 : vector<16x32xf32>
      %88 = arith.truncf %87 : vector<16x32xf32> to vector<16x32xbf16>
      %c0_38 = arith.constant 0 : index
      %c0_39 = arith.constant 0 : index
      %89 = vector.load %arg11[%c0_38, %c0_39] : memref<16x64xbf16, #tpu.memory_space<vmem>>, vector<16x32xbf16>
      tpu.vector_store %arg11[%c0_38, %c0_39], %88 {strides = array<i32>} : memref<16x64xbf16, #tpu.memory_space<vmem>>, vector<16x32xbf16>,
      %90 = vector.broadcast %61 : vector<16x1xf32> to vector<16x32xf32>
      %91 = arith.subf %54, %90 : vector<16x32xf32>
      %92 = vector.broadcast %77 : vector<16x1xf32> to vector<16x32xf32>
      %93 = arith.mulf %91, %92 : vector<16x32xf32>
      %c0_40 = arith.constant 0 : index
      %c0_41 = arith.constant 0 : index
      %94 = vector.load %arg5[%c0_40, %c0_41] : memref<1x32xf32, #tpu.memory_space<vmem>>, vector<1x32xf32>
      %95 = vector.broadcast %94 : vector<1x32xf32> to vector<16x32xf32>
      %96 = arith.mulf %93, %95 : vector<16x32xf32>
      %c0_42 = arith.constant 0 : index
      %c0_43 = arith.constant 0 : index
      %97 = vector.load %arg7[%c0_42, %c0_43] : memref<1x32xf32, #tpu.memory_space<vmem>>, vector<1x32xf32>
      %98 = vector.broadcast %97 : vector<1x32xf32> to vector<16x32xf32>
      %99 = arith.addf %96, %98 : vector<16x32xf32>
      %100 = arith.truncf %99 : vector<16x32xf32> to vector<16x32xbf16>
      %c0_44 = arith.constant 0 : index
      %c32 = arith.constant 32 : index
      %101 = vector.load %arg11[%c0_44, %c32] : memref<16x64xbf16, #tpu.memory_space<vmem>>, vector<16x32xbf16>
      tpu.vector_store %arg11[%c0_44, %c32], %100 {strides = array<i32>} : memref<16x64xbf16, #tpu.memory_space<vmem>>, vector<16x32xbf16>,
    } else {
    }
    %c0 = arith.constant 0 : index
    %c0_1 = arith.constant 0 : index
    %3 = vector.load %arg11[%c0, %c0_1] : memref<16x64xbf16, #tpu.memory_space<vmem>>, vector<16x64xbf16>
    %c0_2 = arith.constant 0 : index
    %c0_3 = arith.constant 0 : index
    %4 = vector.load %arg8[%c0_2, %c0_3] : memref<64x256xbf16, #tpu.memory_space<vmem>>, vector<64x256xbf16>
    %cst = arith.constant dense<0.000000e+00> : vector<16x256xf32>
    %5 = tpu.matmul %3, %4, %cst {dimension_numbers = #tpu.dot_dimension_numbers<[1], [0], [0], [1], [0, 0, 1, 1], [], []>} : vector<16x64xbf16>, vector<64x256xbf16>, vector<16x256xf32> -> vector<16x256xf32>
    %c0_4 = arith.constant 0 : index
    %c0_5 = arith.constant 0 : index
    %6 = vector.load %arg9[%c0_4, %c0_5] : memref<1x256xf32, #tpu.memory_space<vmem>>, vector<1x256xf32>
    %7 = vector.broadcast %6 : vector<1x256xf32> to vector<16x256xf32>
    %8 = arith.addf %5, %7 : vector<16x256xf32>
    %cst_6 = arith.constant 5.000000e-01 : f32
    %9 = vector.broadcast %cst_6 : f32 to vector<16x256xf32>
    %10 = arith.mulf %9, %8 : vector<16x256xf32>
    %cst_7 = arith.constant 0.707106769 : f32
    %11 = vector.broadcast %cst_7 : f32 to vector<16x256xf32>
    %12 = arith.mulf %8, %11 : vector<16x256xf32>
    %cst_8 = arith.constant 0.000000e+00 : f32
    %13 = vector.broadcast %cst_8 : f32 to vector<16x256xf32>
    %14 = arith.cmpf oge, %12, %13 : vector<16x256xf32>
    %cst_9 = arith.constant 1.000000e+00 : f32
    %cst_10 = arith.constant -1.000000e+00 : f32
    %15 = vector.broadcast %cst_9 : f32 to vector<16x256xf32>
    %16 = vector.broadcast %cst_10 : f32 to vector<16x256xf32>
    %17 = arith.select %14, %15, %16 : vector<16x256xi1>, vector<16x256xf32>
    %18 = math.absf %12 : vector<16x256xf32>
    %cst_11 = arith.constant 0.327591091 : f32
    %19 = vector.broadcast %cst_11 : f32 to vector<16x256xf32>
    %20 = arith.mulf %19, %18 : vector<16x256xf32>
    %cst_12 = arith.constant 1.000000e+00 : f32
    %21 = vector.broadcast %cst_12 : f32 to vector<16x256xf32>
    %22 = arith.addf %21, %20 : vector<16x256xf32>
    %23 = tpu.reciprocal %22 {approx = true} : vector<16x256xf32> -> vector<16x256xf32>
    %cst_13 = arith.constant 1.06140542 : f32
    %24 = vector.broadcast %cst_13 : f32 to vector<16x256xf32>
    %25 = arith.mulf %24, %23 : vector<16x256xf32>
    %cst_14 = arith.constant -1.45315206 : f32
    %26 = vector.broadcast %cst_14 : f32 to vector<16x256xf32>
    %27 = arith.addf %25, %26 : vector<16x256xf32>
    %28 = arith.mulf %27, %23 : vector<16x256xf32>
    %cst_15 = arith.constant 1.42141378 : f32
    %29 = vector.broadcast %cst_15 : f32 to vector<16x256xf32>
    %30 = arith.addf %28, %29 : vector<16x256xf32>
    %31 = arith.mulf %30, %23 : vector<16x256xf32>
    %cst_16 = arith.constant -0.284496725 : f32
    %32 = vector.broadcast %cst_16 : f32 to vector<16x256xf32>
    %33 = arith.addf %31, %32 : vector<16x256xf32>
    %34 = arith.mulf %33, %23 : vector<16x256xf32>
    %cst_17 = arith.constant 0.254829586 : f32
    %35 = vector.broadcast %cst_17 : f32 to vector<16x256xf32>
    %36 = arith.addf %34, %35 : vector<16x256xf32>
    %37 = arith.mulf %36, %23 : vector<16x256xf32>
    %cst_18 = arith.constant 0.000000e+00 : f32
    %38 = vector.broadcast %cst_18 : f32 to vector<16x256xf32>
    %39 = arith.subf %38, %18 : vector<16x256xf32>
    %40 = arith.mulf %39, %18 : vector<16x256xf32>
    %41 = math.exp %40 : vector<16x256xf32>
    %42 = arith.mulf %37, %41 : vector<16x256xf32>
    %cst_19 = arith.constant 1.000000e+00 : f32
    %43 = vector.broadcast %cst_19 : f32 to vector<16x256xf32>
    %44 = arith.subf %43, %42 : vector<16x256xf32>
    %45 = arith.mulf %17, %44 : vector<16x256xf32>
    %cst_20 = arith.constant 1.000000e+00 : f32
    %46 = vector.broadcast %cst_20 : f32 to vector<16x256xf32>
    %47 = arith.addf %46, %45 : vector<16x256xf32>
    %48 = arith.mulf %10, %47 : vector<16x256xf32>
    %49 = arith.truncf %48 : vector<16x256xf32> to vector<16x256xbf16>
    %c0_21 = arith.constant 0 : index
    %c0_22 = arith.constant 0 : index
    %50 = vector.load %arg10[%c0_21, %c0_22] : memref<16x256xbf16, #tpu.memory_space<vmem>>, vector<16x256xbf16>
    tpu.vector_store %arg10[%c0_21, %c0_22], %49 {strides = array<i32>} : memref<16x256xbf16, #tpu.memory_space<vmem>>, vector<16x256xbf16>,
    return
  }
  func.func @transform_0(%arg0: i32, %arg1: i32) -> (i32, i32) {
    %c0_i32 = arith.constant 0 : i32
    %c0_i32_0 = arith.constant 0 : i32
    return %arg0, %c0_i32 : i32, i32
  }
  func.func @transform_1(%arg0: i32, %arg1: i32) -> (i32, i32) {
    %c0_i32 = arith.constant 0 : i32
    %c0_i32_0 = arith.constant 0 : i32
    return %arg0, %c0_i32 : i32, i32
  }
  func.func @transform_2(%arg0: i32, %arg1: i32) -> (i32, i32) {
    %c0_i32 = arith.constant 0 : i32
    %c0_i32_0 = arith.constant 0 : i32
    %c0_i32_1 = arith.constant 0 : i32
    return %c0_i32, %c0_i32_0 : i32, i32
  }
  func.func @transform_3(%arg0: i32, %arg1: i32) -> (i32, i32) {
    %c0_i32 = arith.constant 0 : i32
    %c0_i32_0 = arith.constant 0 : i32
    %c0_i32_1 = arith.constant 0 : i32
    return %c0_i32, %c0_i32_0 : i32, i32
  }
  func.func @transform_4(%arg0: i32, %arg1: i32) -> (i32, i32) {
    %c0_i32 = arith.constant 0 : i32
    %c0_i32_0 = arith.constant 0 : i32
    %c0_i32_1 = arith.constant 0 : i32
    return %c0_i32, %c0_i32_0 : i32, i32
  }
  func.func @transform_5(%arg0: i32, %arg1: i32) -> (i32, i32) {
    %c0_i32 = arith.constant 0 : i32
    %c0_i32_0 = arith.constant 0 : i32
    %c0_i32_1 = arith.constant 0 : i32
    return %c0_i32, %c0_i32_0 : i32, i32
  }
  func.func @transform_6(%arg0: i32, %arg1: i32) -> (i32, i32) {
    %c0_i32 = arith.constant 0 : i32
    %c0_i32_0 = arith.constant 0 : i32
    return %c0_i32, %arg1 : i32, i32
  }
  func.func @transform_7(%arg0: i32, %arg1: i32) -> (i32, i32) {
    %c0_i32 = arith.constant 0 : i32
    %c0_i32_0 = arith.constant 0 : i32
    return %c0_i32, %arg1 : i32, i32
  }
  func.func @transform_8(%arg0: i32, %arg1: i32) -> (i32, i32) {
    %c0_i32 = arith.constant 0 : i32
    return %arg0, %arg1 : i32, i32
  }
}

module attributes {stable_mosaic.version = 11 : i64} {
  func.func @_matmul_kernel(%arg0: i32, %arg1: i32, %arg2: i32, %arg3: memref<16x256xbf16, #tpu.memory_space<vmem>>, %arg4: memref<256x32xbf16, #tpu.memory_space<vmem>>, %arg5: memref<1x32xf32, #tpu.memory_space<vmem>>, %arg6: memref<16x32xbf16, #tpu.memory_space<vmem>>, %arg7: memref<16x32xbf16, #tpu.memory_space<vmem>>, %arg8: memref<16x32xf32, #tpu.memory_space<vmem>>) attributes {dimension_semantics = [#tpu.dimension_semantics<parallel>, #tpu.dimension_semantics<parallel>, #tpu.dimension_semantics<arbitrary>], iteration_bounds = array<i64: 1, 1, 1>, scalar_prefetch = 0 : i64, scratch_operands = 1 : i64, tpu.core_type = #tpu.core_type<tc>, window_params = [{transform_indices = @transform_0, window_bounds = array<i64: 16, 256>}, {transform_indices = @transform_1, window_bounds = array<i64: 256, 32>}, {transform_indices = @transform_2, window_bounds = array<i64: 1, 32>}, {transform_indices = @transform_3, window_bounds = array<i64: 16, 32>}, {transform_indices = @transform_4, window_bounds = array<i64: 16, 32>}]} {
    %c0_i32 = arith.constant 0 : i32
    %0 = arith.cmpi eq, %arg2, %c0_i32 : i32
    %1 = arith.extui %0 : i1 to i32
    %c0_i32_0 = arith.constant 0 : i32
    %2 = arith.cmpi ne, %1, %c0_i32_0 : i32
    scf.if %2 {
      %cst_10 = arith.constant 0.000000e+00 : f32
      %12 = vector.broadcast %cst_10 : f32 to vector<16x32xf32>
      %c0_11 = arith.constant 0 : index
      %c0_12 = arith.constant 0 : index
      %13 = vector.load %arg8[%c0_11, %c0_12] : memref<16x32xf32, #tpu.memory_space<vmem>>, vector<16x32xf32>
      tpu.vector_store %arg8[%c0_11, %c0_12], %12 {strides = array<i32>} : memref<16x32xf32, #tpu.memory_space<vmem>>, vector<16x32xf32>,
    } else {
    }
    %c0 = arith.constant 0 : index
    %c0_1 = arith.constant 0 : index
    %3 = vector.load %arg4[%c0, %c0_1] : memref<256x32xbf16, #tpu.memory_space<vmem>>, vector<256x32xbf16>
    %c0_2 = arith.constant 0 : index
    %c0_3 = arith.constant 0 : index
    %4 = vector.load %arg8[%c0_2, %c0_3] : memref<16x32xf32, #tpu.memory_space<vmem>>, vector<16x32xf32>
    %c0_4 = arith.constant 0 : index
    %c0_5 = arith.constant 0 : index
    %5 = vector.load %arg3[%c0_4, %c0_5] : memref<16x256xbf16, #tpu.memory_space<vmem>>, vector<16x256xbf16>
    %cst = arith.constant dense<0.000000e+00> : vector<16x32xf32>
    %6 = tpu.matmul %5, %3, %cst {dimension_numbers = #tpu.dot_dimension_numbers<[1], [0], [0], [1], [0, 0, 1, 1], [], []>} : vector<16x256xbf16>, vector<256x32xbf16>, vector<16x32xf32> -> vector<16x32xf32>
    %7 = arith.addf %4, %6 : vector<16x32xf32>
    %c0_6 = arith.constant 0 : index
    %c0_7 = arith.constant 0 : index
    %8 = vector.load %arg8[%c0_6, %c0_7] : memref<16x32xf32, #tpu.memory_space<vmem>>, vector<16x32xf32>
    tpu.vector_store %arg8[%c0_6, %c0_7], %7 {strides = array<i32>} : memref<16x32xf32, #tpu.memory_space<vmem>>, vector<16x32xf32>,
    %c0_i32_8 = arith.constant 0 : i32
    %9 = arith.cmpi eq, %arg2, %c0_i32_8 : i32
    %10 = arith.extui %9 : i1 to i32
    %c0_i32_9 = arith.constant 0 : i32
    %11 = arith.cmpi ne, %10, %c0_i32_9 : i32
    scf.if %11 {
      %c0_10 = arith.constant 0 : index
      %c0_11 = arith.constant 0 : index
      %12 = vector.load %arg8[%c0_10, %c0_11] : memref<16x32xf32, #tpu.memory_space<vmem>>, vector<16x32xf32>
      %c0_12 = arith.constant 0 : index
      %c0_13 = arith.constant 0 : index
      %13 = vector.load %arg5[%c0_12, %c0_13] : memref<1x32xf32, #tpu.memory_space<vmem>>, vector<1x32xf32>
      %14 = vector.broadcast %13 : vector<1x32xf32> to vector<16x32xf32>
      %15 = arith.addf %12, %14 : vector<16x32xf32>
      %c0_14 = arith.constant 0 : index
      %c0_15 = arith.constant 0 : index
      %16 = vector.load %arg6[%c0_14, %c0_15] : memref<16x32xbf16, #tpu.memory_space<vmem>>, vector<16x32xbf16>
      %17 = arith.extf %16 : vector<16x32xbf16> to vector<16x32xf32>
      %18 = arith.addf %15, %17 : vector<16x32xf32>
      %19 = arith.truncf %18 : vector<16x32xf32> to vector<16x32xbf16>
      %c0_16 = arith.constant 0 : index
      %c0_17 = arith.constant 0 : index
      %20 = vector.load %arg7[%c0_16, %c0_17] : memref<16x32xbf16, #tpu.memory_space<vmem>>, vector<16x32xbf16>
      tpu.vector_store %arg7[%c0_16, %c0_17], %19 {strides = array<i32>} : memref<16x32xbf16, #tpu.memory_space<vmem>>, vector<16x32xbf16>,
    } else {
    }
    return
  }
  func.func @transform_0(%arg0: i32, %arg1: i32, %arg2: i32) -> (i32, i32) {
    %c0_i32 = arith.constant 0 : i32
    return %arg0, %arg2 : i32, i32
  }
  func.func @transform_1(%arg0: i32, %arg1: i32, %arg2: i32) -> (i32, i32) {
    %c0_i32 = arith.constant 0 : i32
    return %arg2, %arg1 : i32, i32
  }
  func.func @transform_2(%arg0: i32, %arg1: i32, %arg2: i32) -> (i32, i32) {
    %c0_i32 = arith.constant 0 : i32
    %c0_i32_0 = arith.constant 0 : i32
    return %c0_i32, %arg1 : i32, i32
  }
  func.func @transform_3(%arg0: i32, %arg1: i32, %arg2: i32) -> (i32, i32) {
    %c0_i32 = arith.constant 0 : i32
    return %arg0, %arg1 : i32, i32
  }
  func.func @transform_4(%arg0: i32, %arg1: i32, %arg2: i32) -> (i32, i32) {
    %c0_i32 = arith.constant 0 : i32
    return %arg0, %arg1 : i32, i32
  }
}

module attributes {stable_mosaic.version = 11 : i64} {
  func.func @_matmul_kernel(%arg0: i32, %arg1: i32, %arg2: i32, %arg3: memref<16x32xbf16, #tpu.memory_space<vmem>>, %arg4: memref<32x32xbf16, #tpu.memory_space<vmem>>, %arg5: memref<1x32xf32, #tpu.memory_space<vmem>>, %arg6: memref<16x32xf32, #tpu.memory_space<vmem>>, %arg7: memref<16x32xf32, #tpu.memory_space<vmem>>) attributes {dimension_semantics = [#tpu.dimension_semantics<parallel>, #tpu.dimension_semantics<parallel>, #tpu.dimension_semantics<arbitrary>], iteration_bounds = array<i64: 1, 1, 1>, scalar_prefetch = 0 : i64, scratch_operands = 1 : i64, tpu.core_type = #tpu.core_type<tc>, window_params = [{transform_indices = @transform_0, window_bounds = array<i64: 16, 32>}, {transform_indices = @transform_1, window_bounds = array<i64: 32, 32>}, {transform_indices = @transform_2, window_bounds = array<i64: 1, 32>}, {transform_indices = @transform_3, window_bounds = array<i64: 16, 32>}]} {
    %c0_i32 = arith.constant 0 : i32
    %0 = arith.cmpi eq, %arg2, %c0_i32 : i32
    %1 = arith.extui %0 : i1 to i32
    %c0_i32_0 = arith.constant 0 : i32
    %2 = arith.cmpi ne, %1, %c0_i32_0 : i32
    scf.if %2 {
      %cst_10 = arith.constant 0.000000e+00 : f32
      %12 = vector.broadcast %cst_10 : f32 to vector<16x32xf32>
      %c0_11 = arith.constant 0 : index
      %c0_12 = arith.constant 0 : index
      %13 = vector.load %arg7[%c0_11, %c0_12] : memref<16x32xf32, #tpu.memory_space<vmem>>, vector<16x32xf32>
      tpu.vector_store %arg7[%c0_11, %c0_12], %12 {strides = array<i32>} : memref<16x32xf32, #tpu.memory_space<vmem>>, vector<16x32xf32>,
    } else {
    }
    %c0 = arith.constant 0 : index
    %c0_1 = arith.constant 0 : index
    %3 = vector.load %arg4[%c0, %c0_1] : memref<32x32xbf16, #tpu.memory_space<vmem>>, vector<32x32xbf16>
    %c0_2 = arith.constant 0 : index
    %c0_3 = arith.constant 0 : index
    %4 = vector.load %arg7[%c0_2, %c0_3] : memref<16x32xf32, #tpu.memory_space<vmem>>, vector<16x32xf32>
    %c0_4 = arith.constant 0 : index
    %c0_5 = arith.constant 0 : index
    %5 = vector.load %arg3[%c0_4, %c0_5] : memref<16x32xbf16, #tpu.memory_space<vmem>>, vector<16x32xbf16>
    %cst = arith.constant dense<0.000000e+00> : vector<16x32xf32>
    %6 = tpu.matmul %5, %3, %cst {dimension_numbers = #tpu.dot_dimension_numbers<[1], [0], [0], [1], [0, 0, 1, 1], [], []>} : vector<16x32xbf16>, vector<32x32xbf16>, vector<16x32xf32> -> vector<16x32xf32>
    %7 = arith.addf %4, %6 : vector<16x32xf32>
    %c0_6 = arith.constant 0 : index
    %c0_7 = arith.constant 0 : index
    %8 = vector.load %arg7[%c0_6, %c0_7] : memref<16x32xf32, #tpu.memory_space<vmem>>, vector<16x32xf32>
    tpu.vector_store %arg7[%c0_6, %c0_7], %7 {strides = array<i32>} : memref<16x32xf32, #tpu.memory_space<vmem>>, vector<16x32xf32>,
    %c0_i32_8 = arith.constant 0 : i32
    %9 = arith.cmpi eq, %arg2, %c0_i32_8 : i32
    %10 = arith.extui %9 : i1 to i32
    %c0_i32_9 = arith.constant 0 : i32
    %11 = arith.cmpi ne, %10, %c0_i32_9 : i32
    scf.if %11 {
      %c0_10 = arith.constant 0 : index
      %c0_11 = arith.constant 0 : index
      %12 = vector.load %arg7[%c0_10, %c0_11] : memref<16x32xf32, #tpu.memory_space<vmem>>, vector<16x32xf32>
      %c0_12 = arith.constant 0 : index
      %c0_13 = arith.constant 0 : index
      %13 = vector.load %arg5[%c0_12, %c0_13] : memref<1x32xf32, #tpu.memory_space<vmem>>, vector<1x32xf32>
      %14 = vector.broadcast %13 : vector<1x32xf32> to vector<16x32xf32>
      %15 = arith.addf %12, %14 : vector<16x32xf32>
      %c0_14 = arith.constant 0 : index
      %c0_15 = arith.constant 0 : index
      %16 = vector.load %arg6[%c0_14, %c0_15] : memref<16x32xf32, #tpu.memory_space<vmem>>, vector<16x32xf32>
      tpu.vector_store %arg6[%c0_14, %c0_15], %15 {strides = array<i32>} : memref<16x32xf32, #tpu.memory_space<vmem>>, vector<16x32xf32>,
    } else {
    }
    return
  }
  func.func @transform_0(%arg0: i32, %arg1: i32, %arg2: i32) -> (i32, i32) {
    %c0_i32 = arith.constant 0 : i32
    return %arg0, %arg2 : i32, i32
  }
  func.func @transform_1(%arg0: i32, %arg1: i32, %arg2: i32) -> (i32, i32) {
    %c0_i32 = arith.constant 0 : i32
    return %arg2, %arg1 : i32, i32
  }
  func.func @transform_2(%arg0: i32, %arg1: i32, %arg2: i32) -> (i32, i32) {
    %c0_i32 = arith.constant 0 : i32
    %c0_i32_0 = arith.constant 0 : i32
    return %c0_i32, %arg1 : i32, i32
  }
  func.func @transform_3(%arg0: i32, %arg1: i32, %arg2: i32) -> (i32, i32) {
    %c0_i32 = arith.constant 0 : i32
    return %arg0, %arg1 : i32, i32
  }
}

</mosaic_0001>

<bundles_post_ra>
// kernel: unet_t_forward.26
= control target key start
LH: loop header
LB: loop body
LE: loop exit
PB: predicated region body
PF: predicated region fallthrough
CT: control target
= control target key end

     0   :  { %vm29_vm0 = vcmask 261120   ;;  %v280_v16 = vmov 0.0   ;;  %vm281_vm1 = vmmov 0   ;;  %vm83_vm2 = vcmask 257024   ;;  %s339_s0 = inlined_call_operand.vmem [shape: bf16[16,32], index: 0, kind: input, shape index: {}]   ;;  %s340_s3 = inlined_call_operand.vmem [shape: bf16[32,128], index: 3, kind: input, shape index: {}]   ;;  %s341_s1 = inlined_call_operand.vmem [shape: f32[1,32], index: 1, kind: input, shape index: {}]   ;;  %s342_s2 = inlined_call_operand.vmem [shape: f32[1,32], index: 2, kind: input, shape index: {}]   ;;  %s343_s4 = inlined_call_operand.vmem [shape: f32[1,128], index: 4, kind: input, shape index: {}]   ;;  %s344_s5 = inlined_call_operand.vmem [shape: bf16[16,128], index: 5, kind: output, shape index: {}]  }
   0x1   :  { %v243_v0 = vld [vmem:[%s339_s0] sm:$0xff]   ;;  %v265_v15 = vld [vmem:[%s340_s3 + $0x8] sm:$0xff]   ;;  %254 = vmatprep.subr.bf16.mxu0 %v280_v16  ;;  %258 = vmatprep.mubr.msk.bf16.mxu0 %vm281_vm1, %v280_v16 }
   0x2   :  { %v244_v1 = vunpack.c.l.bf16 %v243_v0  ;;  %v245_v2 = vunpack.c.h.bf16 %v243_v0  ;;  %255 = vmatpush3.bf16.msra.mxu0 %v265_v15  ;;  %v266_v17 = vld [vmem:[%s340_s3] sm:$0xff]  }
   0x3   :  { %256 = vmatprep.subr.bf16.mxu0 %v280_v16  ;;  %v227_v25 = vld [vmem:[%s341_s1] ss:$0 sm:$0xff] }
   0x4   :  { %v30_v3 = vsel %vm29_vm0, %v244_v1, 0.0  ;;  %v33_v4 = vsel %vm29_vm0, %v245_v2, 0.0  ;;  %v228_v27 = vld [vmem:[%s342_s2] ss:$0 sm:$0xff] }
   0x5   :  { %31 = vadd.xlane.f32.xlu0 %v30_v3  ;;  %v231_v37 = vld [vmem:[%s343_s4] ss:$0 sm:$0xff] }
   0x6   :  { %257 = vmatpush3.bf16.msra.mxu0 %v266_v17 }
   0x9   :  { %34 = vadd.xlane.f32.xlu0 %v33_v4 }
  0x8e   :  { %v32_v5 = vpop.xlane.xlu0 %31 }
  0x8f   :  { %v37_v6 = vmul.f32 0.03125, %v32_v5 }
  0x91   :  { %v39_v7 = vsub.f32 %v244_v1, %v37_v6 }
  0x92   :  { %v35_v8 = vpop.xlane.xlu0 %34 }
  0x93   :  { %v38_v9 = vmul.f32 0.03125, %v35_v8  ;;  %v41_v10 = vmul.f32 %v39_v7, %v39_v7 }
  0x95   :  { %v40_v11 = vsub.f32 %v245_v2, %v38_v9  ;;  %v43_v12 = vsel %vm29_vm0, %v41_v10, 0.0 }
  0x96   :  { %44 = vadd.xlane.f32.xlu1 %v43_v12 }
  0x97   :  { %v42_v13 = vmul.f32 %v40_v11, %v40_v11 }
  0x99   :  { %v46_v14 = vsel %vm29_vm0, %v42_v13, 0.0 }
  0x9a   :  { %47 = vadd.xlane.f32.xlu1 %v46_v14 }
 0x11f   :  { %v45_v18 = vpop.xlane.xlu1 %44 }
 0x120   :  { %v49_v19 = vmul.f32 0.03125, %v45_v18  ;;  %v282_v18 = vmov -1.0  }
 0x122   :  { %v51_v20 = vadd.f32 1e-05, %v49_v19 }
 0x123   :  { %v48_v21 = vpop.xlane.xlu1 %47 }
 0x124   :  { %268 = vrsqrt.f32 %v51_v20  ;;  %v50_v22 = vmul.f32 0.03125, %v48_v21 }
 0x126   :  { %v52_v23 = vadd.f32 1e-05, %v50_v22 }
 0x128   :  { %270 = vrsqrt.f32 %v52_v23 }
 0x131   :  { %v269_v24 = vpop.eup %268 }
 0x132   :  { %v55_v26 = vmul.f32 %v269_v24, %v39_v7 }
 0x134   :  { %v64_v28 = vmul.f32 %v227_v25, %v55_v26 }
 0x135   :  { %v271_v29 = vpop.eup %270 }
 0x136   :  { %v73_v30 = vadd.f32 %v228_v27, %v64_v28  ;;  %v56_v31 = vmul.f32 %v271_v29, %v40_v11 }
 0x138   :  { %v238_v32 = vpack.c.bf16 %v73_v30, %v73_v30  ;;  %v65_v33 = vmul.f32 %v227_v25, %v56_v31 }
 0x13a   :  { %84 = vst.msk [vmem:[#allocation2] sm:$0xf] %vm83_vm2, %v238_v32  ;;  %v74_v34 = vadd.f32 %v228_v27, %v65_v33 }
 0x13c   :  { %v239_v35 = vpack.c.bf16 %v74_v34, %v74_v34 }
 0x13e   :  { %85 = vst.msk [vmem:[#allocation2 + $0x4] sm:$0xf] %vm83_vm2, %v239_v35 }
 0x145   :  { %v267_v36 = vld [vmem:[#allocation2] sm:$0xff]  }
 0x146   :  { %259 = vmatmul.mubr.msk.bf16.vlgmr.msra.gmra.mxu0 %vm29_vm0, %v267_v36 }
 0x206   :  { %v154_v38 = vpop.f32.mrf.mxu0 }
 0x207   :  { %v155_v39 = vadd.f32 %v231_v37, %v154_v38 }
 0x208   :  { %v260_v40 = vpop.f32.mrf.mxu0 }
 0x209   :  { %v163_v41 = vmul.f32 0.70710677, %v155_v39  ;;  %v161_v26 = vmul.f32 0.5, %v155_v39 }
 0x20a   :  { %v157_v42 = vpop.f32.mrf.mxu0 }
 0x20b   :  { %v169_v43 = vand.u32 2147483647, %v163_v41  ;;  %v158_v44 = vadd.f32 %v231_v37, %v157_v42  ;;  %vm165_vm3 = vcmp.ge.f32.partialorder %v163_v41, 0.0 }
 0x20c   :  { %v261_v45 = vpop.f32.mrf.mxu0  ;;  %v167_v19 = vsel %vm165_vm3, 1.0, %v282_v18 }
 0x20d   :  { %v171_v46 = vmul.f32 0.3275911, %v169_v43  ;;  %v164_v47 = vmul.f32 0.70710677, %v158_v44  ;;  %v195_v52 = vsub.f32 0.0, %v169_v43  ;;  %v162_v27 = vmul.f32 0.5, %v158_v44 }
 0x20f   :  { %v173_v48 = vadd.f32 1.0, %v171_v46  ;;  %v170_v49 = vand.u32 2147483647, %v164_v47  ;;  %v197_v53 = vmul.f32 %v195_v52, %v169_v43  ;;  %vm166_vm4 = vcmp.ge.f32.partialorder %v164_v47, 0.0 }
 0x210   :  { %v168_v23 = vsel %vm166_vm4, 1.0, %v282_v18 }
 0x211   :  { %272 = vrcp.f32 %v173_v48  ;;  %v172_v50 = vmul.f32 0.3275911, %v170_v49  ;;  %v196_v54 = vsub.f32 0.0, %v170_v49  ;;  %v199_v57 = vmul.f32 1.442695, %v197_v53 }
 0x213   :  { %v174_v51 = vadd.f32 1.0, %v172_v50  ;;  %v198_v58 = vmul.f32 %v196_v54, %v170_v49 }
 0x215   :  { %274 = vrcp.f32 %v174_v51  ;;  %v201_v63 = vmul.f32 1.442695, %v198_v58 }
 0x216   :  { %276 = vpow2.f32 %v199_v57 }
 0x217   :  { %278 = vpow2.f32 %v201_v63 }
 0x21e   :  { %v273_v55 = vpop.eup %272 }
 0x21f   :  { %v177_v56 = vmul.f32 1.0614054, %v273_v55 }
 0x221   :  { %v179_v59 = vadd.f32 -1.4531521, %v177_v56 }
 0x222   :  { %v275_v60 = vpop.eup %274 }
 0x223   :  { %v181_v61 = vmul.f32 %v273_v55, %v179_v59  ;;  %v178_v62 = vmul.f32 1.0614054, %v275_v60  ;;  %v277_v12 = vpop.eup %276 }
 0x224   :  { %v279_v17 = vpop.eup %278 }
 0x225   :  { %v183_v0 = vadd.f32 1.4214138, %v181_v61  ;;  %v180_v1 = vadd.f32 -1.4531521, %v178_v62 }
 0x227   :  { %v185_v2 = vmul.f32 %v273_v55, %v183_v0  ;;  %v182_v3 = vmul.f32 %v275_v60, %v180_v1 }
 0x229   :  { %v187_v4 = vadd.f32 -0.28449672, %v185_v2  ;;  %v184_v5 = vadd.f32 1.4214138, %v182_v3 }
 0x22b   :  { %v189_v6 = vmul.f32 %v273_v55, %v187_v4  ;;  %v186_v7 = vmul.f32 %v275_v60, %v184_v5 }
 0x22d   :  { %v191_v8 = vadd.f32 0.2548296, %v189_v6  ;;  %v188_v9 = vadd.f32 -0.28449672, %v186_v7 }
 0x22f   :  { %v193_v10 = vmul.f32 %v273_v55, %v191_v8  ;;  %v190_v11 = vmul.f32 %v275_v60, %v188_v9 }
 0x231   :  { %v203_v13 = vmul.f32 %v277_v12, %v193_v10  ;;  %v192_v14 = vadd.f32 0.2548296, %v190_v11 }
 0x233   :  { %v205_v15 = vsub.f32 1.0, %v203_v13  ;;  %v194_v16 = vmul.f32 %v275_v60, %v192_v14 }
 0x235   :  { %v207_v20 = vmul.f32 %v205_v15, %v167_v19  ;;  %v204_v21 = vmul.f32 %v279_v17, %v194_v16 }
 0x237   :  { %v206_v22 = vsub.f32 1.0, %v204_v21  ;;  %v209_v24 = vadd.f32 1.0, %v207_v20 }
 0x239   :  { %v208_v25 = vmul.f32 %v206_v22, %v168_v23  ;;  %v211_v29 = vmul.f32 %v209_v24, %v161_v26 }
 0x23b   :  { %v210_v28 = vadd.f32 1.0, %v208_v25 }
 0x23d   :  { %v212_v30 = vmul.f32 %v210_v28, %v162_v27 }
 0x23f   :  { %v249_v31 = vpack.c.bf16 %v212_v30, %v211_v29 }
 0x241   :  { %250 = vst [vmem:[%s344_s5] sm:$0xff] %v249_v31  }

// kernel: unet_t_forward.25
= control target key start
LH: loop header
LB: loop body
LE: loop exit
PB: predicated region body
PF: predicated region fallthrough
CT: control target
= control target key end

     0   :  { %vm22_vm0 = vcmask 261120   ;;  %v157_v0 = vmov 0.0   ;;  %vm158_vm1 = vmmov 0   ;;  %vm125_vm2 = vcmask 257024   ;;  %s213_s1 = inlined_call_operand.vmem [shape: bf16[32,32], index: 1, kind: input, shape index: {}]   ;;  %s214_s0 = inlined_call_operand.vmem [shape: bf16[16,32], index: 0, kind: input, shape index: {}]   ;;  %s215_s2 = inlined_call_operand.vmem [shape: f32[1,32], index: 2, kind: input, shape index: {}]   ;;  %s216_s3 = inlined_call_operand.vmem [shape: f32[16,32], index: 3, kind: input, shape index: {}]   ;;  %s217_s4 = inlined_call_operand.vmem [shape: bf16[16,32], index: 4, kind: output, shape index: {}]  }
   0x1   :  { %144 = vmatprep.subr.bf16.mxu0 %v157_v0  ;;  %v154_v1 = vld [vmem:[%s213_s1 + $0x8] sm:$0xff]   ;;  %148 = vmatprep.mubr.msk.bf16.mxu0 %vm158_vm1, %v157_v0  ;;  %23 = vst.msk [vmem:[#allocation2] sm:$0xff] %vm22_vm0, %v157_v0  ;;  %24 = vst.msk [vmem:[#allocation2 + $0x8] sm:$0xff] %vm22_vm0, %v157_v0  ;;  %v155_v2 = vld [vmem:[%s213_s1] sm:$0xff]  }
   0x2   :  { %145 = vmatpush3.bf16.msra.mxu0 %v154_v1  ;;  %v156_v3 = vld [vmem:[%s214_s0] sm:$0xff]   ;;  %v114_v18 = vld [vmem:[%s216_s3 + $0x8] sm:$0xff] }
   0x3   :  { %146 = vmatprep.subr.bf16.mxu0 %v157_v0  ;;  %v136_v12 = vld [vmem:[%s215_s2] ss:$0 sm:$0xff] }
   0x4   :  { %v113_v14 = vld [vmem:[%s216_s3] sm:$0xff] }
   0x6   :  { %147 = vmatpush3.bf16.msra.mxu0 %v155_v2 }
   0x8   :  { %v29_v4 = vld [vmem:[#allocation2] sm:$0xff]  ;;  %v30_v8 = vld [vmem:[#allocation2 + $0x8] sm:$0xff] }
   0x9   :  { %149 = vmatmul.mubr.msk.bf16.vlgmr.msra.gmra.mxu0 %vm22_vm0, %v156_v3 }
  0xc9   :  { %v88_v5 = vpop.f32.mrf.mxu0 }
  0xca   :  { %v95_v6 = vadd.f32 %v88_v5, %v29_v4 }
  0xcb   :  { %v150_v7 = vpop.f32.mrf.mxu0 }
  0xcc   :  { %97 = vst.msk [vmem:[#allocation2] sm:$0xff] %vm22_vm0, %v95_v6 }
  0xcd   :  { %v91_v9 = vpop.f32.mrf.mxu0 }
  0xce   :  { %v96_v10 = vadd.f32 %v91_v9, %v30_v8 }
  0xcf   :  { %v151_v11 = vpop.f32.mrf.mxu0 }
  0xd0   :  { %98 = vst.msk [vmem:[#allocation2 + $0x8] sm:$0xff] %vm22_vm0, %v96_v10 }
  0xd3   :  { %v102_v13 = vld [vmem:[#allocation2] sm:$0xff] }
  0xd4   :  { %v111_v15 = vadd.f32 %v136_v12, %v102_v13 }
  0xd6   :  { %v115_v16 = vadd.f32 %v113_v14, %v111_v15 }
  0xd7   :  { %v103_v17 = vld [vmem:[#allocation2 + $0x8] sm:$0xff] }
  0xd8   :  { %v139_v19 = vpack.c.bf16 %v115_v16, %v115_v16  ;;  %v112_v20 = vadd.f32 %v136_v12, %v103_v17 }
  0xda   :  { %126 = vst.msk [vmem:[%s217_s4] sm:$0xf] %vm125_vm2, %v139_v19  ;;  %v116_v21 = vadd.f32 %v114_v18, %v112_v20 }
  0xdc   :  { %v140_v22 = vpack.c.bf16 %v116_v21, %v116_v21 }
  0xde   :  { %127 = vst.msk [vmem:[%s217_s4 + $0x4] sm:$0xf] %vm125_vm2, %v140_v22 }

// kernel: unet_t_forward.23
= control target key start
LH: loop header
LB: loop body
LE: loop exit
PB: predicated region body
PF: predicated region fallthrough
CT: control target
= control target key end

     0   :  { %vm42_vm0 = vcmask 261120   ;;  %v422_v15 = vmov 0.0   ;;  %vm423_vm1 = vmmov 0   ;;  %vm96_vm2 = vcmask 257024   ;;  %s559_s0 = inlined_call_operand.vmem [shape: f32[16,32], index: 0, kind: input, shape index: {}]   ;;  %s560_s3 = inlined_call_operand.vmem [shape: bf16[32,32], index: 3, kind: input, shape index: {}]   ;;  %s561_s4 = inlined_call_operand.vmem [shape: bf16[32,32], index: 4, kind: input, shape index: {}]   ;;  %s562_s5 = inlined_call_operand.vmem [shape: bf16[32,32], index: 5, kind: input, shape index: {}]   ;;  %s563_s1 = inlined_call_operand.vmem [shape: f32[1,32], index: 1, kind: input, shape index: {}]   ;;  %s564_s2 = inlined_call_operand.vmem [shape: f32[1,32], index: 2, kind: input, shape index: {}]   ;;  %s565_s6 = inlined_call_operand.vmem [shape: f32[1,32], index: 6, kind: input, shape index: {}]   ;;  %s566_s7 = inlined_call_operand.vmem [shape: f32[1,32], index: 7, kind: input, shape index: {}]   ;;  %s567_s9 = inlined_call_operand.vmem [shape: bf16[16,32], index: 9, kind: output, shape index: {0}]   ;;  %s568_s10 = inlined_call_operand.vmem [shape: bf16[16,32], index: 10, kind: output, shape index: {1}]   ;;  %s569_s8 = inlined_call_operand.vmem [shape: f32[1,32], index: 8, kind: input, shape index: {}]   ;;  %s570_s11 = inlined_call_operand.vmem [shape: bf16[16,32], index: 11, kind: output, shape index: {2}]  }
   0x1   :  { %v40_v0 = vld [vmem:[%s559_s0] sm:$0xff]  ;;  %v41_v1 = vld [vmem:[%s559_s0 + $0x8] sm:$0xff]  ;;  %385 = vmatprep.subr.bf16.mxu0 %v422_v15  ;;  %393 = vmatprep.subr.bf16.mxu1 %v422_v15 }
   0x2   :  { %v43_v2 = vsel %vm42_vm0, %v40_v0, 0.0  ;;  %v46_v3 = vsel %vm42_vm0, %v41_v1, 0.0  ;;  %v411_v14 = vld [vmem:[%s560_s3 + $0x8] sm:$0xff]   ;;  %v413_v17 = vld [vmem:[%s560_s3] sm:$0xff]   ;;  %389 = vmatprep.mubr.msk.bf16.mxu0 %vm423_vm1, %v422_v15  ;;  %397 = vmatprep.mubr.msk.bf16.mxu1 %vm423_vm1, %v422_v15 }
   0x3   :  { %44 = vadd.xlane.f32.xlu0 %v43_v2  ;;  %v412_v16 = vld [vmem:[%s561_s4 + $0x8] sm:$0xff]   ;;  %386 = vmatpush3.bf16.msra.mxu0 %v411_v14  ;;  %v414_v18 = vld [vmem:[%s561_s4] sm:$0xff]  }
   0x4   :  { %394 = vmatpush3.bf16.msra.mxu1 %v412_v16  ;;  %387 = vmatprep.subr.bf16.mxu0 %v422_v15  ;;  %v345_v26 = vld [vmem:[%s563_s1] ss:$0 sm:$0xff]  ;;  %v416_v37 = vld [vmem:[%s562_s5 + $0x8] sm:$0xff]  }
   0x5   :  { %395 = vmatprep.subr.bf16.mxu1 %v422_v15  ;;  %v346_v28 = vld [vmem:[%s564_s2] ss:$0 sm:$0xff] }
   0x6   :  { %v417_v39 = vld [vmem:[%s562_s5] sm:$0xff]  }
   0x7   :  { %47 = vadd.xlane.f32.xlu0 %v46_v3  ;;  %388 = vmatpush3.bf16.msra.mxu0 %v413_v17  ;;  %v349_v40 = vld [vmem:[%s565_s6] ss:$0 sm:$0xff] }
   0x8   :  { %396 = vmatpush3.bf16.msra.mxu1 %v414_v18  ;;  %401 = vmatprep.subr.bf16.mxu0 %v422_v15  ;;  %v356_v41 = vld [vmem:[%s566_s7] ss:$0 sm:$0xff] }
   0x9   :  { %v362_v56 = vld [vmem:[%s569_s8] ss:$0 sm:$0xff] }
  0x8c   :  { %v45_v4 = vpop.xlane.xlu0 %44 }
  0x8d   :  { %v50_v5 = vmul.f32 0.03125, %v45_v4 }
  0x8f   :  { %v52_v6 = vsub.f32 %v40_v0, %v50_v5 }
  0x90   :  { %v48_v7 = vpop.xlane.xlu0 %47 }
  0x91   :  { %v51_v8 = vmul.f32 0.03125, %v48_v7  ;;  %v54_v9 = vmul.f32 %v52_v6, %v52_v6 }
  0x93   :  { %v53_v10 = vsub.f32 %v41_v1, %v51_v8  ;;  %v56_v11 = vsel %vm42_vm0, %v54_v9, 0.0 }
  0x94   :  { %57 = vadd.xlane.f32.xlu1 %v56_v11 }
  0x95   :  { %v55_v12 = vmul.f32 %v53_v10, %v53_v10 }
  0x97   :  { %v59_v13 = vsel %vm42_vm0, %v55_v12, 0.0 }
  0x98   :  { %60 = vadd.xlane.f32.xlu1 %v59_v13 }
 0x11d   :  { %v58_v19 = vpop.xlane.xlu1 %57 }
 0x11e   :  { %v62_v20 = vmul.f32 0.03125, %v58_v19 }
 0x120   :  { %v64_v21 = vadd.f32 1e-05, %v62_v20 }
 0x121   :  { %v61_v22 = vpop.xlane.xlu1 %60 }
 0x122   :  { %418 = vrsqrt.f32 %v64_v21  ;;  %v63_v23 = vmul.f32 0.03125, %v61_v22 }
 0x124   :  { %v65_v24 = vadd.f32 1e-05, %v63_v23 }
 0x126   :  { %420 = vrsqrt.f32 %v65_v24 }
 0x12f   :  { %v419_v25 = vpop.eup %418 }
 0x130   :  { %v68_v27 = vmul.f32 %v419_v25, %v52_v6 }
 0x132   :  { %v77_v29 = vmul.f32 %v345_v26, %v68_v27 }
 0x133   :  { %v421_v30 = vpop.eup %420 }
 0x134   :  { %v86_v31 = vadd.f32 %v346_v28, %v77_v29  ;;  %v69_v32 = vmul.f32 %v421_v30, %v53_v10 }
 0x136   :  { %v368_v33 = vpack.c.bf16 %v86_v31, %v86_v31  ;;  %v78_v34 = vmul.f32 %v345_v26, %v69_v32 }
 0x138   :  { %97 = vst.msk [vmem:[#allocation2] sm:$0xf] %vm96_vm2, %v368_v33  ;;  %v87_v35 = vadd.f32 %v346_v28, %v78_v34 }
 0x13a   :  { %v369_v36 = vpack.c.bf16 %v87_v35, %v87_v35 }
 0x13c   :  { %98 = vst.msk [vmem:[#allocation2 + $0x4] sm:$0xf] %vm96_vm2, %v369_v36 }
 0x143   :  { %v415_v38 = vld [vmem:[#allocation2] sm:$0xff]  }
 0x144   :  { %390 = vmatmul.mubr.msk.bf16.vlgmr.msra.gmra.mxu0 %vm42_vm0, %v415_v38  ;;  %398 = vmatmul.mubr.msk.bf16.vlgmr.msra.gmra.mxu1 %vm42_vm0, %v415_v38 }
 0x145   :  { %402 = vmatpush3.bf16.msra.mxu0 %v416_v37  ;;  %405 = vmatprep.mubr.msk.bf16.mxu0 %vm423_vm1, %v422_v15 }
 0x146   :  { %403 = vmatprep.subr.bf16.mxu0 %v422_v15 }
 0x149   :  { %404 = vmatpush3.bf16.msra.mxu0 %v417_v39 }
 0x14c   :  { %406 = vmatmul.mubr.msk.bf16.vlgmr.msra.gmra.mxu0 %vm42_vm0, %v415_v38 }
 0x204   :  { %v167_v42 = vpop.f32.mrf.mxu0  ;;  %v242_v43 = vpop.f32.mrf.mxu1 }
 0x205   :  { %v168_v44 = vadd.f32 %v349_v40, %v167_v42  ;;  %v243_v45 = vadd.f32 %v356_v41, %v242_v43 }
 0x206   :  { %v391_v46 = vpop.f32.mrf.mxu0  ;;  %v399_v47 = vpop.f32.mrf.mxu1 }
 0x207   :  { %v370_v48 = vpack.c.bf16 %v168_v44, %v168_v44  ;;  %v372_v49 = vpack.c.bf16 %v243_v45, %v243_v45 }
 0x208   :  { %v170_v50 = vpop.f32.mrf.mxu0  ;;  %v245_v51 = vpop.f32.mrf.mxu1 }
 0x209   :  { %183 = vst.msk [vmem:[%s567_s9] sm:$0xf] %vm96_vm2, %v370_v48  ;;  %257 = vst.msk [vmem:[%s568_s10] sm:$0xf] %vm96_vm2, %v372_v49  ;;  %v171_v52 = vadd.f32 %v349_v40, %v170_v50  ;;  %v246_v53 = vadd.f32 %v356_v41, %v245_v51 }
 0x20a   :  { %v392_v54 = vpop.f32.mrf.mxu0  ;;  %v400_v55 = vpop.f32.mrf.mxu1 }
 0x20b   :  { %v371_v57 = vpack.c.bf16 %v171_v52, %v171_v52  ;;  %v373_v58 = vpack.c.bf16 %v246_v53, %v246_v53 }
 0x20c   :  { %v316_v59 = vpop.f32.mrf.mxu0 }
 0x20d   :  { %184 = vst.msk [vmem:[%s567_s9 + $0x4] sm:$0xf] %vm96_vm2, %v371_v57  ;;  %258 = vst.msk [vmem:[%s568_s10 + $0x4] sm:$0xf] %vm96_vm2, %v373_v58  ;;  %v317_v60 = vadd.f32 %v362_v56, %v316_v59 }
 0x20e   :  { %v407_v61 = vpop.f32.mrf.mxu0 }
 0x20f   :  { %v374_v62 = vpack.c.bf16 %v317_v60, %v317_v60 }
 0x210   :  { %v319_v63 = vpop.f32.mrf.mxu0 }
 0x211   :  { %331 = vst.msk [vmem:[%s570_s11] sm:$0xf] %vm96_vm2, %v374_v62  ;;  %v320_v0 = vadd.f32 %v362_v56, %v319_v63 }
 0x212   :  { %v408_v1 = vpop.f32.mrf.mxu0 }
 0x213   :  { %v375_v2 = vpack.c.bf16 %v320_v0, %v320_v0 }
 0x215   :  { %332 = vst.msk [vmem:[%s570_s11 + $0x4] sm:$0xf] %vm96_vm2, %v375_v2 }

// kernel: unet_t_forward.24
= control target key start
LH: loop header
LB: loop body
LE: loop exit
PB: predicated region body
PF: predicated region fallthrough
CT: control target
= control target key end

     0   :  { %s1189_s12 = smov 0   ;;  %s1191_s13 = smov 0   ;;  %s1369_s0 = inlined_call_operand.vmem [shape: bf16[2,8,32], index: 0, kind: input, shape index: {}]   ;;  %s1370_s1 = inlined_call_operand.vmem [shape: bf16[2,8,32], index: 1, kind: input, shape index: {}]   ;;  %s1371_s2 = inlined_call_operand.vmem [shape: bf16[2,8,32], index: 2, kind: input, shape index: {}]   ;;  %s1372_s3 = inlined_call_operand.vmem [shape: bf16[2,8,32], index: 3, kind: output, shape index: {}]  }
   0x1   :  { %s1193_s14 = smov 0  }
   0x2 LB: > { %s32_s15 = sadd.s32 1, %s1147_s13  ;;  %p975_p0 = scmp.ge.s32.totalorder %s1151_s14, 1  ;;  %s1151_s14 = sphi %s1193_s14, %s13_s14   ;;  %s1147_s13 = sphi %s1191_s13, %s1374_s13   ;;  %s1143_s12 = sphi %s1189_s12, %s1373_s12  }
   0x3   : > { %p34_p1 = scmp.ge.s32.totalorder %s32_s15, 2  ;;  %p190_p2 = scmp.lt.s32.totalorder %s1151_s14, 3 }
   0x5   : > { %s1376_s15 = smov (%p34_p1, %s32_s15), 0  ;;  %p191_p3 = pnand %p975_p0, %p190_p2 }
   0x6   : > { %p232_p4 = scmp.lt.s32.totalorder (!%p191_p3), %s1143_s12, 1  ;;  %s1157_s23 = smov (!%p191_p3), 120  }
   0x7   : > { %194 = sbr.rel (%p191_p3) target bundleno = 1484 (0x5cc), region = 32  ;;  %s1158_s24 = smov (!%p191_p3), 112  }
   0x8   : > { %s1159_s25 = smov (!%p191_p3), 104   ;;  %s1163_s29 = smov (!%p191_p3), 121  }
   0x9   : > { %s1164_s30 = smov (!%p191_p3), 122   ;;  %s1165_s4 = smov (!%p191_p3), 123  }
   0xa   : > { %s1166_s5 = smov (!%p191_p3), 8   ;;  %s1167_s6 = smov (!%p191_p3), 16  }
   0xb   : > { %s1168_s7 = smov (!%p191_p3), 24  }
   0xc   : > { %v1153_v0 = vmov 0.0   ;;  %vm1154_vm0 = vmmov 0   ;;  %s1378_s12 = smov (!%p232_p4, %s1143_s12), 1  ;;  %vm274_vm1 = vcmask 64512   ;;  %vm266_vm2 = vcmask 31744  }
   0xd   : > { %1009 = vmatprep.subr.bf16.mxu0 %v1153_v0  ;;  %1011 = vmatprep.mubr.msk.bf16.mxu0 %vm1154_vm0, %v1153_v0  ;;  %s1213_s16 = sshll.u32 %s1378_s12, 2  ;;  %v1155_v4 = vmov -inf   ;;  %268 = vst.msk [vmem:[#allocation3] sm:$0xff] %vm266_vm2, %v1153_v0  ;;  %v1156_v10 = vmov 0   ;;  %vm403_vm3 = vcmask 7168   ;;  %vm344_vm4 = vcmask 1043456  }
   0xe   : > { %1015 = vmatprep.subr.bf16.mxu1 %v1153_v0  ;;  %1017 = vmatprep.mubr.msk.bf16.mxu1 %vm1154_vm0, %v1153_v0  ;;  %s245_s19 = scalar_lea.vmem %s1370_s1, %s1213_s16  ;;  %s238_s22 = scalar_lea.vmem %s1369_s0, %s1213_s16  ;;  %267 = vst.msk [vmem:[#allocation2] sm:$0xff] %vm266_vm2, %v1155_v4  ;;  %v1160_v47 = vmov 1   ;;  %v1161_v54 = vmov 2   ;;  %vm551_vm5 = vcmask 15368   ;;  %v1162_v61 = vmov 3  }
   0xf   : > { %v272_v1 = vld [vmem:[%s245_s19] sm:$0xf]  ;;  %1097 = vset.pattern.permute.xlu0 %v1156_v10  ;;  %s252_s28 = scalar_lea.vmem %s1371_s2, %s1213_s16  ;;  %1098 = vset.pattern.permute.xlu1 %v1160_v47  ;;  %vm690_vm6 = vcmask 23568   ;;  %vm829_vm7 = vcmask 31768   ;;  %vm269_vm8 = vcmask 261120   ;;  %vm543_vm9 = vcmask 130112   ;;  %s259_s10 = scalar_lea.vmem %s1372_s3, %s1213_s16 }
  0x10   : > { %v279_v2 = vsel %vm274_vm1, %v272_v1, 0  ;;  %v271_v3 = vld [vmem:[%s238_s22] sm:$0xf]  ;;  %v983_v11 = vcombine.low %v272_v1, %v272_v1  ;;  %270 = vst.msk [vmem:[#allocation4] sm:$0xff] %vm269_vm8, %v1153_v0  ;;  %vm682_vm10 = vcmask 195712   ;;  %vm821_vm11 = vcmask 261312  }
  0x11   : > { %1010 = vmatpush3.bf16.xpose.msra.mxu0 %v279_v2  ;;  %v982_v12 = vcombine.low %v271_v3, %v271_v3  ;;  %v1251_v17 = vld [vmem:[%s252_s28] sm:$0xf]  ;;  %vm855_vm12 = vcmask 130048   ;;  %vm857_vm13 = vcmask 195584   ;;  %vm862_vm14 = vcmask 257024  }
  0x12   : > { %1027 = vmatprep.subr.bf16.mxu0 %v1153_v0  ;;  %414 = vrot.lane.b32.xlu1 %v983_v11, %s1157_s23  ;;  %v339_v18 = vsel %vm274_vm1, %v1251_v17, 1065369472  ;;  %v985_v58 = vcombine.low %v1251_v17, %v1251_v17 }
  0x13   : > { %v345_v19 = vsel %vm344_vm4, %v339_v18, 0 }
  0x14   : > { %1016 = vmatpush3.bf16.msra.mxu1 %v345_v19 }
  0x15   : > { %v1237_v13 = vld [vmem:[#allocation2] sm:$0xff]  ;;  %1021 = vmatprep.subr.bf16.mxu1 %v1153_v0 }
  0x16   : > { %409 = vrot.lane.b32.xlu1 %v982_v12, %s1157_s23 }
  0x18   : > { %1012 = vmatmul.mubr.msk.bf16.vlgmr.msra.gmra.mxu0 %vm274_vm1, %v271_v3 }
  0x19   : > { %1029 = vmatprep.mubr.msk.bf16.mxu0 %vm1154_vm0, %v1153_v0 }
  0x1a   : > { %556 = vrot.lane.b32.xlu1 %v983_v11, %s1158_s24 }
  0x1e   : > { %554 = vrot.lane.b32.xlu1 %v982_v12, %s1158_s24 }
  0x22   : > { %695 = vrot.lane.b32.xlu1 %v983_v11, %s1159_s25 }
  0x26   : > { %693 = vrot.lane.b32.xlu1 %v982_v12, %s1159_s25 }
  0x84   : > { %v415_v23 = vpop.permute.xlu1 %414 }
  0x85   : > { %v420_v27 = vsel %vm274_vm1, %v415_v23, 0 }
  0x88   : > { %v410_v24 = vpop.permute.xlu1 %409 }
  0x8c   : > { %v557_v28 = vpop.permute.xlu1 %556 }
  0x8d   : > { %v562_v30 = vsel %vm274_vm1, %v557_v28, 0 }
  0x90   : > { %v555_v29 = vpop.permute.xlu1 %554 }
  0x94   : > { %v696_v31 = vpop.permute.xlu1 %695 }
  0x95   : > { %v701_v32 = vsel %vm274_vm1, %v696_v31, 0 }
  0x98   : > { %v694_v33 = vpop.permute.xlu1 %693 }
  0xd8   : > { %v315_v5 = vpop.f32.mrf.mxu0 }
  0xd9   : > { %v322_v6 = vsel %vm274_vm1, %v315_v5, -inf }
  0xda   : > { %323 = vmax.xlane.f32.xlu0 %v322_v6  ;;  %v1013_v7 = vpop.f32.mrf.mxu0 }
  0xdc   : > { %v318_v8 = vpop.f32.mrf.mxu0 }
  0xde   : > { %v1014_v9 = vpop.f32.mrf.mxu0 }
 0x163   : > { %v324_v14 = vpop.xlane.xlu0 %323 }
 0x164   : > { %v1240_v15 = vmax.f32 %v1237_v13, %v324_v14 }
 0x166   : > { %v326_v16 = vsub.f32 %v1237_v13, %v1240_v15  ;;  %405 = vst.msk [vmem:[#allocation2] sm:$0xff] %vm403_vm3, %v1240_v15  ;;  %331 = vperm.xlu0 %1097, %v1240_v15  }
 0x16a   : > { %1099 = vset.pattern.permute.xlu0 %v1161_v54 }
 0x16d   : > { %v1288_v56 = vld [vmem:[#allocation2] sm:$0xff] }
 0x1e1   : > { %v332_v20 = vpop.permute.xlu0 %331 }
 0x1e2   : > { %v334_v21 = vsub.f32 %v315_v5, %v332_v20  ;;  %v327_v20 = vmul.f32 1.442695, %v326_v16 }
 0x1e4   : > { %v335_v22 = vmul.f32 1.442695, %v334_v21 }
 0x1e6   : > { %1111 = vpow2.f32 %v335_v22 }
 0x1f3   : > { %v1112_v25 = vpop.eup %1111 }
 0x1f4   : > { %v340_v26 = vpack.c.bf16 %v1112_v25, %v1112_v25 }
 0x1f6   : > { %1018 = vmatmul.mubr.msk.bf16.vlgmr.msra.gmra.mxu1 %vm274_vm1, %v340_v26 }
 0x1f7   : > { %1022 = vmatpush3.bf16.xpose.msra.mxu1 %v420_v27  ;;  %1023 = vmatprep.mubr.msk.bf16.mxu1 %vm1154_vm0, %v1153_v0 }
 0x1f8   : > { %1033 = vmatprep.subr.bf16.mxu1 %v1153_v0 }
 0x1fe   : > { %1024 = vmatmul.mubr.msk.bf16.vlgmr.msra.gmra.mxu1 %vm274_vm1, %v410_v24 }
 0x1ff   : > { %1034 = vmatpush3.bf16.xpose.msra.mxu1 %v562_v30  ;;  %1035 = vmatprep.mubr.msk.bf16.mxu1 %vm1154_vm0, %v1153_v0 }
 0x200   : > { %1045 = vmatprep.subr.bf16.mxu1 %v1153_v0 }
 0x206   : > { %1036 = vmatmul.mubr.msk.bf16.vlgmr.msra.gmra.mxu1 %vm274_vm1, %v555_v29 }
 0x207   : > { %1046 = vmatpush3.bf16.xpose.msra.mxu1 %v701_v32  ;;  %1047 = vmatprep.mubr.msk.bf16.mxu1 %vm1154_vm0, %v1153_v0  ;;  %v396_v32 = vld [vmem:[#allocation3] sm:$0xff] }
 0x20e   : > { %1048 = vmatmul.mubr.msk.bf16.vlgmr.msra.gmra.mxu1 %vm274_vm1, %v694_v33 }
 0x2b6   : > { %v1272_v34 = vpop.f32.mrf.mxu1 }
 0x2b8   : > { %v1019_v35 = vpop.f32.mrf.mxu1 }
 0x2ba   : > { %v384_v36 = vpop.f32.mrf.mxu1 }
 0x2bc   : > { %v1020_v37 = vpop.f32.mrf.mxu1 }
 0x2be   : > { %v1274_v38 = vpop.f32.mrf.mxu1 }
 0x2bf   : > { %v463_v39 = vsel %vm274_vm1, %v1274_v38, -inf }
 0x2c0   : > { %464 = vmax.xlane.f32.xlu1 %v463_v39  ;;  %v1025_v40 = vpop.f32.mrf.mxu1 }
 0x2c2   : > { %v459_v41 = vpop.f32.mrf.mxu1 }
 0x2c4   : > { %v1026_v42 = vpop.f32.mrf.mxu1 }
 0x2c6   : > { %v1278_v43 = vpop.f32.mrf.mxu1 }
 0x2c7   : > { %v605_v44 = vsel %vm274_vm1, %v1278_v43, -inf }
 0x2c8   : > { %606 = vmax.xlane.f32.xlu0 %v605_v44  ;;  %v1037_v45 = vpop.f32.mrf.mxu1 }
 0x2ca   : > { %v601_v46 = vpop.f32.mrf.mxu1 }
 0x2cc   : > { %v1038_v48 = vpop.f32.mrf.mxu1 }
 0x2ce   : > { %v1283_v49 = vpop.f32.mrf.mxu1 }
 0x2cf   : > { %v744_v50 = vsel %vm274_vm1, %v1283_v49, -inf }
 0x2d0   : > { %v1049_v51 = vpop.f32.mrf.mxu1  ;;  %745 = vmax.xlane.f32.xlu1 %v744_v50 }
 0x2d2   : > { %v740_v52 = vpop.f32.mrf.mxu1 }
 0x2d4   : > { %v1050_v53 = vpop.f32.mrf.mxu1 }
 0x349   : > { %v465_v55 = vpop.xlane.xlu1 %464 }
 0x34a   : > { %v1291_v57 = vmax.f32 %v1288_v56, %v465_v55 }
 0x34c   : > { %v467_v59 = vsub.f32 %v1288_v56, %v1291_v57  ;;  %553 = vst.msk [vmem:[#allocation2] sm:$0xff] %vm551_vm5, %v1291_v57  ;;  %472 = vperm.xlu1 %1098, %v1291_v57  }
 0x34e   : > { %v468_v48 = vmul.f32 1.442695, %v467_v59 }
 0x350   : > { %481 = vrot.lane.b32.xlu1 %v985_v58, %s1157_s23 }
 0x351   : > { %v607_v60 = vpop.xlane.xlu0 %606  ;;  %1100 = vset.pattern.permute.xlu1 %v1162_v61 }
 0x353   : > { %v604_v62 = vld [vmem:[#allocation2] sm:$0xff] }
 0x354   : > { %v608_v63 = vmax.f32 %v604_v62, %v607_v60 }
 0x356   : > { %v609_v1 = vsub.f32 %v604_v62, %v608_v63  ;;  %692 = vst.msk [vmem:[#allocation2] sm:$0xff] %vm690_vm6, %v608_v63  ;;  %614 = vperm.xlu0 %1099, %v608_v63  }
 0x358   : > { %v610_v2 = vmul.f32 1.442695, %v609_v1 }
 0x359   : > { %v746_v3 = vpop.xlane.xlu1 %745 }
 0x35a   : > { %1113 = vpow2.f32 %v610_v2 }
 0x35d   : > { %v743_v4 = vld [vmem:[#allocation2] sm:$0xff] }
 0x35e   : > { %v747_v5 = vmax.f32 %v743_v4, %v746_v3 }
 0x360   : > { %v748_v6 = vsub.f32 %v743_v4, %v747_v5  ;;  %831 = vst.msk [vmem:[#allocation2] sm:$0xff] %vm829_vm7, %v747_v5  ;;  %753 = vperm.xlu1 %1100, %v747_v5   ;;  %v387_v5 = vld [vmem:[#allocation4] sm:$0xff] }
 0x362   : > { %v749_v7 = vmul.f32 1.442695, %v748_v6 }
 0x364   : > { %1115 = vpow2.f32 %v749_v7  ;;  %620 = vrot.lane.b32.xlu1 %v985_v58, %s1158_s24 }
 0x365   : > { %1101 = vset.pattern.permute.xlu1 %v1156_v10 }
 0x367   : > { %v1306_v8 = vpop.eup %1113 }
 0x368   : > { %759 = vrot.lane.b32.xlu1 %v985_v58, %s1159_s25  ;;  %673 = vperm.xlu0 %1099, %v1306_v8  }
 0x36c   : > { %399 = vrot.lane.b32.xlu1 %v1272_v34, %s1157_s23  ;;  %1103 = vset.pattern.permute.xlu0 %v1162_v61 }
 0x371   : > { %v1313_v9 = vpop.eup %1115 }
 0x372   : > { %812 = vperm.xlu0 %1103, %v1313_v9  }
 0x376   : > { %1105 = vset.pattern.permute.xlu0 %v1160_v47 }
 0x3c7   : > { %v473_v11 = vpop.permute.xlu1 %472 }
 0x3c8   : > { %v475_v12 = vsub.f32 %v1274_v38, %v473_v11 }
 0x3ca   : > { %v476_v14 = vmul.f32 1.442695, %v475_v12 }
 0x3cb   : > { %v482_v17 = vpop.permute.xlu1 %481 }
 0x3cc   : > { %1117 = vpow2.f32 %v476_v14  ;;  %v484_v18 = vsel %vm274_vm1, %v482_v17, 1065369472 }
 0x3cd   : > { %v489_v19 = vsel %vm344_vm4, %v484_v18, 0  ;;  %1119 = vpow2.f32 %v327_v20 }
 0x3ce   : > { %1028 = vmatpush3.bf16.msra.mxu0 %v489_v19 }
 0x3cf   : > { %1039 = vmatprep.subr.bf16.mxu0 %v1153_v0 }
 0x3d1   : > { %v615_v21 = vpop.permute.xlu0 %614 }
 0x3d2   : > { %v617_v22 = vsub.f32 %v1278_v43, %v615_v21 }
 0x3d4   : > { %v618_v23 = vmul.f32 1.442695, %v617_v22 }
 0x3d6   : > { %1121 = vpow2.f32 %v618_v23 }
 0x3d9   : > { %v1118_v24 = vpop.eup %1117 }
 0x3da   : > { %v485_v25 = vpack.c.bf16 %v1118_v24, %v1118_v24  ;;  %v1120_v16 = vpop.eup %1119 }
 0x3db   : > { %v754_v26 = vpop.permute.xlu1 %753  ;;  %v397_v37 = vmul.f32 %v1120_v16, %v396_v32 }
 0x3dc   : > { %v756_v27 = vsub.f32 %v1283_v49, %v754_v26  ;;  %1030 = vmatmul.mubr.msk.bf16.vlgmr.msra.gmra.mxu0 %vm274_vm1, %v485_v25 }
 0x3dd   : > { %1041 = vmatprep.mubr.msk.bf16.mxu0 %vm1154_vm0, %v1153_v0 }
 0x3de   : > { %v757_v28 = vmul.f32 1.442695, %v756_v27 }
 0x3df   : > { %v621_v29 = vpop.permute.xlu1 %620 }
 0x3e0   : > { %1123 = vpow2.f32 %v757_v28  ;;  %v623_v13 = vsel %vm274_vm1, %v621_v29, 1065369472 }
 0x3e1   : > { %v628_v15 = vsel %vm344_vm4, %v623_v13, 0  ;;  %1125 = vpow2.f32 %v468_v48 }
 0x3e2   : > { %1040 = vmatpush3.bf16.msra.mxu0 %v628_v15 }
 0x3e3   : > { %v1122_v30 = vpop.eup %1121  ;;  %v760_v31 = vpop.permute.xlu1 %759  ;;  %1051 = vmatprep.subr.bf16.mxu0 %v1153_v0 }
 0x3e4   : > { %v624_v33 = vpack.c.bf16 %v1122_v30, %v1122_v30  ;;  %v762_v35 = vsel %vm274_vm1, %v760_v31, 1065369472  ;;  %v674_v20 = vpop.permute.xlu0 %673 }
 0x3e5   : > { %v767_v36 = vsel %vm344_vm4, %v762_v35, 0 }
 0x3e6   : > { %1042 = vmatmul.mubr.msk.bf16.vlgmr.msra.gmra.mxu0 %vm274_vm1, %v624_v33 }
 0x3e7   : > { %v400_v38 = vpop.permute.xlu1 %399  ;;  %1052 = vmatpush3.bf16.msra.mxu0 %v767_v36  ;;  %1053 = vmatprep.mubr.msk.bf16.mxu0 %vm1154_vm0, %v1153_v0 }
 0x3e8   : > { %v402_v39 = vadd.f32 %v400_v38, %v397_v37 }
 0x3ea   : > { %404 = vst.msk [vmem:[#allocation3] sm:$0xff] %vm403_vm3, %v402_v39 }
 0x3ed   : > { %v1124_v40 = vpop.eup %1123  ;;  %v813_v24 = vpop.permute.xlu0 %812 }
 0x3ee   : > { %v763_v41 = vpack.c.bf16 %v1124_v40, %v1124_v40  ;;  %v1126_v60 = vpop.eup %1125 }
 0x3f0   : > { %1054 = vmatmul.mubr.msk.bf16.vlgmr.msra.gmra.mxu0 %vm274_vm1, %v763_v41 }
 0x3f1   : > { %v545_v0 = vld [vmem:[#allocation3] sm:$0xff] }
 0x3f2   : > { %v546_v56 = vmul.f32 %v1126_v60, %v545_v0 }
 0x49c   : > { %v525_v42 = vpop.f32.mrf.mxu0 }
 0x49d   : > { %547 = vrot.lane.b32.xlu1 %v525_v42, %s1163_s29 }
 0x49e   : > { %v1031_v43 = vpop.f32.mrf.mxu0 }
 0x4a0   : > { %v528_v44 = vpop.f32.mrf.mxu0 }
 0x4a2   : > { %v1032_v45 = vpop.f32.mrf.mxu0 }
 0x4a6   : > { %v664_v46 = vpop.f32.mrf.mxu0 }
 0x4a7   : > { %686 = vrot.lane.b32.xlu1 %v664_v46, %s1164_s30 }
 0x4a8   : > { %v1043_v49 = vpop.f32.mrf.mxu0 }
 0x4aa   : > { %v667_v50 = vpop.f32.mrf.mxu0 }
 0x4ac   : > { %v1044_v51 = vpop.f32.mrf.mxu0 }
 0x4b0   : > { %v803_v52 = vpop.f32.mrf.mxu0 }
 0x4b1   : > { %825 = vrot.lane.b32.xlu1 %v803_v52, %s1165_s4 }
 0x4b2   : > { %v1055_v53 = vpop.f32.mrf.mxu0 }
 0x4b4   : > { %v806_v55 = vpop.f32.mrf.mxu0 }
 0x4b5   : > { %390 = vperm.xlu1 %1101, %v1120_v16  }
 0x4b6   : > { %v1056_v58 = vpop.f32.mrf.mxu0 }
 0x4b9   : > { %1102 = vset.pattern.permute.xlu1 %v1160_v47 }
 0x4ba   : > { %534 = vperm.xlu1 %1102, %v1126_v60  }
 0x4be   : > { %539 = vrot.lane.b32.xlu1 %v525_v42, %s1166_s5 }
 0x4bf   : > { %1104 = vset.pattern.permute.xlu1 %v1156_v10 }
 0x4c2   : > { %678 = vrot.lane.b32.xlu1 %v664_v46, %s1167_s6 }
 0x4c6   : > { %817 = vrot.lane.b32.xlu1 %v803_v52, %s1168_s7 }
 0x50f   : > { %v548_v57 = vpop.permute.xlu1 %547 }
 0x510   : > { %v550_v59 = vadd.f32 %v548_v57, %v546_v56 }
 0x512   : > { %552 = vst.msk [vmem:[#allocation3] sm:$0xff] %vm551_vm5, %v550_v59 }
 0x519   : > { %v684_v62 = vld [vmem:[#allocation3] sm:$0xff]  ;;  %v687_v1 = vpop.permute.xlu1 %686 }
 0x51a   : > { %v685_v63 = vmul.f32 %v1306_v8, %v684_v62 }
 0x51c   : > { %v689_v47 = vadd.f32 %v687_v1, %v685_v63 }
 0x51e   : > { %691 = vst.msk [vmem:[#allocation3] sm:$0xff] %vm690_vm6, %v689_v47 }
 0x523   : > { %v826_v3 = vpop.permute.xlu1 %825 }
 0x525   : > { %v823_v2 = vld [vmem:[#allocation3] sm:$0xff] }
 0x526   : > { %v824_v10 = vmul.f32 %v1313_v9, %v823_v2 }
 0x528   : > { %v828_v4 = vadd.f32 %v826_v3, %v824_v10 }
 0x52a   : > { %830 = vst.msk [vmem:[#allocation3] sm:$0xff] %vm829_vm7, %v828_v4 }
 0x530   : > { %v391_v6 = vpop.permute.xlu1 %390 }
 0x531   : > { %v835_v7 = vld [vmem:[#allocation3] sm:$0xff]  ;;  %v393_v11 = vmul.f32 %v391_v6, %v387_v5 }
 0x532   : > { %1127 = vrcp.f32 %v835_v7 }
 0x533   : > { %v394_v12 = vadd.f32 %v393_v11, %v1272_v34 }
 0x535   : > { %395 = vst.msk [vmem:[#allocation4] sm:$0xff] %vm274_vm1, %v394_v12  ;;  %v535_v8 = vpop.permute.xlu1 %534 }
 0x539   : > { %v540_v18 = vpop.permute.xlu1 %539 }
 0x53c   : > { %v531_v14 = vld [vmem:[#allocation4] sm:$0xff] }
 0x53d   : > { %v537_v17 = vmul.f32 %v535_v8, %v531_v14  ;;  %v679_v22 = vpop.permute.xlu1 %678 }
 0x53f   : > { %v1128_v19 = vpop.eup %1127  ;;  %v542_v9 = vadd.f32 %v540_v18, %v537_v17 }
 0x540   : > { %843 = vperm.xlu0 %1105, %v1128_v19   ;;  %839 = vperm.xlu1 %1104, %v1128_v19  }
 0x541   : > { %544 = vst.msk [vmem:[#allocation4] sm:$0xff] %vm543_vm9, %v542_v9  ;;  %v818_v27 = vpop.permute.xlu1 %817 }
 0x544   : > { %1106 = vset.pattern.permute.xlu1 %v1161_v54  ;;  %1108 = vset.pattern.permute.xlu0 %v1162_v61 }
 0x545   : > { %847 = vperm.xlu1 %1106, %v1128_v19  }
 0x548   : > { %v670_v21 = vld [vmem:[#allocation4] sm:$0xff] }
 0x549   : > { %v676_v34 = vmul.f32 %v674_v20, %v670_v21  ;;  %1107 = vset.pattern.permute.xlu1 %v1162_v61 }
 0x54a   : > { %851 = vperm.xlu1 %1107, %v1128_v19  }
 0x54b   : > { %v681_v23 = vadd.f32 %v679_v22, %v676_v34 }
 0x54d   : > { %683 = vst.msk [vmem:[#allocation4] sm:$0xff] %vm682_vm10, %v681_v23 }
 0x554   : > { %v809_v25 = vld [vmem:[#allocation4] sm:$0xff] }
 0x555   : > { %v815_v26 = vmul.f32 %v813_v24, %v809_v25 }
 0x557   : > { %v820_v54 = vadd.f32 %v818_v27, %v815_v26 }
 0x559   : > { %822 = vst.msk [vmem:[#allocation4] sm:$0xff] %vm821_vm11, %v820_v54 }
 0x560   : > { %v859_v30 = vld [vmem:[#allocation4] sm:$0xff] }
 0x5bb   : > { %v840_v28 = vpop.permute.xlu1 %839  ;;  %v844_v13 = vpop.permute.xlu0 %843 }
 0x5bc   : > { %v854_v61 = vsel %vm274_vm1, %v840_v28, %v844_v13 }
 0x5c0   : > { %v848_v29 = vpop.permute.xlu1 %847 }
 0x5c1   : > { %v856_v15 = vsel %vm855_vm12, %v854_v61, %v848_v29 }
 0x5c5   : > { %v852_v16 = vpop.permute.xlu1 %851 }
 0x5c6   : > { %v858_v31 = vsel %vm857_vm13, %v856_v15, %v852_v16 }
 0x5c7   : > { %v860_v32 = vmul.f32 %v859_v30, %v858_v31 }
 0x5c9   : > { %v861_v33 = vpack.c.bf16 %v860_v32, %v860_v32 }
 0x5cb   : > { %863 = vst.msk [vmem:[%s259_s10] sm:$0xf] %vm862_vm14, %v861_v33 }
 0x5cc PF: > { %s13_s14 = sadd.s32 1, %s1151_s14   ;;  %s1373_s12 = smov %s1147_s13 }
 0x5cd   : > { %p10_p5 = scmp.ge.s32.totalorder %s13_s14, 4   ;;  %s1374_s13 = smov %s1376_s15 }
 0x5cf   :  { %12 = sbr.rel (!%p10_p5) target bundleno = 2 (0x2), region = 76 }

// kernel: unet_t_forward.27
= control target key start
LH: loop header
LB: loop body
LE: loop exit
PB: predicated region body
PF: predicated region fallthrough
CT: control target
= control target key end

     0   :  { %vm22_vm0 = vcmask 261120   ;;  %v238_v0 = vmov 0.0   ;;  %vm239_vm1 = vmmov 0   ;;  %vm173_vm2 = vcmask 257024   ;;  %s308_s1 = inlined_call_operand.vmem [shape: bf16[128,32], index: 1, kind: input, shape index: {}]   ;;  %s309_s0 = inlined_call_operand.vmem [shape: bf16[16,128], index: 0, kind: input, shape index: {}]   ;;  %s310_s3 = inlined_call_operand.vmem [shape: bf16[16,32], index: 3, kind: input, shape index: {}]   ;;  %s311_s2 = inlined_call_operand.vmem [shape: f32[1,32], index: 2, kind: input, shape index: {}]   ;;  %s312_s4 = inlined_call_operand.vmem [shape: bf16[16,32], index: 4, kind: output, shape index: {}]  }
   0x1   :  { %207 = vmatprep.subr.bf16.mxu0 %v238_v0  ;;  %v229_v1 = vld [vmem:[%s308_s1 + $0x38] sm:$0xff]   ;;  %223 = vmatprep.mubr.msk.bf16.mxu0 %vm239_vm1, %v238_v0  ;;  %23 = vst.msk [vmem:[#allocation2] sm:$0xff] %vm22_vm0, %v238_v0  ;;  %24 = vst.msk [vmem:[#allocation2 + $0x8] sm:$0xff] %vm22_vm0, %v238_v0  ;;  %v230_v2 = vld [vmem:[%s308_s1 + $0x30] sm:$0xff]  }
   0x2   :  { %208 = vmatpush3.bf16.msra.mxu0 %v229_v1  ;;  %v231_v3 = vld [vmem:[%s308_s1 + $0x28] sm:$0xff]   ;;  %v232_v4 = vld [vmem:[%s308_s1 + $0x20] sm:$0xff]   ;;  %v233_v5 = vld [vmem:[%s308_s1 + $0x18] sm:$0xff]  }
   0x3   :  { %209 = vmatprep.subr.bf16.mxu0 %v238_v0  ;;  %v234_v6 = vld [vmem:[%s308_s1 + $0x10] sm:$0xff]   ;;  %v235_v7 = vld [vmem:[%s308_s1 + $0x8] sm:$0xff]   ;;  %v236_v8 = vld [vmem:[%s308_s1] sm:$0xff]  }
   0x4   :  { %v237_v9 = vld [vmem:[%s309_s0] sm:$0xff]  }
   0x5   :  { %v195_v17 = vld [vmem:[%s310_s3] sm:$0xff]  }
   0x6   :  { %210 = vmatpush3.bf16.msra.mxu0 %v230_v2  ;;  %v189_v19 = vld [vmem:[%s311_s2] ss:$0 sm:$0xff]  ;;  %v196_v20 = vunpack.c.l.bf16 %v195_v17  ;;  %v197_v24 = vunpack.c.h.bf16 %v195_v17 }
   0x7   :  { %211 = vmatprep.subr.bf16.mxu0 %v238_v0 }
   0x8   :  { %v41_v10 = vld [vmem:[#allocation2] sm:$0xff]  ;;  %v42_v14 = vld [vmem:[#allocation2 + $0x8] sm:$0xff] }
   0xa   :  { %212 = vmatpush3.bf16.msra.mxu0 %v231_v3 }
   0xb   :  { %213 = vmatprep.subr.bf16.mxu0 %v238_v0 }
   0xe   :  { %214 = vmatpush3.bf16.msra.mxu0 %v232_v4 }
   0xf   :  { %215 = vmatprep.subr.bf16.mxu0 %v238_v0 }
  0x12   :  { %216 = vmatpush3.bf16.msra.mxu0 %v233_v5 }
  0x13   :  { %217 = vmatprep.subr.bf16.mxu0 %v238_v0 }
  0x16   :  { %218 = vmatpush3.bf16.msra.mxu0 %v234_v6 }
  0x17   :  { %219 = vmatprep.subr.bf16.mxu0 %v238_v0 }
  0x1a   :  { %220 = vmatpush3.bf16.msra.mxu0 %v235_v7 }
  0x1b   :  { %221 = vmatprep.subr.bf16.mxu0 %v238_v0 }
  0x1e   :  { %222 = vmatpush3.bf16.msra.mxu0 %v236_v8 }
  0x21   :  { %224 = vmatmul.mubr.bf16.vlgmr.msra.gmra.mxu0 %v237_v9 }
  0xe1   :  { %v133_v11 = vpop.f32.mrf.mxu0 }
  0xe2   :  { %v140_v12 = vadd.f32 %v133_v11, %v41_v10 }
  0xe3   :  { %v225_v13 = vpop.f32.mrf.mxu0 }
  0xe4   :  { %143 = vst.msk [vmem:[#allocation2] sm:$0xff] %vm22_vm0, %v140_v12 }
  0xe5   :  { %v136_v15 = vpop.f32.mrf.mxu0 }
  0xe6   :  { %v141_v16 = vadd.f32 %v136_v15, %v42_v14 }
  0xe7   :  { %v226_v18 = vpop.f32.mrf.mxu0 }
  0xe8   :  { %144 = vst.msk [vmem:[#allocation2 + $0x8] sm:$0xff] %vm22_vm0, %v141_v16 }
  0xeb   :  { %v148_v21 = vld [vmem:[#allocation2] sm:$0xff] }
  0xec   :  { %v157_v22 = vadd.f32 %v189_v19, %v148_v21 }
  0xee   :  { %v163_v23 = vadd.f32 %v196_v20, %v157_v22 }
  0xef   :  { %v149_v25 = vld [vmem:[#allocation2 + $0x8] sm:$0xff] }
  0xf0   :  { %v192_v26 = vpack.c.bf16 %v163_v23, %v163_v23  ;;  %v158_v27 = vadd.f32 %v189_v19, %v149_v25 }
  0xf2   :  { %174 = vst.msk [vmem:[%s312_s4] sm:$0xf] %vm173_vm2, %v192_v26  ;;  %v164_v28 = vadd.f32 %v197_v24, %v158_v27 }
  0xf4   :  { %v193_v29 = vpack.c.bf16 %v164_v28, %v164_v28 }
  0xf6   :  { %175 = vst.msk [vmem:[%s312_s4 + $0x4] sm:$0xf] %vm173_vm2, %v193_v29 }

// kernel: unet_t_forward.30
= control target key start
LH: loop header
LB: loop body
LE: loop exit
PB: predicated region body
PF: predicated region fallthrough
CT: control target
= control target key end

     0   :  { %vm22_vm0 = vcmask 261120   ;;  %v163_v0 = vmov 0.0   ;;  %vm164_vm1 = vmmov 0   ;;  %vm127_vm2 = vcmask 257024   ;;  %s216_s1 = inlined_call_operand.vmem [shape: bf16[32,32], index: 1, kind: input, shape index: {}]   ;;  %s217_s0 = inlined_call_operand.vmem [shape: bf16[16,32], index: 0, kind: input, shape index: {}]   ;;  %s218_s3 = inlined_call_operand.vmem [shape: bf16[16,32], index: 3, kind: input, shape index: {}]   ;;  %s219_s2 = inlined_call_operand.vmem [shape: f32[1,32], index: 2, kind: input, shape index: {}]   ;;  %s220_s4 = inlined_call_operand.vmem [shape: bf16[16,32], index: 4, kind: output, shape index: {}]  }
   0x1   :  { %150 = vmatprep.subr.bf16.mxu0 %v163_v0  ;;  %v160_v1 = vld [vmem:[%s216_s1 + $0x8] sm:$0xff]   ;;  %154 = vmatprep.mubr.msk.bf16.mxu0 %vm164_vm1, %v163_v0  ;;  %23 = vst.msk [vmem:[#allocation2] sm:$0xff] %vm22_vm0, %v163_v0  ;;  %24 = vst.msk [vmem:[#allocation2 + $0x8] sm:$0xff] %vm22_vm0, %v163_v0  ;;  %v161_v2 = vld [vmem:[%s216_s1] sm:$0xff]  }
   0x2   :  { %151 = vmatpush3.bf16.msra.mxu0 %v160_v1  ;;  %v162_v3 = vld [vmem:[%s217_s0] sm:$0xff]  }
   0x3   :  { %152 = vmatprep.subr.bf16.mxu0 %v163_v0  ;;  %v144_v11 = vld [vmem:[%s218_s3] sm:$0xff]  }
   0x4   :  { %v138_v13 = vld [vmem:[%s219_s2] ss:$0 sm:$0xff]  ;;  %v145_v14 = vunpack.c.l.bf16 %v144_v11  ;;  %v146_v18 = vunpack.c.h.bf16 %v144_v11 }
   0x6   :  { %153 = vmatpush3.bf16.msra.mxu0 %v161_v2 }
   0x8   :  { %v29_v4 = vld [vmem:[#allocation2] sm:$0xff]  ;;  %v30_v8 = vld [vmem:[#allocation2 + $0x8] sm:$0xff] }
   0x9   :  { %155 = vmatmul.mubr.msk.bf16.vlgmr.msra.gmra.mxu0 %vm22_vm0, %v162_v3 }
  0xc9   :  { %v88_v5 = vpop.f32.mrf.mxu0 }
  0xca   :  { %v95_v6 = vadd.f32 %v88_v5, %v29_v4 }
  0xcb   :  { %v156_v7 = vpop.f32.mrf.mxu0 }
  0xcc   :  { %97 = vst.msk [vmem:[#allocation2] sm:$0xff] %vm22_vm0, %v95_v6 }
  0xcd   :  { %v91_v9 = vpop.f32.mrf.mxu0 }
  0xce   :  { %v96_v10 = vadd.f32 %v91_v9, %v30_v8 }
  0xcf   :  { %v157_v12 = vpop.f32.mrf.mxu0 }
  0xd0   :  { %98 = vst.msk [vmem:[#allocation2 + $0x8] sm:$0xff] %vm22_vm0, %v96_v10 }
  0xd3   :  { %v102_v15 = vld [vmem:[#allocation2] sm:$0xff] }
  0xd4   :  { %v111_v16 = vadd.f32 %v138_v13, %v102_v15 }
  0xd6   :  { %v117_v17 = vadd.f32 %v145_v14, %v111_v16 }
  0xd7   :  { %v103_v19 = vld [vmem:[#allocation2 + $0x8] sm:$0xff] }
  0xd8   :  { %v141_v20 = vpack.c.bf16 %v117_v17, %v117_v17  ;;  %v112_v21 = vadd.f32 %v138_v13, %v103_v19 }
  0xda   :  { %128 = vst.msk [vmem:[%s220_s4] sm:$0xf] %vm127_vm2, %v141_v20  ;;  %v118_v22 = vadd.f32 %v146_v18, %v112_v21 }
  0xdc   :  { %v142_v23 = vpack.c.bf16 %v118_v22, %v118_v22 }
  0xde   :  { %129 = vst.msk [vmem:[%s220_s4 + $0x4] sm:$0xf] %vm127_vm2, %v142_v23 }

// kernel: unet_t_forward.28
= control target key start
LH: loop header
LB: loop body
LE: loop exit
PB: predicated region body
PF: predicated region fallthrough
CT: control target
= control target key end

     0   :  { %vm44_vm0 = vcmask 261120   ;;  %v428_v16 = vmov 0.0   ;;  %vm429_vm1 = vmmov 0   ;;  %vm98_vm2 = vcmask 257024   ;;  %s562_s0 = inlined_call_operand.vmem [shape: bf16[16,32], index: 0, kind: input, shape index: {}]   ;;  %s563_s3 = inlined_call_operand.vmem [shape: bf16[32,32], index: 3, kind: input, shape index: {}]   ;;  %s564_s4 = inlined_call_operand.vmem [shape: bf16[32,32], index: 4, kind: input, shape index: {}]   ;;  %s565_s5 = inlined_call_operand.vmem [shape: bf16[32,32], index: 5, kind: input, shape index: {}]   ;;  %s566_s1 = inlined_call_operand.vmem [shape: f32[1,32], index: 1, kind: input, shape index: {}]   ;;  %s567_s2 = inlined_call_operand.vmem [shape: f32[1,32], index: 2, kind: input, shape index: {}]   ;;  %s568_s6 = inlined_call_operand.vmem [shape: f32[1,32], index: 6, kind: input, shape index: {}]   ;;  %s569_s7 = inlined_call_operand.vmem [shape: f32[1,32], index: 7, kind: input, shape index: {}]   ;;  %s570_s9 = inlined_call_operand.vmem [shape: bf16[16,32], index: 9, kind: output, shape index: {0}]   ;;  %s571_s10 = inlined_call_operand.vmem [shape: bf16[16,32], index: 10, kind: output, shape index: {1}]   ;;  %s572_s8 = inlined_call_operand.vmem [shape: f32[1,32], index: 8, kind: input, shape index: {}]   ;;  %s573_s11 = inlined_call_operand.vmem [shape: bf16[16,32], index: 11, kind: output, shape index: {2}]  }
   0x1   :  { %v379_v0 = vld [vmem:[%s562_s0] sm:$0xff]   ;;  %v417_v15 = vld [vmem:[%s563_s3 + $0x8] sm:$0xff]   ;;  %391 = vmatprep.subr.bf16.mxu0 %v428_v16  ;;  %399 = vmatprep.subr.bf16.mxu1 %v428_v16 }
   0x2   :  { %v380_v1 = vunpack.c.l.bf16 %v379_v0  ;;  %v381_v2 = vunpack.c.h.bf16 %v379_v0  ;;  %v418_v17 = vld [vmem:[%s564_s4 + $0x8] sm:$0xff]   ;;  %392 = vmatpush3.bf16.msra.mxu0 %v417_v15  ;;  %v419_v18 = vld [vmem:[%s563_s3] sm:$0xff]   ;;  %395 = vmatprep.mubr.msk.bf16.mxu0 %vm429_vm1, %v428_v16 }
   0x3   :  { %400 = vmatpush3.bf16.msra.mxu1 %v418_v17  ;;  %393 = vmatprep.subr.bf16.mxu0 %v428_v16  ;;  %v420_v19 = vld [vmem:[%s564_s4] sm:$0xff]   ;;  %v422_v38 = vld [vmem:[%s565_s5 + $0x8] sm:$0xff]  }
   0x4   :  { %v45_v3 = vsel %vm44_vm0, %v380_v1, 0.0  ;;  %v48_v4 = vsel %vm44_vm0, %v381_v2, 0.0  ;;  %401 = vmatprep.subr.bf16.mxu1 %v428_v16  ;;  %403 = vmatprep.mubr.msk.bf16.mxu1 %vm429_vm1, %v428_v16  ;;  %v347_v27 = vld [vmem:[%s566_s1] ss:$0 sm:$0xff] }
   0x5   :  { %46 = vadd.xlane.f32.xlu0 %v45_v3  ;;  %v348_v29 = vld [vmem:[%s567_s2] ss:$0 sm:$0xff] }
   0x6   :  { %394 = vmatpush3.bf16.msra.mxu0 %v419_v18  ;;  %v423_v40 = vld [vmem:[%s565_s5] sm:$0xff]  }
   0x7   :  { %402 = vmatpush3.bf16.msra.mxu1 %v420_v19  ;;  %407 = vmatprep.subr.bf16.mxu0 %v428_v16  ;;  %v351_v41 = vld [vmem:[%s568_s6] ss:$0 sm:$0xff] }
   0x8   :  { %v358_v42 = vld [vmem:[%s569_s7] ss:$0 sm:$0xff] }
   0x9   :  { %49 = vadd.xlane.f32.xlu0 %v48_v4  ;;  %v364_v57 = vld [vmem:[%s572_s8] ss:$0 sm:$0xff] }
  0x8e   :  { %v47_v5 = vpop.xlane.xlu0 %46 }
  0x8f   :  { %v52_v6 = vmul.f32 0.03125, %v47_v5 }
  0x91   :  { %v54_v7 = vsub.f32 %v380_v1, %v52_v6 }
  0x92   :  { %v50_v8 = vpop.xlane.xlu0 %49 }
  0x93   :  { %v53_v9 = vmul.f32 0.03125, %v50_v8  ;;  %v56_v10 = vmul.f32 %v54_v7, %v54_v7 }
  0x95   :  { %v55_v11 = vsub.f32 %v381_v2, %v53_v9  ;;  %v58_v12 = vsel %vm44_vm0, %v56_v10, 0.0 }
  0x96   :  { %59 = vadd.xlane.f32.xlu1 %v58_v12 }
  0x97   :  { %v57_v13 = vmul.f32 %v55_v11, %v55_v11 }
  0x99   :  { %v61_v14 = vsel %vm44_vm0, %v57_v13, 0.0 }
  0x9a   :  { %62 = vadd.xlane.f32.xlu1 %v61_v14 }
 0x11f   :  { %v60_v20 = vpop.xlane.xlu1 %59 }
 0x120   :  { %v64_v21 = vmul.f32 0.03125, %v60_v20 }
 0x122   :  { %v66_v22 = vadd.f32 1e-05, %v64_v21 }
 0x123   :  { %v63_v23 = vpop.xlane.xlu1 %62 }
 0x124   :  { %424 = vrsqrt.f32 %v66_v22  ;;  %v65_v24 = vmul.f32 0.03125, %v63_v23 }
 0x126   :  { %v67_v25 = vadd.f32 1e-05, %v65_v24 }
 0x128   :  { %426 = vrsqrt.f32 %v67_v25 }
 0x131   :  { %v425_v26 = vpop.eup %424 }
 0x132   :  { %v70_v28 = vmul.f32 %v425_v26, %v54_v7 }
 0x134   :  { %v79_v30 = vmul.f32 %v347_v27, %v70_v28 }
 0x135   :  { %v427_v31 = vpop.eup %426 }
 0x136   :  { %v88_v32 = vadd.f32 %v348_v29, %v79_v30  ;;  %v71_v33 = vmul.f32 %v427_v31, %v55_v11 }
 0x138   :  { %v370_v34 = vpack.c.bf16 %v88_v32, %v88_v32  ;;  %v80_v35 = vmul.f32 %v347_v27, %v71_v33 }
 0x13a   :  { %99 = vst.msk [vmem:[#allocation2] sm:$0xf] %vm98_vm2, %v370_v34  ;;  %v89_v36 = vadd.f32 %v348_v29, %v80_v35 }
 0x13c   :  { %v371_v37 = vpack.c.bf16 %v89_v36, %v89_v36 }
 0x13e   :  { %100 = vst.msk [vmem:[#allocation2 + $0x4] sm:$0xf] %vm98_vm2, %v371_v37 }
 0x145   :  { %v421_v39 = vld [vmem:[#allocation2] sm:$0xff]  }
 0x146   :  { %396 = vmatmul.mubr.msk.bf16.vlgmr.msra.gmra.mxu0 %vm44_vm0, %v421_v39  ;;  %404 = vmatmul.mubr.msk.bf16.vlgmr.msra.gmra.mxu1 %vm44_vm0, %v421_v39 }
 0x147   :  { %408 = vmatpush3.bf16.msra.mxu0 %v422_v38  ;;  %411 = vmatprep.mubr.msk.bf16.mxu0 %vm429_vm1, %v428_v16 }
 0x148   :  { %409 = vmatprep.subr.bf16.mxu0 %v428_v16 }
 0x14b   :  { %410 = vmatpush3.bf16.msra.mxu0 %v423_v40 }
 0x14e   :  { %412 = vmatmul.mubr.msk.bf16.vlgmr.msra.gmra.mxu0 %vm44_vm0, %v421_v39 }
 0x206   :  { %v169_v43 = vpop.f32.mrf.mxu0  ;;  %v244_v44 = vpop.f32.mrf.mxu1 }
 0x207   :  { %v170_v45 = vadd.f32 %v351_v41, %v169_v43  ;;  %v245_v46 = vadd.f32 %v358_v42, %v244_v44 }
 0x208   :  { %v397_v47 = vpop.f32.mrf.mxu0  ;;  %v405_v48 = vpop.f32.mrf.mxu1 }
 0x209   :  { %v372_v49 = vpack.c.bf16 %v170_v45, %v170_v45  ;;  %v374_v50 = vpack.c.bf16 %v245_v46, %v245_v46 }
 0x20a   :  { %v172_v51 = vpop.f32.mrf.mxu0  ;;  %v247_v52 = vpop.f32.mrf.mxu1 }
 0x20b   :  { %185 = vst.msk [vmem:[%s570_s9] sm:$0xf] %vm98_vm2, %v372_v49  ;;  %259 = vst.msk [vmem:[%s571_s10] sm:$0xf] %vm98_vm2, %v374_v50  ;;  %v173_v53 = vadd.f32 %v351_v41, %v172_v51  ;;  %v248_v54 = vadd.f32 %v358_v42, %v247_v52 }
 0x20c   :  { %v398_v55 = vpop.f32.mrf.mxu0  ;;  %v406_v56 = vpop.f32.mrf.mxu1 }
 0x20d   :  { %v373_v58 = vpack.c.bf16 %v173_v53, %v173_v53  ;;  %v375_v59 = vpack.c.bf16 %v248_v54, %v248_v54 }
 0x20e   :  { %v318_v60 = vpop.f32.mrf.mxu0 }
 0x20f   :  { %186 = vst.msk [vmem:[%s570_s9 + $0x4] sm:$0xf] %vm98_vm2, %v373_v58  ;;  %260 = vst.msk [vmem:[%s571_s10 + $0x4] sm:$0xf] %vm98_vm2, %v375_v59  ;;  %v319_v61 = vadd.f32 %v364_v57, %v318_v60 }
 0x210   :  { %v413_v62 = vpop.f32.mrf.mxu0 }
 0x211   :  { %v376_v63 = vpack.c.bf16 %v319_v61, %v319_v61 }
 0x212   :  { %v321_v0 = vpop.f32.mrf.mxu0 }
 0x213   :  { %333 = vst.msk [vmem:[%s573_s11] sm:$0xf] %vm98_vm2, %v376_v63  ;;  %v322_v1 = vadd.f32 %v364_v57, %v321_v0 }
 0x214   :  { %v414_v2 = vpop.f32.mrf.mxu0 }
 0x215   :  { %v377_v3 = vpack.c.bf16 %v322_v1, %v322_v1 }
 0x217   :  { %334 = vst.msk [vmem:[%s573_s11 + $0x4] sm:$0xf] %vm98_vm2, %v377_v3 }

// kernel: unet_t_forward.33
= control target key start
LH: loop header
LB: loop body
LE: loop exit
PB: predicated region body
PF: predicated region fallthrough
CT: control target
= control target key end

     0   :  { %vm57_vm0 = vcmask 261120   ;;  %v585_v30 = vmov 0.0   ;;  %vm586_vm1 = vmmov 0   ;;  %vm131_vm2 = vcmask 257024   ;;  %s791_s1 = inlined_call_operand.vmem [shape: bf16[16,32], index: 1, kind: input, shape index: {}, may-alias: {0,1}]   ;;  %s792_s0 = inlined_call_operand.vmem [shape: bf16[16,32], index: 0, kind: input, shape index: {}, may-alias: {0,1}]   ;;  %s793_s6 = inlined_call_operand.vmem [shape: bf16[64,64], index: 6, kind: input, shape index: {}]   ;;  %s794_s7 = inlined_call_operand.vmem [shape: bf16[64,64], index: 7, kind: input, shape index: {}]   ;;  %s795_s3 = inlined_call_operand.vmem [shape: f32[1,32], index: 3, kind: input, shape index: {}]   ;;  %s796_s2 = inlined_call_operand.vmem [shape: f32[1,32], index: 2, kind: input, shape index: {}]   ;;  %s797_s5 = inlined_call_operand.vmem [shape: f32[1,32], index: 5, kind: input, shape index: {}]   ;;  %s798_s4 = inlined_call_operand.vmem [shape: f32[1,32], index: 4, kind: input, shape index: {}]   ;;  %s799_s8 = inlined_call_operand.vmem [shape: bf16[64,64], index: 8, kind: input, shape index: {}]   ;;  %s800_s9 = inlined_call_operand.vmem [shape: f32[1,64], index: 9, kind: input, shape index: {}]   ;;  %s801_s10 = inlined_call_operand.vmem [shape: f32[1,64], index: 10, kind: input, shape index: {}]   ;;  %s802_s12 = inlined_call_operand.vmem [shape: bf16[16,64], index: 12, kind: output, shape index: {0}]   ;;  %s803_s13 = inlined_call_operand.vmem [shape: bf16[16,64], index: 13, kind: output, shape index: {1}]   ;;  %s804_s11 = inlined_call_operand.vmem [shape: f32[1,64], index: 11, kind: input, shape index: {}]   ;;  %s805_s14 = inlined_call_operand.vmem [shape: bf16[16,64], index: 14, kind: output, shape index: {2}]  }
   0x1   :  { %v511_v0 = vld [vmem:[%s791_s1] sm:$0xff]   ;;  %529 = vmatprep.subr.bf16.mxu0 %v585_v30  ;;  %v568_v31 = vld [vmem:[%s793_s6 + $0x18] sm:$0xff]   ;;  %541 = vmatprep.subr.bf16.mxu1 %v585_v30  ;;  %v570_v43 = vld [vmem:[%s793_s6 + $0x10] sm:$0xff]   ;;  %vm166_vm3 = vcmask 519424   ;;  %vm215_vm4 = vcmask 523264   ;;  %vm268_vm5 = vcmask 519168  }
   0x2   :  { %v507_v1 = vld [vmem:[%s792_s0] sm:$0xff]   ;;  %v512_v2 = vunpack.c.l.bf16 %v511_v0  ;;  %v513_v4 = vunpack.c.h.bf16 %v511_v0  ;;  %v569_v32 = vld [vmem:[%s794_s7 + $0x18] sm:$0xff]   ;;  %530 = vmatpush3.bf16.msra.mxu0 %v568_v31  ;;  %v571_v44 = vld [vmem:[%s794_s7 + $0x10] sm:$0xff]   ;;  %537 = vmatprep.mubr.msk.bf16.mxu0 %vm586_vm1, %v585_v30 }
   0x3   :  { %v508_v3 = vunpack.c.l.bf16 %v507_v1  ;;  %v509_v5 = vunpack.c.h.bf16 %v507_v1  ;;  %542 = vmatpush3.bf16.msra.mxu1 %v569_v32  ;;  %531 = vmatprep.subr.bf16.mxu0 %v585_v30  ;;  %v572_v45 = vld [vmem:[%s793_s6 + $0x8] sm:$0xff]   ;;  %v467_v47 = vld [vmem:[%s795_s3] ss:$0 sm:$0xff] }
   0x4   :  { %v64_v6 = vsel %vm57_vm0, %v512_v2, 0.0  ;;  %v67_v8 = vsel %vm57_vm0, %v513_v4, 0.0  ;;  %543 = vmatprep.subr.bf16.mxu1 %v585_v30  ;;  %v463_v48 = vld [vmem:[%s796_s2] ss:$0 sm:$0xff]  ;;  %v573_v49 = vld [vmem:[%s794_s7 + $0x8] sm:$0xff]   ;;  %549 = vmatprep.mubr.msk.bf16.mxu1 %vm586_vm1, %v585_v30 }
   0x5   :  { %v58_v7 = vsel %vm57_vm0, %v508_v3, 0.0  ;;  %65 = vadd.xlane.f32.xlu1 %v64_v6  ;;  %v61_v9 = vsel %vm57_vm0, %v509_v5, 0.0  ;;  %v574_v52 = vld [vmem:[%s793_s6] sm:$0xff]  }
   0x6   :  { %59 = vadd.xlane.f32.xlu0 %v58_v7  ;;  %532 = vmatpush3.bf16.msra.mxu0 %v570_v43  ;;  %v468_v53 = vld [vmem:[%s797_s5] ss:$0 sm:$0xff] }
   0x7   :  { %544 = vmatpush3.bf16.msra.mxu1 %v571_v44  ;;  %533 = vmatprep.subr.bf16.mxu0 %v585_v30  ;;  %v464_v54 = vld [vmem:[%s798_s4] ss:$0 sm:$0xff]  ;;  %s587_s4 = smov 32  }
   0x8   :  { %545 = vmatprep.subr.bf16.mxu1 %v585_v30  ;;  %v575_v55 = vld [vmem:[%s794_s7] sm:$0xff]  }
   0x9   :  { %68 = vadd.xlane.f32.xlu1 %v67_v8  ;;  %v488_v32 = vld [vmem:[%s804_s11] ss:$0 sm:$0xff] }
   0xa   :  { %62 = vadd.xlane.f32.xlu0 %v61_v9  ;;  %534 = vmatpush3.bf16.msra.mxu0 %v572_v45  ;;  %v577_v9 = vld [vmem:[%s799_s8 + $0x18] sm:$0xff]  }
   0xb   :  { %546 = vmatpush3.bf16.msra.mxu1 %v573_v49  ;;  %535 = vmatprep.subr.bf16.mxu0 %v585_v30 }
   0xc   :  { %547 = vmatprep.subr.bf16.mxu1 %v585_v30 }
   0xe   :  { %536 = vmatpush3.bf16.msra.mxu0 %v574_v52 }
   0xf   :  { %548 = vmatpush3.bf16.msra.mxu1 %v575_v55  ;;  %553 = vmatprep.subr.bf16.mxu0 %v585_v30 }
  0x8e   :  { %v66_v10 = vpop.xlane.xlu1 %65 }
  0x8f   :  { %v60_v11 = vpop.xlane.xlu0 %59 }
  0x90   :  { %v70_v12 = vadd.f32 %v66_v10, %v60_v11  ;;  %v578_v11 = vld [vmem:[%s799_s8 + $0x10] sm:$0xff]  }
  0x92   :  { %v73_v13 = vmul.f32 0.015625, %v70_v12  ;;  %v69_v14 = vpop.xlane.xlu1 %68  ;;  %v579_v12 = vld [vmem:[%s799_s8 + $0x8] sm:$0xff]  }
  0x93   :  { %v63_v15 = vpop.xlane.xlu0 %62 }
  0x94   :  { %v75_v16 = vsub.f32 %v508_v3, %v73_v13  ;;  %v85_v17 = vsub.f32 %v512_v2, %v73_v13  ;;  %v71_v18 = vadd.f32 %v69_v14, %v63_v15  ;;  %v580_v13 = vld [vmem:[%s799_s8] sm:$0xff]  }
  0x95   :  { %v471_v14 = vld [vmem:[%s800_s9] ss:$0 sm:$0xff] }
  0x96   :  { %v74_v19 = vmul.f32 0.015625, %v71_v18  ;;  %v77_v20 = vmul.f32 %v75_v16, %v75_v16  ;;  %v87_v24 = vmul.f32 %v85_v17, %v85_v17  ;;  %v480_v15 = vld [vmem:[%s801_s10] ss:$0 sm:$0xff] }
  0x98   :  { %v673_v21 = vsub.f32 %v509_v5, %v74_v19  ;;  %v675_v22 = vsub.f32 %v513_v4, %v74_v19  ;;  %v79_v23 = vsel %vm57_vm0, %v77_v20, 0.0  ;;  %v89_v26 = vsel %vm57_vm0, %v87_v24, 0.0 }
  0x99   :  { %80 = vadd.xlane.f32.xlu0 %v79_v23 }
  0x9a   :  { %v78_v25 = vmul.f32 %v673_v21, %v673_v21  ;;  %v88_v28 = vmul.f32 %v675_v22, %v675_v22 }
  0x9c   :  { %v82_v27 = vsel %vm57_vm0, %v78_v25, 0.0  ;;  %v92_v29 = vsel %vm57_vm0, %v88_v28, 0.0 }
  0x9d   :  { %90 = vadd.xlane.f32.xlu0 %v89_v26  ;;  %83 = vadd.xlane.f32.xlu1 %v82_v27 }
  0xa1   :  { %93 = vadd.xlane.f32.xlu1 %v92_v29 }
 0x122   :  { %v81_v33 = vpop.xlane.xlu0 %80 }
 0x126   :  { %v84_v34 = vpop.xlane.xlu1 %83  ;;  %v91_v35 = vpop.xlane.xlu0 %90 }
 0x127   :  { %v95_v36 = vadd.f32 %v91_v35, %v81_v33 }
 0x129   :  { %v97_v37 = vmul.f32 0.015625, %v95_v36 }
 0x12a   :  { %v94_v38 = vpop.xlane.xlu1 %93 }
 0x12b   :  { %v99_v39 = vadd.f32 1e-05, %v97_v37  ;;  %v96_v40 = vadd.f32 %v94_v38, %v84_v34 }
 0x12d   :  { %581 = vrsqrt.f32 %v99_v39  ;;  %v98_v41 = vmul.f32 0.015625, %v96_v40 }
 0x12f   :  { %v100_v42 = vadd.f32 1e-05, %v98_v41 }
 0x131   :  { %583 = vrsqrt.f32 %v100_v42 }
 0x13a   :  { %v582_v46 = vpop.eup %581 }
 0x13b   :  { %v134_v50 = vmul.f32 %v582_v46, %v85_v17  ;;  %v103_v51 = vmul.f32 %v582_v46, %v75_v16 }
 0x13d   :  { %v143_v56 = vmul.f32 %v467_v47, %v134_v50  ;;  %v112_v57 = vmul.f32 %v463_v48, %v103_v51 }
 0x13e   :  { %v584_v58 = vpop.eup %583 }
 0x13f   :  { %v152_v59 = vadd.f32 %v468_v53, %v143_v56  ;;  %v135_v60 = vmul.f32 %v584_v58, %v675_v22  ;;  %v121_v61 = vadd.f32 %v464_v54, %v112_v57  ;;  %v104_v62 = vmul.f32 %v584_v58, %v673_v21 }
 0x141   :  { %v498_v63 = vpack.c.bf16 %v152_v59, %v152_v59  ;;  %v144_v0 = vmul.f32 %v467_v47, %v135_v60  ;;  %v496_v1 = vpack.c.bf16 %v121_v61, %v121_v61  ;;  %v113_v2 = vmul.f32 %v463_v48, %v104_v62 }
 0x143   :  { %160 = vrot.lane.b32.xlu0 %v498_v63, %s587_s4  ;;  %v153_v3 = vadd.f32 %v468_v53, %v144_v0  ;;  %132 = vst.msk [vmem:[#allocation2] sm:$0xf] %vm131_vm2, %v496_v1  ;;  %v122_v4 = vadd.f32 %v464_v54, %v113_v2 }
 0x145   :  { %v499_v5 = vpack.c.bf16 %v153_v3, %v153_v3  ;;  %v497_v6 = vpack.c.bf16 %v122_v4, %v122_v4 }
 0x147   :  { %162 = vrot.lane.b32.xlu1 %v499_v5, %s587_s4  ;;  %133 = vst.msk [vmem:[#allocation2 + $0x4] sm:$0xf] %vm131_vm2, %v497_v6 }
 0x1b5   :  { %v161_v7 = vpop.permute.xlu0 %160 }
 0x1b6   :  { %167 = vst.msk [vmem:[#allocation2] sm:$0xf] %vm166_vm3, %v161_v7 }
 0x1b9   :  { %v163_v8 = vpop.permute.xlu1 %162 }
 0x1ba   :  { %168 = vst.msk [vmem:[#allocation2 + $0x4] sm:$0xf] %vm166_vm3, %v163_v8 }
 0x1c1   :  { %v576_v10 = vld [vmem:[#allocation2] sm:$0xff]  }
 0x1c2   :  { %538 = vmatmul.mubr.msk.bf16.vlgmr.msra.gmra.mxu0 %vm215_vm4, %v576_v10  ;;  %550 = vmatmul.mubr.msk.bf16.vlgmr.msra.gmra.mxu1 %vm215_vm4, %v576_v10 }
 0x1c3   :  { %554 = vmatpush3.bf16.msra.mxu0 %v577_v9  ;;  %561 = vmatprep.mubr.msk.bf16.mxu0 %vm586_vm1, %v585_v30 }
 0x1c4   :  { %555 = vmatprep.subr.bf16.mxu0 %v585_v30 }
 0x1c7   :  { %556 = vmatpush3.bf16.msra.mxu0 %v578_v11 }
 0x1c8   :  { %557 = vmatprep.subr.bf16.mxu0 %v585_v30 }
 0x1cb   :  { %558 = vmatpush3.bf16.msra.mxu0 %v579_v12 }
 0x1cc   :  { %559 = vmatprep.subr.bf16.mxu0 %v585_v30 }
 0x1cf   :  { %560 = vmatpush3.bf16.msra.mxu0 %v580_v13 }
 0x1d2   :  { %562 = vmatmul.mubr.msk.bf16.vlgmr.msra.gmra.mxu0 %vm215_vm4, %v576_v10 }
 0x282   :  { %v253_v16 = vpop.f32.mrf.mxu0  ;;  %v344_v17 = vpop.f32.mrf.mxu1 }
 0x283   :  { %v254_v18 = vadd.f32 %v471_v14, %v253_v16  ;;  %v345_v19 = vadd.f32 %v480_v15, %v344_v17 }
 0x284   :  { %v539_v20 = vpop.f32.mrf.mxu0  ;;  %v551_v21 = vpop.f32.mrf.mxu1 }
 0x285   :  { %v500_v22 = vpack.c.bf16 %v254_v18, %v254_v18  ;;  %v502_v23 = vpack.c.bf16 %v345_v19, %v345_v19 }
 0x286   :  { %v256_v24 = vpop.f32.mrf.mxu0  ;;  %v347_v25 = vpop.f32.mrf.mxu1 }
 0x287   :  { %269 = vst.msk [vmem:[%s802_s12] sm:$0xf] %vm268_vm5, %v500_v22  ;;  %359 = vst.msk [vmem:[%s803_s13] sm:$0xf] %vm268_vm5, %v502_v23  ;;  %v257_v26 = vadd.f32 %v471_v14, %v256_v24  ;;  %v348_v27 = vadd.f32 %v480_v15, %v347_v25 }
 0x288   :  { %v540_v28 = vpop.f32.mrf.mxu0  ;;  %v552_v29 = vpop.f32.mrf.mxu1 }
 0x289   :  { %v501_v30 = vpack.c.bf16 %v257_v26, %v257_v26  ;;  %v503_v31 = vpack.c.bf16 %v348_v27, %v348_v27 }
 0x28b   :  { %270 = vst.msk [vmem:[%s802_s12 + $0x4] sm:$0xf] %vm268_vm5, %v501_v30  ;;  %360 = vst.msk [vmem:[%s803_s13 + $0x4] sm:$0xf] %vm268_vm5, %v503_v31 }
 0x292   :  { %v434_v33 = vpop.f32.mrf.mxu0 }
 0x293   :  { %v435_v34 = vadd.f32 %v488_v32, %v434_v33 }
 0x294   :  { %v563_v35 = vpop.f32.mrf.mxu0 }
 0x295   :  { %v504_v36 = vpack.c.bf16 %v435_v34, %v435_v34 }
 0x296   :  { %v437_v37 = vpop.f32.mrf.mxu0 }
 0x297   :  { %449 = vst.msk [vmem:[%s805_s14] sm:$0xf] %vm268_vm5, %v504_v36  ;;  %v438_v38 = vadd.f32 %v488_v32, %v437_v37 }
 0x298   :  { %v564_v39 = vpop.f32.mrf.mxu0 }
 0x299   :  { %v505_v40 = vpack.c.bf16 %v438_v38, %v438_v38 }
 0x29b   :  { %450 = vst.msk [vmem:[%s805_s14 + $0x4] sm:$0xf] %vm268_vm5, %v505_v40 }

// kernel: unet_t_forward.36
= control target key start
LH: loop header
LB: loop body
LE: loop exit
PB: predicated region body
PF: predicated region fallthrough
CT: control target
= control target key end

     0   :  { %vm22_vm0 = vcmask 261120   ;;  %v190_v0 = vmov 0.0   ;;  %vm191_vm1 = vmmov 0   ;;  %vm66_vm2 = vcmask 523264   ;;  %s248_s1 = inlined_call_operand.vmem [shape: bf16[64,32], index: 1, kind: input, shape index: {}]   ;;  %s249_s0 = inlined_call_operand.vmem [shape: bf16[16,64], index: 0, kind: input, shape index: {}]   ;;  %s250_s3 = inlined_call_operand.vmem [shape: bf16[16,32], index: 3, kind: input, shape index: {}]   ;;  %s251_s2 = inlined_call_operand.vmem [shape: f32[1,32], index: 2, kind: input, shape index: {}]   ;;  %s252_s4 = inlined_call_operand.vmem [shape: bf16[16,32], index: 4, kind: output, shape index: {}]  }
   0x1   :  { %171 = vmatprep.subr.bf16.mxu0 %v190_v0  ;;  %v185_v1 = vld [vmem:[%s248_s1 + $0x18] sm:$0xff]   ;;  %179 = vmatprep.mubr.msk.bf16.mxu0 %vm191_vm1, %v190_v0  ;;  %23 = vst.msk [vmem:[#allocation2] sm:$0xff] %vm22_vm0, %v190_v0  ;;  %24 = vst.msk [vmem:[#allocation2 + $0x8] sm:$0xff] %vm22_vm0, %v190_v0  ;;  %v186_v2 = vld [vmem:[%s248_s1 + $0x10] sm:$0xff]   ;;  %vm144_vm3 = vcmask 257024  }
   0x2   :  { %172 = vmatpush3.bf16.msra.mxu0 %v185_v1  ;;  %v187_v3 = vld [vmem:[%s248_s1 + $0x8] sm:$0xff]   ;;  %v188_v4 = vld [vmem:[%s248_s1] sm:$0xff]  }
   0x3   :  { %173 = vmatprep.subr.bf16.mxu0 %v190_v0  ;;  %v189_v5 = vld [vmem:[%s249_s0] sm:$0xff]  }
   0x4   :  { %v163_v13 = vld [vmem:[%s250_s3] sm:$0xff]  }
   0x5   :  { %v157_v15 = vld [vmem:[%s251_s2] ss:$0 sm:$0xff]  ;;  %v164_v16 = vunpack.c.l.bf16 %v163_v13  ;;  %v165_v20 = vunpack.c.h.bf16 %v163_v13 }
   0x6   :  { %174 = vmatpush3.bf16.msra.mxu0 %v186_v2 }
   0x7   :  { %175 = vmatprep.subr.bf16.mxu0 %v190_v0 }
   0x8   :  { %v33_v6 = vld [vmem:[#allocation2] sm:$0xff]  ;;  %v34_v10 = vld [vmem:[#allocation2 + $0x8] sm:$0xff] }
   0xa   :  { %176 = vmatpush3.bf16.msra.mxu0 %v187_v3 }
   0xb   :  { %177 = vmatprep.subr.bf16.mxu0 %v190_v0 }
   0xe   :  { %178 = vmatpush3.bf16.msra.mxu0 %v188_v4 }
  0x11   :  { %180 = vmatmul.mubr.msk.bf16.vlgmr.msra.gmra.mxu0 %vm66_vm2, %v189_v5 }
  0xd1   :  { %v104_v7 = vpop.f32.mrf.mxu0 }
  0xd2   :  { %v111_v8 = vadd.f32 %v104_v7, %v33_v6 }
  0xd3   :  { %v181_v9 = vpop.f32.mrf.mxu0 }
  0xd4   :  { %114 = vst.msk [vmem:[#allocation2] sm:$0xff] %vm22_vm0, %v111_v8 }
  0xd5   :  { %v107_v11 = vpop.f32.mrf.mxu0 }
  0xd6   :  { %v112_v12 = vadd.f32 %v107_v11, %v34_v10 }
  0xd7   :  { %v182_v14 = vpop.f32.mrf.mxu0 }
  0xd8   :  { %115 = vst.msk [vmem:[#allocation2 + $0x8] sm:$0xff] %vm22_vm0, %v112_v12 }
  0xdb   :  { %v119_v17 = vld [vmem:[#allocation2] sm:$0xff] }
  0xdc   :  { %v128_v18 = vadd.f32 %v157_v15, %v119_v17 }
  0xde   :  { %v134_v19 = vadd.f32 %v164_v16, %v128_v18 }
  0xdf   :  { %v120_v21 = vld [vmem:[#allocation2 + $0x8] sm:$0xff] }
  0xe0   :  { %v160_v22 = vpack.c.bf16 %v134_v19, %v134_v19  ;;  %v129_v23 = vadd.f32 %v157_v15, %v120_v21 }
  0xe2   :  { %145 = vst.msk [vmem:[%s252_s4] sm:$0xf] %vm144_vm3, %v160_v22  ;;  %v135_v24 = vadd.f32 %v165_v20, %v129_v23 }
  0xe4   :  { %v161_v25 = vpack.c.bf16 %v135_v24, %v135_v24 }
  0xe6   :  { %146 = vst.msk [vmem:[%s252_s4 + $0x4] sm:$0xf] %vm144_vm3, %v161_v25 }

// kernel: unet_t_forward.37
= control target key start
LH: loop header
LB: loop body
LE: loop exit
PB: predicated region body
PF: predicated region fallthrough
CT: control target
= control target key end

     0   :  { %vm42_vm0 = vcmask 261120   ;;  %v460_v55 = vmov 0   ;;  %vm116_vm1 = vcmask 257024   ;;  %vm151_vm2 = vcmask 519424   ;;  %s599_s1 = inlined_call_operand.vmem [shape: bf16[16,32], index: 1, kind: input, shape index: {}]   ;;  %s600_s0 = inlined_call_operand.vmem [shape: bf16[16,32], index: 0, kind: input, shape index: {}]   ;;  %s601_s6 = inlined_call_operand.vmem [shape: bf16[64,256], index: 6, kind: input, shape index: {}]   ;;  %s602_s3 = inlined_call_operand.vmem [shape: f32[1,32], index: 3, kind: input, shape index: {}]   ;;  %s603_s2 = inlined_call_operand.vmem [shape: f32[1,32], index: 2, kind: input, shape index: {}]   ;;  %s604_s5 = inlined_call_operand.vmem [shape: f32[1,32], index: 5, kind: input, shape index: {}]   ;;  %s605_s4 = inlined_call_operand.vmem [shape: f32[1,32], index: 4, kind: input, shape index: {}]   ;;  %s606_s7 = inlined_call_operand.vmem [shape: f32[1,256], index: 7, kind: input, shape index: {}]   ;;  %s607_s8 = inlined_call_operand.vmem [shape: bf16[16,256], index: 8, kind: output, shape index: {}]  }
   0x1   :  { %v421_v0 = vld [vmem:[%s599_s1] sm:$0xff]   ;;  %v427_v30 = vld [vmem:[%s601_s6 + $0x34] ss:$8 sps:$4 sm:$0xff]   ;;  %v429_v31 = vld [vmem:[%s601_s6 + $0x30] ss:$8 sps:$4 sm:$0xff]   ;;  %257 = vmatprep.mubr.bf16.mxu0 %v460_v55  ;;  %vm221_vm3 = vcmask 523264  }
   0x2   :  { %v417_v1 = vld [vmem:[%s600_s0] sm:$0xff]   ;;  %v422_v2 = vunpack.c.l.bf16 %v421_v0  ;;  %v423_v4 = vunpack.c.h.bf16 %v421_v0  ;;  %233 = vmatprep.subr.bf16.mxu0 %v427_v30  ;;  %v433_v45 = vld [vmem:[%s601_s6 + $0x14] ss:$8 sps:$4 sm:$0xff]   ;;  %v435_v48 = vld [vmem:[%s601_s6 + $0x10] ss:$8 sps:$4 sm:$0xff]  }
   0x3   :  { %v418_v3 = vunpack.c.l.bf16 %v417_v1  ;;  %v419_v5 = vunpack.c.h.bf16 %v417_v1  ;;  %234 = vmatpush1.bf16.msra.mxu0 %v429_v31  ;;  %v430_v42 = vld [vmem:[%s601_s6 + $0x24] ss:$8 sps:$4 sm:$0xff]   ;;  %v432_v43 = vld [vmem:[%s601_s6 + $0x20] ss:$8 sps:$4 sm:$0xff]  }
   0x4   :  { %v49_v6 = vsel %vm42_vm0, %v422_v2, 0.0  ;;  %v52_v8 = vsel %vm42_vm0, %v423_v4, 0.0  ;;  %235 = vmatprep.subr.bf16.mxu0 %v430_v42  ;;  %v394_v44 = vld [vmem:[%s602_s3] ss:$0 sm:$0xff]  ;;  %v436_v49 = vld [vmem:[%s601_s6 + $0x4] ss:$8 sps:$4 sm:$0xff]  }
   0x5   :  { %v43_v7 = vsel %vm42_vm0, %v418_v3, 0.0  ;;  %50 = vadd.xlane.f32.xlu1 %v49_v6  ;;  %v46_v9 = vsel %vm42_vm0, %v419_v5, 0.0  ;;  %v390_v47 = vld [vmem:[%s603_s2] ss:$0 sm:$0xff] }
   0x6   :  { %44 = vadd.xlane.f32.xlu0 %v43_v7  ;;  %v395_v52 = vld [vmem:[%s604_s5] ss:$0 sm:$0xff] }
   0x7   :  { %236 = vmatpush1.bf16.msra.mxu0 %v432_v43  ;;  %v391_v53 = vld [vmem:[%s605_s4] ss:$0 sm:$0xff]  ;;  %s461_s4 = smov 32  }
   0x8   :  { %237 = vmatprep.subr.bf16.mxu0 %v433_v45  ;;  %v438_v54 = vld [vmem:[%s601_s6] ss:$8 sps:$4 sm:$0xff]  }
   0x9   :  { %53 = vadd.xlane.f32.xlu1 %v52_v8 }
   0xa   :  { %47 = vadd.xlane.f32.xlu0 %v46_v9 }
   0xb   :  { %238 = vmatpush1.bf16.msra.mxu0 %v435_v48 }
   0xc   :  { %239 = vmatprep.subr.bf16.mxu0 %v436_v49 }
   0xf   :  { %240 = vmatpush1.bf16.msra.mxu0 %v438_v54 }
  0x8e   :  { %v51_v10 = vpop.xlane.xlu1 %50 }
  0x8f   :  { %v45_v11 = vpop.xlane.xlu0 %44 }
  0x90   :  { %v55_v12 = vadd.f32 %v51_v10, %v45_v11  ;;  %v166_v10 = vlaneseq }
  0x92   :  { %v58_v13 = vmul.f32 0.015625, %v55_v12  ;;  %v54_v14 = vpop.xlane.xlu1 %53  ;;  %v167_v11 = vshrl.u32 %v166_v10, 7 }
  0x93   :  { %v48_v15 = vpop.xlane.xlu0 %47 }
  0x94   :  { %v60_v16 = vsub.f32 %v418_v3, %v58_v13  ;;  %v70_v17 = vsub.f32 %v422_v2, %v58_v13  ;;  %v56_v18 = vadd.f32 %v54_v14, %v48_v15  ;;  %v168_v12 = vsub.s32 0, %v167_v11  ;;  %v164_v13 = vld [vmem:[%s606_s7] sm:$0x3] }
  0x95   :  { %v172_v14 = vsub.s32 1, %v167_v11 }
  0x96   :  { %v59_v19 = vmul.f32 0.015625, %v56_v18  ;;  %v62_v20 = vmul.f32 %v60_v16, %v60_v16  ;;  %v72_v24 = vmul.f32 %v70_v17, %v70_v17  ;;  %v169_v15 = vrot.slane %v164_v13, %v168_v12 }
  0x98   :  { %v61_v21 = vsub.f32 %v419_v5, %v59_v19  ;;  %v71_v22 = vsub.f32 %v423_v4, %v59_v19  ;;  %v64_v23 = vsel %vm42_vm0, %v62_v20, 0.0  ;;  %v74_v26 = vsel %vm42_vm0, %v72_v24, 0.0 }
  0x99   :  { %65 = vadd.xlane.f32.xlu0 %v64_v23 }
  0x9a   :  { %v63_v25 = vmul.f32 %v61_v21, %v61_v21  ;;  %v73_v28 = vmul.f32 %v71_v22, %v71_v22 }
  0x9c   :  { %v67_v27 = vsel %vm42_vm0, %v63_v25, 0.0  ;;  %v77_v29 = vsel %vm42_vm0, %v73_v28, 0.0 }
  0x9d   :  { %75 = vadd.xlane.f32.xlu0 %v74_v26  ;;  %68 = vadd.xlane.f32.xlu1 %v67_v27 }
  0xa1   :  { %78 = vadd.xlane.f32.xlu1 %v77_v29 }
 0x122   :  { %v66_v32 = vpop.xlane.xlu0 %65 }
 0x126   :  { %v69_v33 = vpop.xlane.xlu1 %68  ;;  %v76_v34 = vpop.xlane.xlu0 %75 }
 0x127   :  { %v80_v35 = vadd.f32 %v76_v34, %v66_v32 }
 0x129   :  { %v82_v36 = vmul.f32 0.015625, %v80_v35 }
 0x12a   :  { %v79_v37 = vpop.xlane.xlu1 %78 }
 0x12b   :  { %v84_v38 = vadd.f32 1e-05, %v82_v36  ;;  %v81_v39 = vadd.f32 %v79_v37, %v69_v33 }
 0x12d   :  { %440 = vrsqrt.f32 %v84_v38  ;;  %v83_v40 = vmul.f32 0.015625, %v81_v39 }
 0x12f   :  { %v85_v41 = vadd.f32 1e-05, %v83_v40 }
 0x131   :  { %442 = vrsqrt.f32 %v85_v41 }
 0x13a   :  { %v441_v46 = vpop.eup %440 }
 0x13b   :  { %v119_v50 = vmul.f32 %v441_v46, %v70_v17  ;;  %v88_v51 = vmul.f32 %v441_v46, %v60_v16  ;;  %v173_v16 = vrot.slane %v164_v13, %v172_v14 }
 0x13d   :  { %v128_v56 = vmul.f32 %v394_v44, %v119_v50  ;;  %v97_v57 = vmul.f32 %v390_v47, %v88_v51 }
 0x13e   :  { %v443_v58 = vpop.eup %442 }
 0x13f   :  { %v137_v59 = vadd.f32 %v395_v52, %v128_v56  ;;  %v120_v60 = vmul.f32 %v443_v58, %v71_v22  ;;  %v106_v61 = vadd.f32 %v391_v53, %v97_v57  ;;  %v89_v62 = vmul.f32 %v443_v58, %v61_v21 }
 0x141   :  { %v412_v63 = vpack.c.bf16 %v137_v59, %v137_v59  ;;  %v129_v0 = vmul.f32 %v394_v44, %v120_v60  ;;  %v410_v1 = vpack.c.bf16 %v106_v61, %v106_v61  ;;  %v98_v2 = vmul.f32 %v390_v47, %v89_v62 }
 0x143   :  { %145 = vrot.lane.b32.xlu0 %v412_v63, %s461_s4  ;;  %v138_v3 = vadd.f32 %v395_v52, %v129_v0  ;;  %117 = vst.msk [vmem:[#allocation2] sm:$0xf] %vm116_vm1, %v410_v1  ;;  %v107_v4 = vadd.f32 %v391_v53, %v98_v2 }
 0x145   :  { %v413_v5 = vpack.c.bf16 %v138_v3, %v138_v3  ;;  %v411_v6 = vpack.c.bf16 %v107_v4, %v107_v4 }
 0x147   :  { %147 = vrot.lane.b32.xlu1 %v413_v5, %s461_s4  ;;  %118 = vst.msk [vmem:[#allocation2 + $0x4] sm:$0xf] %vm116_vm1, %v411_v6 }
 0x1b5   :  { %v146_v7 = vpop.permute.xlu0 %145 }
 0x1b6   :  { %152 = vst.msk [vmem:[#allocation2] sm:$0xf] %vm151_vm2, %v146_v7 }
 0x1b9   :  { %v148_v8 = vpop.permute.xlu1 %147 }
 0x1ba   :  { %153 = vst.msk [vmem:[#allocation2 + $0x4] sm:$0xf] %vm151_vm2, %v148_v8 }
 0x1c1   :  { %v439_v9 = vld [vmem:[#allocation2] sm:$0xff]  }
 0x1c2   :  { %407 = vmatmul.mubr.msk.bf16.vlgmr.msra.gmra.mxu0 %vm221_vm3, %v439_v9 }
 0x282   :  { %v259_v17 = vpop.f32.mrf.mxu0 }
 0x283   :  { %v561_v18 = vadd.f32 %v259_v17, %v169_v15 }
 0x284   :  { %v261_v19 = vpop.f32.mrf.mxu0 }
 0x285   :  { %v564_v20 = vmul.f32 0.70710677, %v561_v18  ;;  %v566_v21 = vadd.f32 %v261_v19, %v173_v16 }
 0x286   :  { %v263_v22 = vpop.f32.mrf.mxu0 }
 0x287   :  { %v284_v23 = vand.u32 2147483647, %v564_v20  ;;  %v570_v24 = vmul.f32 0.70710677, %v566_v21  ;;  %v572_v25 = vadd.f32 %v263_v22, %v169_v15  ;;  %vm276_vm4 = vcmp.ge.f32.partialorder %v564_v20, 0.0 }
 0x288   :  { %v265_v26 = vpop.f32.mrf.mxu0 }
 0x289   :  { %v288_v27 = vmul.f32 0.3275911, %v284_v23  ;;  %v285_v28 = vand.u32 2147483647, %v570_v24  ;;  %v576_v29 = vmul.f32 0.70710677, %v572_v25  ;;  %v578_v30 = vadd.f32 %v265_v26, %v173_v16 }
 0x28a   :  { %v336_v40 = vsub.f32 0.0, %v284_v23  ;;  %vm277_vm5 = vcmp.ge.f32.partialorder %v570_v24, 0.0  ;;  %v268_v24 = vmul.f32 0.5, %v561_v18 }
 0x28b   :  { %v292_v31 = vadd.f32 1.0, %v288_v27  ;;  %v289_v32 = vmul.f32 0.3275911, %v285_v28  ;;  %v286_v33 = vand.u32 2147483647, %v576_v29  ;;  %v337_v42 = vsub.f32 0.0, %v285_v28 }
 0x28c   :  { %v582_v34 = vmul.f32 0.70710677, %v578_v30  ;;  %v340_v43 = vmul.f32 %v336_v40, %v284_v23  ;;  %vm278_vm6 = vcmp.ge.f32.partialorder %v576_v29, 0.0 }
 0x28d   :  { %444 = vrcp.f32 %v292_v31  ;;  %v293_v35 = vadd.f32 1.0, %v289_v32  ;;  %v290_v36 = vmul.f32 0.3275911, %v286_v33  ;;  %v338_v44 = vsub.f32 0.0, %v286_v33 }
 0x28e   :  { %v287_v37 = vand.u32 2147483647, %v582_v34  ;;  %v341_v46 = vmul.f32 %v337_v42, %v285_v28  ;;  %v344_v48 = vmul.f32 1.442695, %v340_v43  ;;  %vm279_vm7 = vcmp.ge.f32.partialorder %v582_v34, 0.0 }
 0x28f   :  { %446 = vrcp.f32 %v293_v35  ;;  %v294_v38 = vadd.f32 1.0, %v290_v36  ;;  %v342_v50 = vmul.f32 %v338_v44, %v286_v33 }
 0x290   :  { %v291_v39 = vmul.f32 0.3275911, %v287_v37  ;;  %v339_v49 = vsub.f32 0.0, %v287_v37  ;;  %v346_v54 = vmul.f32 1.442695, %v341_v46 }
 0x291   :  { %448 = vrcp.f32 %v294_v38  ;;  %v348_v60 = vmul.f32 1.442695, %v342_v50  ;;  %v462_v38 = vmov -1.0  }
 0x292   :  { %v295_v41 = vadd.f32 1.0, %v291_v39  ;;  %v343_v57 = vmul.f32 %v339_v49, %v287_v37  ;;  %v280_v39 = vsel %vm276_vm4, 1.0, %v462_v38  ;;  %v281_v46 = vsel %vm277_vm5, 1.0, %v462_v38 }
 0x294   :  { %450 = vrcp.f32 %v295_v41  ;;  %v350_v3 = vmul.f32 1.442695, %v343_v57 }
 0x295   :  { %452 = vpow2.f32 %v344_v48 }
 0x296   :  { %454 = vpow2.f32 %v346_v54  ;;  %v269_v54 = vmul.f32 0.5, %v566_v21 }
 0x297   :  { %456 = vpow2.f32 %v348_v60 }
 0x298   :  { %458 = vpow2.f32 %v350_v3 }
 0x29a   :  { %v445_v45 = vpop.eup %444 }
 0x29b   :  { %v300_v47 = vmul.f32 1.0614054, %v445_v45 }
 0x29c   :  { %v447_v51 = vpop.eup %446 }
 0x29d   :  { %v304_v52 = vadd.f32 -1.4531521, %v300_v47  ;;  %v301_v53 = vmul.f32 1.0614054, %v447_v51 }
 0x29e   :  { %v449_v55 = vpop.eup %448 }
 0x29f   :  { %v308_v56 = vmul.f32 %v445_v45, %v304_v52  ;;  %v305_v58 = vadd.f32 -1.4531521, %v301_v53  ;;  %v302_v59 = vmul.f32 1.0614054, %v449_v55  ;;  %v282_v52 = vsel %vm278_vm6, 1.0, %v462_v38 }
 0x2a1   :  { %v312_v61 = vadd.f32 1.4214138, %v308_v56  ;;  %v451_v62 = vpop.eup %450  ;;  %v309_v63 = vmul.f32 %v447_v51, %v305_v58  ;;  %v306_v0 = vadd.f32 -1.4531521, %v302_v59  ;;  %v283_v59 = vsel %vm279_vm7, 1.0, %v462_v38 }
 0x2a2   :  { %v303_v2 = vmul.f32 1.0614054, %v451_v62  ;;  %v453_v23 = vpop.eup %452 }
 0x2a3   :  { %v316_v1 = vmul.f32 %v445_v45, %v312_v61  ;;  %v313_v4 = vadd.f32 1.4214138, %v309_v63  ;;  %v310_v5 = vmul.f32 %v449_v55, %v306_v0  ;;  %v455_v35 = vpop.eup %454  ;;  %v270_v63 = vmul.f32 0.5, %v572_v25 }
 0x2a4   :  { %v307_v7 = vadd.f32 -1.4531521, %v303_v2  ;;  %v457_v42 = vpop.eup %456  ;;  %v271_v0 = vmul.f32 0.5, %v578_v30 }
 0x2a5   :  { %v320_v6 = vadd.f32 -0.28449672, %v316_v1  ;;  %v317_v8 = vmul.f32 %v447_v51, %v313_v4  ;;  %v314_v9 = vadd.f32 1.4214138, %v310_v5  ;;  %v459_v48 = vpop.eup %458 }
 0x2a6   :  { %v311_v11 = vmul.f32 %v451_v62, %v307_v7 }
 0x2a7   :  { %v324_v10 = vmul.f32 %v445_v45, %v320_v6  ;;  %v321_v12 = vadd.f32 -0.28449672, %v317_v8  ;;  %v318_v13 = vmul.f32 %v449_v55, %v314_v9 }
 0x2a8   :  { %v315_v15 = vadd.f32 1.4214138, %v311_v11 }
 0x2a9   :  { %v328_v14 = vadd.f32 0.2548296, %v324_v10  ;;  %v325_v16 = vmul.f32 %v447_v51, %v321_v12  ;;  %v322_v17 = vadd.f32 -0.28449672, %v318_v13 }
 0x2aa   :  { %v319_v22 = vmul.f32 %v451_v62, %v315_v15 }
 0x2ab   :  { %v332_v19 = vmul.f32 %v445_v45, %v328_v14  ;;  %v329_v26 = vadd.f32 0.2548296, %v325_v16  ;;  %v326_v27 = vmul.f32 %v449_v55, %v322_v17 }
 0x2ac   :  { %v323_v31 = vadd.f32 -0.28449672, %v319_v22 }
 0x2ad   :  { %v352_v28 = vmul.f32 %v453_v23, %v332_v19  ;;  %v333_v32 = vmul.f32 %v447_v51, %v329_v26  ;;  %v330_v33 = vadd.f32 0.2548296, %v326_v27 }
 0x2ae   :  { %v327_v37 = vmul.f32 %v451_v62, %v323_v31 }
 0x2af   :  { %v356_v36 = vsub.f32 1.0, %v352_v28  ;;  %v353_v40 = vmul.f32 %v455_v35, %v333_v32  ;;  %v334_v41 = vmul.f32 %v449_v55, %v330_v33 }
 0x2b0   :  { %v331_v44 = vadd.f32 0.2548296, %v327_v37 }
 0x2b1   :  { %v360_v43 = vmul.f32 %v356_v36, %v280_v39  ;;  %v357_v45 = vsub.f32 1.0, %v353_v40  ;;  %v354_v20 = vmul.f32 %v457_v42, %v334_v41 }
 0x2b2   :  { %v335_v47 = vmul.f32 %v451_v62, %v331_v44 }
 0x2b3   :  { %v364_v49 = vadd.f32 1.0, %v360_v43  ;;  %v361_v50 = vmul.f32 %v357_v45, %v281_v46  ;;  %v358_v51 = vsub.f32 1.0, %v354_v20 }
 0x2b4   :  { %v355_v53 = vmul.f32 %v459_v48, %v335_v47 }
 0x2b5   :  { %v365_v55 = vadd.f32 1.0, %v361_v50  ;;  %v362_v56 = vmul.f32 %v358_v51, %v282_v52  ;;  %v368_v58 = vmul.f32 %v364_v49, %v268_v24 }
 0x2b6   :  { %v359_v57 = vsub.f32 1.0, %v355_v53 }
 0x2b7   :  { %v369_v29 = vmul.f32 %v365_v55, %v269_v54  ;;  %v366_v60 = vadd.f32 1.0, %v362_v56 }
 0x2b8   :  { %v363_v61 = vmul.f32 %v359_v57, %v283_v59 }
 0x2b9   :  { %v414_v62 = vpack.c.bf16 %v369_v29, %v368_v58  ;;  %v370_v18 = vmul.f32 %v366_v60, %v270_v63 }
 0x2ba   :  { %v367_v1 = vadd.f32 1.0, %v363_v61 }
 0x2bb   :  { %384 = vst [vmem:[%s607_s8] sm:$0xff] %v414_v62 }
 0x2bc   :  { %v371_v21 = vmul.f32 %v367_v1, %v271_v0 }
 0x2be   :  { %v415_v34 = vpack.c.bf16 %v371_v21, %v370_v18 }
 0x2c0   :  { %385 = vst [vmem:[%s607_s8 + $0x8] sm:$0xff] %v415_v34 }

// kernel: unet_t_forward.34
= control target key start
LH: loop header
LB: loop body
LE: loop exit
PB: predicated region body
PF: predicated region fallthrough
CT: control target
= control target key end

     0   :  { %s1190_s12 = smov 0   ;;  %s1192_s13 = smov 0   ;;  %s1370_s0 = inlined_call_operand.vmem [shape: bf16[2,8,64], index: 0, kind: input, shape index: {}]   ;;  %s1371_s1 = inlined_call_operand.vmem [shape: bf16[2,8,64], index: 1, kind: input, shape index: {}]   ;;  %s1372_s2 = inlined_call_operand.vmem [shape: bf16[2,8,64], index: 2, kind: input, shape index: {}]   ;;  %s1373_s3 = inlined_call_operand.vmem [shape: bf16[2,8,64], index: 3, kind: output, shape index: {}]  }
   0x1   :  { %s1194_s14 = smov 0  }
   0x2 LB: > { %s32_s15 = sadd.s32 1, %s1148_s13  ;;  %p976_p0 = scmp.ge.s32.totalorder %s1152_s14, 1  ;;  %s1152_s14 = sphi %s1194_s14, %s13_s14   ;;  %s1148_s13 = sphi %s1192_s13, %s1375_s13   ;;  %s1144_s12 = sphi %s1190_s12, %s1374_s12  }
   0x3   : > { %p34_p1 = scmp.ge.s32.totalorder %s32_s15, 2  ;;  %p190_p2 = scmp.lt.s32.totalorder %s1152_s14, 3 }
   0x5   : > { %s1377_s15 = smov (%p34_p1, %s32_s15), 0  ;;  %p191_p3 = pnand %p976_p0, %p190_p2 }
   0x6   : > { %p232_p4 = scmp.lt.s32.totalorder (!%p191_p3), %s1144_s12, 1  ;;  %s1158_s23 = smov (!%p191_p3), 112  }
   0x7   : > { %194 = sbr.rel (%p191_p3) target bundleno = 1484 (0x5cc), region = 32  ;;  %s1159_s24 = smov (!%p191_p3), 96  }
   0x8   : > { %s1160_s25 = smov (!%p191_p3), 80   ;;  %s1164_s29 = smov (!%p191_p3), 113  }
   0x9   : > { %s1165_s30 = smov (!%p191_p3), 114   ;;  %s1166_s4 = smov (!%p191_p3), 115  }
   0xa   : > { %s1167_s5 = smov (!%p191_p3), 16   ;;  %s1168_s6 = smov (!%p191_p3), 32  }
   0xb   : > { %s1169_s7 = smov (!%p191_p3), 48  }
   0xc   : > { %v1154_v0 = vmov 0.0   ;;  %vm1155_vm0 = vmmov 0   ;;  %s1379_s12 = smov (!%p232_p4, %s1144_s12), 1  ;;  %vm274_vm1 = vcmask 130048   ;;  %vm266_vm2 = vcmask 31744  }
   0xd   : > { %1010 = vmatprep.subr.bf16.mxu0 %v1154_v0  ;;  %1012 = vmatprep.mubr.msk.bf16.mxu0 %vm1155_vm0, %v1154_v0  ;;  %s1214_s16 = sshll.u32 %s1379_s12, 2  ;;  %v1156_v4 = vmov -inf   ;;  %268 = vst.msk [vmem:[#allocation3] sm:$0xff] %vm266_vm2, %v1154_v0  ;;  %vm322_vm3 = vcmask 64512   ;;  %v1157_v10 = vmov 0   ;;  %vm404_vm4 = vcmask 7168  }
   0xe   : > { %1016 = vmatprep.subr.bf16.mxu1 %v1154_v0  ;;  %1018 = vmatprep.mubr.msk.bf16.mxu1 %vm1155_vm0, %v1154_v0  ;;  %s245_s19 = scalar_lea.vmem %s1371_s1, %s1214_s16  ;;  %s238_s22 = scalar_lea.vmem %s1370_s0, %s1214_s16  ;;  %267 = vst.msk [vmem:[#allocation2] sm:$0xff] %vm266_vm2, %v1156_v4  ;;  %vm345_vm5 = vcmask 1043456   ;;  %v1161_v47 = vmov 1   ;;  %v1162_v54 = vmov 2   ;;  %vm552_vm6 = vcmask 15368  }
   0xf   : > { %v272_v1 = vld [vmem:[%s245_s19] sm:$0xf]  ;;  %1098 = vset.pattern.permute.xlu0 %v1157_v10  ;;  %s252_s28 = scalar_lea.vmem %s1372_s2, %s1214_s16  ;;  %1099 = vset.pattern.permute.xlu1 %v1161_v47  ;;  %v1163_v61 = vmov 3   ;;  %vm691_vm7 = vcmask 23568   ;;  %vm830_vm8 = vcmask 31768   ;;  %vm269_vm9 = vcmask 523264   ;;  %s259_s10 = scalar_lea.vmem %s1373_s3, %s1214_s16 }
  0x10   : > { %v279_v2 = vsel %vm274_vm1, %v272_v1, 0  ;;  %v271_v3 = vld [vmem:[%s238_s22] sm:$0xf]  ;;  %v984_v11 = vcombine.low %v272_v1, %v272_v1  ;;  %270 = vst.msk [vmem:[#allocation4] sm:$0xff] %vm269_vm9, %v1154_v0  ;;  %vm544_vm10 = vcmask 261248   ;;  %vm683_vm11 = vcmask 392448  }
  0x11   : > { %1011 = vmatpush3.bf16.xpose.msra.mxu0 %v279_v2  ;;  %v983_v12 = vcombine.low %v271_v3, %v271_v3  ;;  %v1252_v17 = vld [vmem:[%s252_s28] sm:$0xf]  ;;  %vm822_vm12 = vcmask 523648   ;;  %vm856_vm13 = vcmask 261120   ;;  %vm858_vm14 = vcmask 392192  }
  0x12   : > { %1028 = vmatprep.subr.bf16.mxu0 %v1154_v0  ;;  %415 = vrot.lane.b32.xlu1 %v984_v11, %s1158_s23  ;;  %v340_v18 = vsel %vm274_vm1, %v1252_v17, 1065369472  ;;  %v986_v58 = vcombine.low %v1252_v17, %v1252_v17  ;;  %vm863_vm15 = vcmask 519168  }
  0x13   : > { %v346_v19 = vsel %vm345_vm5, %v340_v18, 0 }
  0x14   : > { %1017 = vmatpush3.bf16.msra.mxu1 %v346_v19 }
  0x15   : > { %v1238_v13 = vld [vmem:[#allocation2] sm:$0xff]  ;;  %1022 = vmatprep.subr.bf16.mxu1 %v1154_v0 }
  0x16   : > { %410 = vrot.lane.b32.xlu1 %v983_v12, %s1158_s23 }
  0x18   : > { %1013 = vmatmul.mubr.msk.bf16.vlgmr.msra.gmra.mxu0 %vm274_vm1, %v271_v3 }
  0x19   : > { %1030 = vmatprep.mubr.msk.bf16.mxu0 %vm1155_vm0, %v1154_v0 }
  0x1a   : > { %557 = vrot.lane.b32.xlu1 %v984_v11, %s1159_s24 }
  0x1e   : > { %555 = vrot.lane.b32.xlu1 %v983_v12, %s1159_s24 }
  0x22   : > { %696 = vrot.lane.b32.xlu1 %v984_v11, %s1160_s25 }
  0x26   : > { %694 = vrot.lane.b32.xlu1 %v983_v12, %s1160_s25 }
  0x84   : > { %v416_v23 = vpop.permute.xlu1 %415 }
  0x85   : > { %v421_v27 = vsel %vm274_vm1, %v416_v23, 0 }
  0x88   : > { %v411_v24 = vpop.permute.xlu1 %410 }
  0x8c   : > { %v558_v28 = vpop.permute.xlu1 %557 }
  0x8d   : > { %v563_v30 = vsel %vm274_vm1, %v558_v28, 0 }
  0x90   : > { %v556_v29 = vpop.permute.xlu1 %555 }
  0x94   : > { %v697_v31 = vpop.permute.xlu1 %696 }
  0x95   : > { %v702_v32 = vsel %vm274_vm1, %v697_v31, 0 }
  0x98   : > { %v695_v33 = vpop.permute.xlu1 %694 }
  0xd8   : > { %v315_v5 = vpop.f32.mrf.mxu0 }
  0xd9   : > { %v323_v6 = vsel %vm322_vm3, %v315_v5, -inf }
  0xda   : > { %324 = vmax.xlane.f32.xlu0 %v323_v6  ;;  %v1014_v7 = vpop.f32.mrf.mxu0 }
  0xdc   : > { %v318_v8 = vpop.f32.mrf.mxu0 }
  0xde   : > { %v1015_v9 = vpop.f32.mrf.mxu0 }
 0x163   : > { %v325_v14 = vpop.xlane.xlu0 %324 }
 0x164   : > { %v1241_v15 = vmax.f32 %v1238_v13, %v325_v14 }
 0x166   : > { %v327_v16 = vsub.f32 %v1238_v13, %v1241_v15  ;;  %406 = vst.msk [vmem:[#allocation2] sm:$0xff] %vm404_vm4, %v1241_v15  ;;  %332 = vperm.xlu0 %1098, %v1241_v15  }
 0x16a   : > { %1100 = vset.pattern.permute.xlu0 %v1162_v54 }
 0x16d   : > { %v1289_v56 = vld [vmem:[#allocation2] sm:$0xff] }
 0x1e1   : > { %v333_v20 = vpop.permute.xlu0 %332 }
 0x1e2   : > { %v335_v21 = vsub.f32 %v315_v5, %v333_v20  ;;  %v328_v20 = vmul.f32 1.442695, %v327_v16 }
 0x1e4   : > { %v336_v22 = vmul.f32 1.442695, %v335_v21 }
 0x1e6   : > { %1112 = vpow2.f32 %v336_v22 }
 0x1f3   : > { %v1113_v25 = vpop.eup %1112 }
 0x1f4   : > { %v341_v26 = vpack.c.bf16 %v1113_v25, %v1113_v25 }
 0x1f6   : > { %1019 = vmatmul.mubr.msk.bf16.vlgmr.msra.gmra.mxu1 %vm322_vm3, %v341_v26 }
 0x1f7   : > { %1023 = vmatpush3.bf16.xpose.msra.mxu1 %v421_v27  ;;  %1024 = vmatprep.mubr.msk.bf16.mxu1 %vm1155_vm0, %v1154_v0 }
 0x1f8   : > { %1034 = vmatprep.subr.bf16.mxu1 %v1154_v0 }
 0x1fe   : > { %1025 = vmatmul.mubr.msk.bf16.vlgmr.msra.gmra.mxu1 %vm274_vm1, %v411_v24 }
 0x1ff   : > { %1035 = vmatpush3.bf16.xpose.msra.mxu1 %v563_v30  ;;  %1036 = vmatprep.mubr.msk.bf16.mxu1 %vm1155_vm0, %v1154_v0 }
 0x200   : > { %1046 = vmatprep.subr.bf16.mxu1 %v1154_v0 }
 0x206   : > { %1037 = vmatmul.mubr.msk.bf16.vlgmr.msra.gmra.mxu1 %vm274_vm1, %v556_v29 }
 0x207   : > { %1047 = vmatpush3.bf16.xpose.msra.mxu1 %v702_v32  ;;  %1048 = vmatprep.mubr.msk.bf16.mxu1 %vm1155_vm0, %v1154_v0  ;;  %v397_v32 = vld [vmem:[#allocation3] sm:$0xff] }
 0x20e   : > { %1049 = vmatmul.mubr.msk.bf16.vlgmr.msra.gmra.mxu1 %vm274_vm1, %v695_v33 }
 0x2b6   : > { %v1273_v34 = vpop.f32.mrf.mxu1 }
 0x2b8   : > { %v1020_v35 = vpop.f32.mrf.mxu1 }
 0x2ba   : > { %v385_v36 = vpop.f32.mrf.mxu1 }
 0x2bc   : > { %v1021_v37 = vpop.f32.mrf.mxu1 }
 0x2be   : > { %v1275_v38 = vpop.f32.mrf.mxu1 }
 0x2bf   : > { %v464_v39 = vsel %vm322_vm3, %v1275_v38, -inf }
 0x2c0   : > { %465 = vmax.xlane.f32.xlu1 %v464_v39  ;;  %v1026_v40 = vpop.f32.mrf.mxu1 }
 0x2c2   : > { %v460_v41 = vpop.f32.mrf.mxu1 }
 0x2c4   : > { %v1027_v42 = vpop.f32.mrf.mxu1 }
 0x2c6   : > { %v1279_v43 = vpop.f32.mrf.mxu1 }
 0x2c7   : > { %v606_v44 = vsel %vm322_vm3, %v1279_v43, -inf }
 0x2c8   : > { %607 = vmax.xlane.f32.xlu0 %v606_v44  ;;  %v1038_v45 = vpop.f32.mrf.mxu1 }
 0x2ca   : > { %v602_v46 = vpop.f32.mrf.mxu1 }
 0x2cc   : > { %v1039_v48 = vpop.f32.mrf.mxu1 }
 0x2ce   : > { %v1284_v49 = vpop.f32.mrf.mxu1 }
 0x2cf   : > { %v745_v50 = vsel %vm322_vm3, %v1284_v49, -inf }
 0x2d0   : > { %v1050_v51 = vpop.f32.mrf.mxu1  ;;  %746 = vmax.xlane.f32.xlu1 %v745_v50 }
 0x2d2   : > { %v741_v52 = vpop.f32.mrf.mxu1 }
 0x2d4   : > { %v1051_v53 = vpop.f32.mrf.mxu1 }
 0x349   : > { %v466_v55 = vpop.xlane.xlu1 %465 }
 0x34a   : > { %v1292_v57 = vmax.f32 %v1289_v56, %v466_v55 }
 0x34c   : > { %v468_v59 = vsub.f32 %v1289_v56, %v1292_v57  ;;  %554 = vst.msk [vmem:[#allocation2] sm:$0xff] %vm552_vm6, %v1292_v57  ;;  %473 = vperm.xlu1 %1099, %v1292_v57  }
 0x34e   : > { %v469_v48 = vmul.f32 1.442695, %v468_v59 }
 0x350   : > { %482 = vrot.lane.b32.xlu1 %v986_v58, %s1158_s23 }
 0x351   : > { %v608_v60 = vpop.xlane.xlu0 %607  ;;  %1101 = vset.pattern.permute.xlu1 %v1163_v61 }
 0x353   : > { %v605_v62 = vld [vmem:[#allocation2] sm:$0xff] }
 0x354   : > { %v609_v63 = vmax.f32 %v605_v62, %v608_v60 }
 0x356   : > { %v610_v1 = vsub.f32 %v605_v62, %v609_v63  ;;  %693 = vst.msk [vmem:[#allocation2] sm:$0xff] %vm691_vm7, %v609_v63  ;;  %615 = vperm.xlu0 %1100, %v609_v63  }
 0x358   : > { %v611_v2 = vmul.f32 1.442695, %v610_v1 }
 0x359   : > { %v747_v3 = vpop.xlane.xlu1 %746 }
 0x35a   : > { %1114 = vpow2.f32 %v611_v2 }
 0x35d   : > { %v744_v4 = vld [vmem:[#allocation2] sm:$0xff] }
 0x35e   : > { %v748_v5 = vmax.f32 %v744_v4, %v747_v3 }
 0x360   : > { %v749_v6 = vsub.f32 %v744_v4, %v748_v5  ;;  %832 = vst.msk [vmem:[#allocation2] sm:$0xff] %vm830_vm8, %v748_v5  ;;  %754 = vperm.xlu1 %1101, %v748_v5   ;;  %v388_v5 = vld [vmem:[#allocation4] sm:$0xff] }
 0x362   : > { %v750_v7 = vmul.f32 1.442695, %v749_v6 }
 0x364   : > { %1116 = vpow2.f32 %v750_v7  ;;  %621 = vrot.lane.b32.xlu1 %v986_v58, %s1159_s24 }
 0x365   : > { %1102 = vset.pattern.permute.xlu1 %v1157_v10 }
 0x367   : > { %v1307_v8 = vpop.eup %1114 }
 0x368   : > { %760 = vrot.lane.b32.xlu1 %v986_v58, %s1160_s25  ;;  %674 = vperm.xlu0 %1100, %v1307_v8  }
 0x36c   : > { %400 = vrot.lane.b32.xlu1 %v1273_v34, %s1158_s23  ;;  %1104 = vset.pattern.permute.xlu0 %v1163_v61 }
 0x371   : > { %v1314_v9 = vpop.eup %1116 }
 0x372   : > { %813 = vperm.xlu0 %1104, %v1314_v9  }
 0x376   : > { %1106 = vset.pattern.permute.xlu0 %v1161_v47 }
 0x3c7   : > { %v474_v11 = vpop.permute.xlu1 %473 }
 0x3c8   : > { %v476_v12 = vsub.f32 %v1275_v38, %v474_v11 }
 0x3ca   : > { %v477_v14 = vmul.f32 1.442695, %v476_v12 }
 0x3cb   : > { %v483_v17 = vpop.permute.xlu1 %482 }
 0x3cc   : > { %1118 = vpow2.f32 %v477_v14  ;;  %v485_v18 = vsel %vm274_vm1, %v483_v17, 1065369472 }
 0x3cd   : > { %v490_v19 = vsel %vm345_vm5, %v485_v18, 0  ;;  %1120 = vpow2.f32 %v328_v20 }
 0x3ce   : > { %1029 = vmatpush3.bf16.msra.mxu0 %v490_v19 }
 0x3cf   : > { %1040 = vmatprep.subr.bf16.mxu0 %v1154_v0 }
 0x3d1   : > { %v616_v21 = vpop.permute.xlu0 %615 }
 0x3d2   : > { %v618_v22 = vsub.f32 %v1279_v43, %v616_v21 }
 0x3d4   : > { %v619_v23 = vmul.f32 1.442695, %v618_v22 }
 0x3d6   : > { %1122 = vpow2.f32 %v619_v23 }
 0x3d9   : > { %v1119_v24 = vpop.eup %1118 }
 0x3da   : > { %v486_v25 = vpack.c.bf16 %v1119_v24, %v1119_v24  ;;  %v1121_v16 = vpop.eup %1120 }
 0x3db   : > { %v755_v26 = vpop.permute.xlu1 %754  ;;  %v398_v37 = vmul.f32 %v1121_v16, %v397_v32 }
 0x3dc   : > { %v757_v27 = vsub.f32 %v1284_v49, %v755_v26  ;;  %1031 = vmatmul.mubr.msk.bf16.vlgmr.msra.gmra.mxu0 %vm322_vm3, %v486_v25 }
 0x3dd   : > { %1042 = vmatprep.mubr.msk.bf16.mxu0 %vm1155_vm0, %v1154_v0 }
 0x3de   : > { %v758_v28 = vmul.f32 1.442695, %v757_v27 }
 0x3df   : > { %v622_v29 = vpop.permute.xlu1 %621 }
 0x3e0   : > { %1124 = vpow2.f32 %v758_v28  ;;  %v624_v13 = vsel %vm274_vm1, %v622_v29, 1065369472 }
 0x3e1   : > { %v629_v15 = vsel %vm345_vm5, %v624_v13, 0  ;;  %1126 = vpow2.f32 %v469_v48 }
 0x3e2   : > { %1041 = vmatpush3.bf16.msra.mxu0 %v629_v15 }
 0x3e3   : > { %v1123_v30 = vpop.eup %1122  ;;  %v761_v31 = vpop.permute.xlu1 %760  ;;  %1052 = vmatprep.subr.bf16.mxu0 %v1154_v0 }
 0x3e4   : > { %v625_v33 = vpack.c.bf16 %v1123_v30, %v1123_v30  ;;  %v763_v35 = vsel %vm274_vm1, %v761_v31, 1065369472  ;;  %v675_v20 = vpop.permute.xlu0 %674 }
 0x3e5   : > { %v768_v36 = vsel %vm345_vm5, %v763_v35, 0 }
 0x3e6   : > { %1043 = vmatmul.mubr.msk.bf16.vlgmr.msra.gmra.mxu0 %vm322_vm3, %v625_v33 }
 0x3e7   : > { %v401_v38 = vpop.permute.xlu1 %400  ;;  %1053 = vmatpush3.bf16.msra.mxu0 %v768_v36  ;;  %1054 = vmatprep.mubr.msk.bf16.mxu0 %vm1155_vm0, %v1154_v0 }
 0x3e8   : > { %v403_v39 = vadd.f32 %v401_v38, %v398_v37 }
 0x3ea   : > { %405 = vst.msk [vmem:[#allocation3] sm:$0xff] %vm404_vm4, %v403_v39 }
 0x3ed   : > { %v1125_v40 = vpop.eup %1124  ;;  %v814_v24 = vpop.permute.xlu0 %813 }
 0x3ee   : > { %v764_v41 = vpack.c.bf16 %v1125_v40, %v1125_v40  ;;  %v1127_v60 = vpop.eup %1126 }
 0x3f0   : > { %1055 = vmatmul.mubr.msk.bf16.vlgmr.msra.gmra.mxu0 %vm322_vm3, %v764_v41 }
 0x3f1   : > { %v546_v0 = vld [vmem:[#allocation3] sm:$0xff] }
 0x3f2   : > { %v547_v56 = vmul.f32 %v1127_v60, %v546_v0 }
 0x49c   : > { %v526_v42 = vpop.f32.mrf.mxu0 }
 0x49d   : > { %548 = vrot.lane.b32.xlu1 %v526_v42, %s1164_s29 }
 0x49e   : > { %v1032_v43 = vpop.f32.mrf.mxu0 }
 0x4a0   : > { %v529_v44 = vpop.f32.mrf.mxu0 }
 0x4a2   : > { %v1033_v45 = vpop.f32.mrf.mxu0 }
 0x4a6   : > { %v665_v46 = vpop.f32.mrf.mxu0 }
 0x4a7   : > { %687 = vrot.lane.b32.xlu1 %v665_v46, %s1165_s30 }
 0x4a8   : > { %v1044_v49 = vpop.f32.mrf.mxu0 }
 0x4aa   : > { %v668_v50 = vpop.f32.mrf.mxu0 }
 0x4ac   : > { %v1045_v51 = vpop.f32.mrf.mxu0 }
 0x4b0   : > { %v804_v52 = vpop.f32.mrf.mxu0 }
 0x4b1   : > { %826 = vrot.lane.b32.xlu1 %v804_v52, %s1166_s4 }
 0x4b2   : > { %v1056_v53 = vpop.f32.mrf.mxu0 }
 0x4b4   : > { %v807_v55 = vpop.f32.mrf.mxu0 }
 0x4b5   : > { %391 = vperm.xlu1 %1102, %v1121_v16  }
 0x4b6   : > { %v1057_v58 = vpop.f32.mrf.mxu0 }
 0x4b9   : > { %1103 = vset.pattern.permute.xlu1 %v1161_v47 }
 0x4ba   : > { %535 = vperm.xlu1 %1103, %v1127_v60  }
 0x4be   : > { %540 = vrot.lane.b32.xlu1 %v526_v42, %s1167_s5 }
 0x4bf   : > { %1105 = vset.pattern.permute.xlu1 %v1157_v10 }
 0x4c2   : > { %679 = vrot.lane.b32.xlu1 %v665_v46, %s1168_s6 }
 0x4c6   : > { %818 = vrot.lane.b32.xlu1 %v804_v52, %s1169_s7 }
 0x50f   : > { %v549_v57 = vpop.permute.xlu1 %548 }
 0x510   : > { %v551_v59 = vadd.f32 %v549_v57, %v547_v56 }
 0x512   : > { %553 = vst.msk [vmem:[#allocation3] sm:$0xff] %vm552_vm6, %v551_v59 }
 0x519   : > { %v685_v62 = vld [vmem:[#allocation3] sm:$0xff]  ;;  %v688_v1 = vpop.permute.xlu1 %687 }
 0x51a   : > { %v686_v63 = vmul.f32 %v1307_v8, %v685_v62 }
 0x51c   : > { %v690_v47 = vadd.f32 %v688_v1, %v686_v63 }
 0x51e   : > { %692 = vst.msk [vmem:[#allocation3] sm:$0xff] %vm691_vm7, %v690_v47 }
 0x523   : > { %v827_v3 = vpop.permute.xlu1 %826 }
 0x525   : > { %v824_v2 = vld [vmem:[#allocation3] sm:$0xff] }
 0x526   : > { %v825_v10 = vmul.f32 %v1314_v9, %v824_v2 }
 0x528   : > { %v829_v4 = vadd.f32 %v827_v3, %v825_v10 }
 0x52a   : > { %831 = vst.msk [vmem:[#allocation3] sm:$0xff] %vm830_vm8, %v829_v4 }
 0x530   : > { %v392_v6 = vpop.permute.xlu1 %391 }
 0x531   : > { %v836_v7 = vld [vmem:[#allocation3] sm:$0xff]  ;;  %v394_v11 = vmul.f32 %v392_v6, %v388_v5 }
 0x532   : > { %1128 = vrcp.f32 %v836_v7 }
 0x533   : > { %v395_v12 = vadd.f32 %v394_v11, %v1273_v34 }
 0x535   : > { %396 = vst.msk [vmem:[#allocation4] sm:$0xff] %vm274_vm1, %v395_v12  ;;  %v536_v8 = vpop.permute.xlu1 %535 }
 0x539   : > { %v541_v18 = vpop.permute.xlu1 %540 }
 0x53c   : > { %v532_v14 = vld [vmem:[#allocation4] sm:$0xff] }
 0x53d   : > { %v538_v17 = vmul.f32 %v536_v8, %v532_v14  ;;  %v680_v22 = vpop.permute.xlu1 %679 }
 0x53f   : > { %v1129_v19 = vpop.eup %1128  ;;  %v543_v9 = vadd.f32 %v541_v18, %v538_v17 }
 0x540   : > { %844 = vperm.xlu0 %1106, %v1129_v19   ;;  %840 = vperm.xlu1 %1105, %v1129_v19  }
 0x541   : > { %545 = vst.msk [vmem:[#allocation4] sm:$0xff] %vm544_vm10, %v543_v9  ;;  %v819_v27 = vpop.permute.xlu1 %818 }
 0x544   : > { %1107 = vset.pattern.permute.xlu1 %v1162_v54  ;;  %1109 = vset.pattern.permute.xlu0 %v1163_v61 }
 0x545   : > { %848 = vperm.xlu1 %1107, %v1129_v19  }
 0x548   : > { %v671_v21 = vld [vmem:[#allocation4] sm:$0xff] }
 0x549   : > { %v677_v34 = vmul.f32 %v675_v20, %v671_v21  ;;  %1108 = vset.pattern.permute.xlu1 %v1163_v61 }
 0x54a   : > { %852 = vperm.xlu1 %1108, %v1129_v19  }
 0x54b   : > { %v682_v23 = vadd.f32 %v680_v22, %v677_v34 }
 0x54d   : > { %684 = vst.msk [vmem:[#allocation4] sm:$0xff] %vm683_vm11, %v682_v23 }
 0x554   : > { %v810_v25 = vld [vmem:[#allocation4] sm:$0xff] }
 0x555   : > { %v816_v26 = vmul.f32 %v814_v24, %v810_v25 }
 0x557   : > { %v821_v54 = vadd.f32 %v819_v27, %v816_v26 }
 0x559   : > { %823 = vst.msk [vmem:[#allocation4] sm:$0xff] %vm822_vm12, %v821_v54 }
 0x560   : > { %v860_v30 = vld [vmem:[#allocation4] sm:$0xff] }
 0x5bb   : > { %v841_v28 = vpop.permute.xlu1 %840  ;;  %v845_v13 = vpop.permute.xlu0 %844 }
 0x5bc   : > { %v855_v61 = vsel %vm274_vm1, %v841_v28, %v845_v13 }
 0x5c0   : > { %v849_v29 = vpop.permute.xlu1 %848 }
 0x5c1   : > { %v857_v15 = vsel %vm856_vm13, %v855_v61, %v849_v29 }
 0x5c5   : > { %v853_v16 = vpop.permute.xlu1 %852 }
 0x5c6   : > { %v859_v31 = vsel %vm858_vm14, %v857_v15, %v853_v16 }
 0x5c7   : > { %v861_v32 = vmul.f32 %v860_v30, %v859_v31 }
 0x5c9   : > { %v862_v33 = vpack.c.bf16 %v861_v32, %v861_v32 }
 0x5cb   : > { %864 = vst.msk [vmem:[%s259_s10] sm:$0xf] %vm863_vm15, %v862_v33 }
 0x5cc PF: > { %s13_s14 = sadd.s32 1, %s1152_s14   ;;  %s1374_s12 = smov %s1148_s13 }
 0x5cd   : > { %p10_p5 = scmp.ge.s32.totalorder %s13_s14, 4   ;;  %s1375_s13 = smov %s1377_s15 }
 0x5cf   :  { %12 = sbr.rel (!%p10_p5) target bundleno = 2 (0x2), region = 76 }

// kernel: unet_t_forward.45
= control target key start
LH: loop header
LB: loop body
LE: loop exit
PB: predicated region body
PF: predicated region fallthrough
CT: control target
= control target key end

     0   :  { %v175_v1 = vmov 0.0   ;;  %vm176_vm0 = vmmov 0   ;;  %vm20_vm1 = vcmask 261120   ;;  %s222_s0 = inlined_call_operand.vmem [shape: bf16[16,32], index: 0, kind: input, shape index: {}]   ;;  %s223_s1 = inlined_call_operand.vmem [shape: bf16[32,32], index: 1, kind: input, shape index: {}]   ;;  %s224_s2 = inlined_call_operand.vmem [shape: f32[1,32], index: 2, kind: input, shape index: {}]   ;;  %s225_s3 = inlined_call_operand.hbm [shape: f32[16,32], index: 3, kind: output, shape index: {}]  }
   0x1   :  { %v150_v0 = vld [vmem:[%s223_s1 + $0x8] sm:$0xff]   ;;  %137 = vmatprep.subr.bf16.mxu0 %v175_v1  ;;  %v151_v2 = vld [vmem:[%s223_s1] sm:$0xff]   ;;  %141 = vmatprep.mubr.msk.bf16.mxu0 %vm176_vm0, %v175_v1  ;;  %21 = vst.msk [vmem:[#allocation2] sm:$0xff] %vm20_vm1, %v175_v1  ;;  %22 = vst.msk [vmem:[#allocation2 + $0x8] sm:$0xff] %vm20_vm1, %v175_v1 }
   0x2   :  { %138 = vmatpush3.bf16.msra.mxu0 %v150_v0 }
   0x3   :  { %139 = vmatprep.subr.bf16.mxu0 %v175_v1 }
   0x4   :  { %8 = vsyncpa [#allocation4], 0  ;;  %v152_v3 = vld [vmem:[%s222_s0] sm:$0xff]   ;;  %s177_s0 = smov [#allocation3]  }
   0x5   :  { %v133_v12 = vld [vmem:[%s224_s2] ss:$0 sm:$0xff]  ;;  %s118_s19 = sshll.u32 %s177_s0, 4  ;;  %s119_s19 = int_to_ptr.vmem [resolvable:$true] %s118_s19 }
   0x6   :  { %140 = vmatpush3.bf16.msra.mxu0 %v151_v2  ;;  %s153_s20 = scalar_lea.vmem %s119_s19, 256  ;;  %p158_p1 = scmp.lt.s32.totalorder %s119_s19, %s119_s19 }
   0x7   :  { %p154_p0 = scmp.ne.s32.totalorder %s119_s19, %s153_s20  ;;  %p159_p2 = scmp.lt.s32.totalorder %s153_s20, %s153_s20 }
   0x8   :  { %v27_v4 = vld [vmem:[#allocation2] sm:$0xff]  ;;  %v28_v8 = vld [vmem:[#allocation2 + $0x8] sm:$0xff] }
   0x9   :  { %142 = vmatmul.mubr.msk.bf16.vlgmr.msra.gmra.mxu0 %vm20_vm1, %v152_v3  ;;  %p160_p3 = por %p159_p2, %p158_p1 }
   0xb   :  { %p161_p4 = pnand %p160_p3, %p154_p0 }
  0xc9   :  { %v86_v5 = vpop.f32.mrf.mxu0 }
  0xca   :  { %v93_v6 = vadd.f32 %v86_v5, %v27_v4 }
  0xcb   :  { %v143_v7 = vpop.f32.mrf.mxu0 }
  0xcc   :  { %95 = vst.msk [vmem:[#allocation2] sm:$0xff] %vm20_vm1, %v93_v6 }
  0xcd   :  { %v89_v9 = vpop.f32.mrf.mxu0 }
  0xce   :  { %v94_v10 = vadd.f32 %v89_v9, %v28_v8 }
  0xcf   :  { %v144_v11 = vpop.f32.mrf.mxu0 }
  0xd0   :  { %96 = vst.msk [vmem:[#allocation2 + $0x8] sm:$0xff] %vm20_vm1, %v94_v10 }
  0xd3   :  { %v100_v13 = vld [vmem:[#allocation2] sm:$0xff] }
  0xd4   :  { %v109_v14 = vadd.f32 %v133_v12, %v100_v13 }
  0xd6   :  { %111 = vst.msk [vmem:[#allocation3] sm:$0xff] %vm20_vm1, %v109_v14 }
  0xd7   :  { %v101_v15 = vld [vmem:[#allocation2 + $0x8] sm:$0xff] }
  0xd8   :  { %v110_v16 = vadd.f32 %v133_v12, %v101_v15 }
  0xda   :  { %112 = vst.msk [vmem:[#allocation3 + $0x8] sm:$0xff] %vm20_vm1, %v110_v16 }
  0xdb   :  { %164 = shalt.err (!%p161_p4)
}
  0xdc   :  { %s178_s21 = smov 128   ;;  %s179_s2 = smov 8  }
  0xdd   :  { %124 = dma.vmem_to_hbm [thread:$0]  %s119_s19, 256, %s225_s3, [#allocation4], %s178_s21, %s178_s21, %s179_s2  }
  0xde   :  { %173 = dma.done.wait [#allocation4], 256  }
  0xdf   :  { %174 = vsyncadd [#allocation4], 4294967040 }
  0xe0   :  { %128 = vsyncpa [#allocation4], 1 }

// kernel: unet_t_forward.38
= control target key start
LH: loop header
LB: loop body
LE: loop exit
PB: predicated region body
PF: predicated region fallthrough
CT: control target
= control target key end

     0   :  { %vm22_vm0 = vcmask 261120   ;;  %v317_v18 = vmov 0.0   ;;  %vm241_vm1 = vcmask 257024   ;;  %s413_s1 = inlined_call_operand.vmem [shape: bf16[256,32], index: 1, kind: input, shape index: {}]   ;;  %s414_s0 = inlined_call_operand.vmem [shape: bf16[16,256], index: 0, kind: input, shape index: {}]   ;;  %s415_s3 = inlined_call_operand.vmem [shape: bf16[16,32], index: 3, kind: input, shape index: {}]   ;;  %s416_s2 = inlined_call_operand.vmem [shape: f32[1,32], index: 2, kind: input, shape index: {}]   ;;  %s417_s4 = inlined_call_operand.vmem [shape: bf16[16,32], index: 4, kind: output, shape index: {}]  }
   0x1   :  { %v298_v0 = vld [vmem:[%s413_s1 + $0x78] sm:$0xff]   ;;  %v300_v2 = vld [vmem:[%s413_s1 + $0x70] sm:$0xff]   ;;  %v302_v4 = vld [vmem:[%s413_s1 + $0x68] sm:$0xff]   ;;  %23 = vst.msk [vmem:[#allocation2] sm:$0xff] %vm22_vm0, %v317_v18 }
   0x2   :  { %v299_v1 = vld [vmem:[%s413_s1 + $0x38] sm:$0xff]   ;;  %275 = vmatprep.subr.bf16.mxu0 %v298_v0  ;;  %v301_v3 = vld [vmem:[%s413_s1 + $0x30] sm:$0xff]   ;;  %v303_v5 = vld [vmem:[%s413_s1 + $0x28] sm:$0xff]   ;;  %24 = vst.msk [vmem:[#allocation2 + $0x8] sm:$0xff] %vm22_vm0, %v317_v18 }
   0x3   :  { %276 = vmatpush3.bf16.msra.mxu0 %v299_v1  ;;  %v304_v6 = vld [vmem:[%s413_s1 + $0x60] sm:$0xff]   ;;  %v306_v8 = vld [vmem:[%s413_s1 + $0x58] sm:$0xff]   ;;  %v308_v10 = vld [vmem:[%s413_s1 + $0x50] sm:$0xff]  }
   0x4   :  { %277 = vmatprep.subr.bf16.mxu0 %v300_v2  ;;  %v305_v7 = vld [vmem:[%s413_s1 + $0x20] sm:$0xff]   ;;  %v307_v9 = vld [vmem:[%s413_s1 + $0x18] sm:$0xff]   ;;  %v309_v12 = vld [vmem:[%s413_s1 + $0x10] sm:$0xff]  }
   0x5   :  { %v316_v11 = vld [vmem:[%s414_s0 + $0x4] ss:$8 sps:$4 sm:$0xff]   ;;  %v314_v17 = vld [vmem:[%s414_s0] ss:$8 sps:$4 sm:$0xff]  }
   0x6   :  { %199 = vmatprep.mubr.bf16.mxu0 %v316_v11  ;;  %v310_v13 = vld [vmem:[%s413_s1 + $0x48] sm:$0xff]   ;;  %v312_v15 = vld [vmem:[%s413_s1 + $0x40] sm:$0xff]  }
   0x7   :  { %278 = vmatpush3.bf16.msra.mxu0 %v301_v3  ;;  %v311_v14 = vld [vmem:[%s413_s1 + $0x8] sm:$0xff]   ;;  %v313_v16 = vld [vmem:[%s413_s1] sm:$0xff]  }
   0x8   :  { %279 = vmatprep.subr.bf16.mxu0 %v302_v4  ;;  %v57_v20 = vld [vmem:[#allocation2] sm:$0xff] }
   0x9   :  { %v58_v25 = vld [vmem:[#allocation2 + $0x8] sm:$0xff]  ;;  %v272_v29 = vld [vmem:[%s415_s3] sm:$0xff]  }
   0xa   :  { %v266_v30 = vld [vmem:[%s416_s2] ss:$0 sm:$0xff]  ;;  %v273_v31 = vunpack.c.l.bf16 %v272_v29  ;;  %v274_v35 = vunpack.c.h.bf16 %v272_v29 }
   0xb   :  { %280 = vmatpush3.bf16.msra.mxu0 %v303_v5 }
   0xc   :  { %281 = vmatprep.subr.bf16.mxu0 %v304_v6 }
   0xf   :  { %282 = vmatpush3.bf16.msra.mxu0 %v305_v7 }
  0x10   :  { %283 = vmatprep.subr.bf16.mxu0 %v306_v8 }
  0x13   :  { %284 = vmatpush3.bf16.msra.mxu0 %v307_v9 }
  0x14   :  { %285 = vmatprep.subr.bf16.mxu0 %v308_v10 }
  0x17   :  { %286 = vmatpush3.bf16.msra.mxu0 %v309_v12 }
  0x18   :  { %287 = vmatprep.subr.bf16.mxu0 %v310_v13 }
  0x1b   :  { %288 = vmatpush3.bf16.msra.mxu0 %v311_v14 }
  0x1c   :  { %289 = vmatprep.subr.bf16.mxu0 %v312_v15 }
  0x1f   :  { %290 = vmatpush3.bf16.msra.mxu0 %v313_v16 }
  0x22   :  { %200 = vmatmul.mubr.bf16.vlgmr.msra.gmra.mxu0 %v314_v17 }
  0xe2   :  { %v291_v19 = vpop.f32.mrf.mxu0 }
  0xe4   :  { %v292_v21 = vpop.f32.mrf.mxu0 }
  0xe5   :  { %v293_v22 = vadd.f32 %v292_v21, %v291_v19 }
  0xe6   :  { %v294_v23 = vpop.f32.mrf.mxu0 }
  0xe7   :  { %v208_v24 = vadd.f32 %v293_v22, %v57_v20 }
  0xe8   :  { %v295_v26 = vpop.f32.mrf.mxu0 }
  0xe9   :  { %211 = vst.msk [vmem:[#allocation2] sm:$0xff] %vm22_vm0, %v208_v24  ;;  %v296_v27 = vadd.f32 %v295_v26, %v294_v23 }
  0xeb   :  { %v209_v28 = vadd.f32 %v296_v27, %v58_v25 }
  0xed   :  { %212 = vst.msk [vmem:[#allocation2 + $0x8] sm:$0xff] %vm22_vm0, %v209_v28 }
  0xf0   :  { %v216_v32 = vld [vmem:[#allocation2] sm:$0xff] }
  0xf1   :  { %v225_v33 = vadd.f32 %v266_v30, %v216_v32 }
  0xf3   :  { %v231_v34 = vadd.f32 %v273_v31, %v225_v33 }
  0xf4   :  { %v217_v36 = vld [vmem:[#allocation2 + $0x8] sm:$0xff] }
  0xf5   :  { %v269_v37 = vpack.c.bf16 %v231_v34, %v231_v34  ;;  %v226_v38 = vadd.f32 %v266_v30, %v217_v36 }
  0xf7   :  { %242 = vst.msk [vmem:[%s417_s4] sm:$0xf] %vm241_vm1, %v269_v37  ;;  %v232_v39 = vadd.f32 %v274_v35, %v226_v38 }
  0xf9   :  { %v270_v40 = vpack.c.bf16 %v232_v39, %v232_v39 }
  0xfb   :  { %243 = vst.msk [vmem:[%s417_s4 + $0x4] sm:$0xf] %vm241_vm1, %v270_v40 }

</bundles_post_ra>
